<compile_context>
chip_gen: v7x
topology: tpu7x:2x2x1
jax: 0.10.0
libtpu: 0.0.40
codegen_flags: <defaults>
</compile_context>

<pallas_src>
import functools
import math

import jax
import jax.numpy as jnp
from jax import lax
from jax.experimental import pallas as pl
from jax.experimental.pallas import tpu as pltpu


def _round_up(x, m):
    return ((x + m - 1) // m) * m


def _layernorm(x, g, b, eps):
    x = x.astype(jnp.float32)
    mean = jnp.mean(x, axis=-1, keepdims=True)
    var = jnp.mean((x - mean) ** 2, axis=-1, keepdims=True)
    return (x - mean) * lax.rsqrt(var + eps) * g + b


# ---------------------------------------------------------------------------
# One fused kernel: whole ViT encoder + pooler for a single batch element
# ---------------------------------------------------------------------------
def _vit_fused_kernel(patches_ref, patch_w_ref, patch_b_ref, cls_ref, pos_ref,
                      ln1_g_ref, ln1_b_ref, wqkv_ref, bqkv_ref, wo_ref, bo_ref,
                      ln2_g_ref, ln2_b_ref, w1_ref, b1_ref, w2_ref, b2_ref,
                      lnf_g_ref, lnf_b_ref, pool_w_ref, pool_b_ref,
                      out_ref,
                      tok_scr, attn_scr,
                      *, layers, heads, dh, s_real, eps):
    s_pad, d_model = tok_scr.shape

    # ---- patch embedding: one matmul for all patches of this batch element
    patches = patches_ref[0].astype(jnp.float32)                  # (N, C*p*p)
    emb = jnp.dot(patches, patch_w_ref[...],
                  preferred_element_type=jnp.float32) + patch_b_ref[...]

    # ---- token assembly in VMEM: [CLS] + patch tokens + zero pad, + pos emb
    n_patches = emb.shape[0]
    tok_scr[...] = pos_ref[...]                  # padded pos rows are zero
    tok_scr[0:1, :] = tok_scr[0:1, :] + cls_ref[...]
    tok_scr[1:1 + n_patches, :] = tok_scr[1:1 + n_patches, :] + emb
    x = tok_scr[...]                                              # (S_pad, D)

    # ---- additive key-padding bias: keys >= s_real are masked in softmax
    key_idx = lax.broadcasted_iota(jnp.int32, (s_pad, s_pad), 1)
    key_bias = jnp.where(key_idx < s_real, 0.0, -1e30).astype(jnp.float32)

    scale = 1.0 / math.sqrt(dh)

    for l in range(layers):          # unrolled; layer weights stay in VMEM
        # --- self-attention block (pre-norm) ---
        resid = x
        h_ln = _layernorm(x, ln1_g_ref[l], ln1_b_ref[l], eps)
        qkv = jnp.dot(h_ln, wqkv_ref[l],
                      preferred_element_type=jnp.float32) + bqkv_ref[l]
        q = qkv[:, 0:d_model]
        k = qkv[:, d_model:2 * d_model]
        v = qkv[:, 2 * d_model:3 * d_model]
        for h in range(heads):       # unrolled per-head attention, all in VMEM
            lo, hi = h * dh, (h + 1) * dh
            qh, kh, vh = q[:, lo:hi], k[:, lo:hi], v[:, lo:hi]
            s = lax.dot_general(qh, kh, (((1,), (1,)), ((), ())),
                                preferred_element_type=jnp.float32)
            s = s * scale + key_bias
            m = jnp.max(s, axis=-1, keepdims=True)
            p = jnp.exp(s - m)
            p = p * pl.reciprocal(jnp.sum(p, axis=-1, keepdims=True),
                                  approx=True)
            attn_scr[:, lo:hi] = jnp.dot(p, vh,
                                         preferred_element_type=jnp.float32)
        attn = jnp.dot(attn_scr[...], wo_ref[l],
                       preferred_element_type=jnp.float32) + bo_ref[l]
        x = resid + attn

        # --- MLP block (pre-norm) ---
        resid = x
        h_ln = _layernorm(x, ln2_g_ref[l], ln2_b_ref[l], eps)
        h1 = jnp.dot(h_ln, w1_ref[l],
                     preferred_element_type=jnp.float32) + b1_ref[l]
        # TODO(synk): HF ViT uses exact erf-GELU; tanh-approx GELU used here.
        h1 = jax.nn.gelu(h1, approximate=True)
        h2 = jnp.dot(h1, w2_ref[l],
                     preferred_element_type=jnp.float32) + b2_ref[l]
        x = resid + h2

    # ---- final layernorm, CLS extraction and tanh pooler (all in-kernel) ----
    xf = _layernorm(x, lnf_g_ref[...], lnf_b_ref[...], eps)
    cls_tok = xf[0:1, :]                                          # (1, D)
    pooled = jnp.tanh(jnp.dot(cls_tok, pool_w_ref[...],
                              preferred_element_type=jnp.float32)
                      + pool_b_ref[...])
    out_ref[0] = pooled.astype(out_ref.dtype)


# ---------------------------------------------------------------------------
# Wrapper: one pallas_call for the whole forward pass, grid over batch
# ---------------------------------------------------------------------------
def vit_pooler_forward(image, params, cfg):
    B, C, H, W = image.shape
    p = cfg["patch"]
    D = cfg["hidden"]
    heads = cfg["heads"]
    dh = D // heads
    L = cfg["layers"]
    nH, nW = H // p, W // p
    N = nH * nW
    Cpp = C * p * p
    S_real = N + 1
    S_pad = _round_up(S_real, 8)

    # Unfold NCHW into patch vectors (ordering matches a flattened Conv2d
    # weight [D, C, p, p]).  Single XLA op; everything else is one kernel.
    patches = (image.reshape(B, C, nH, p, nW, p)
                    .transpose(0, 2, 4, 1, 3, 5)
                    .reshape(B, N, Cpp))

    def resident(a):  # full-array VMEM-resident block, same for every step
        nd = a.ndim
        return pl.BlockSpec(a.shape, lambda b, _nd=nd: (0,) * _nd)

    weight_args = (
        params["patch_w"], params["patch_b"], params["cls"], params["pos"],
        params["ln1_g"], params["ln1_b"], params["wqkv"], params["bqkv"],
        params["wo"], params["bo"], params["ln2_g"], params["ln2_b"],
        params["w1"], params["b1"], params["w2"], params["b2"],
        params["lnf_g"], params["lnf_b"], params["pool_w"], params["pool_b"],
    )

    kernel = functools.partial(_vit_fused_kernel, layers=L, heads=heads,
                               dh=dh, s_real=S_real, eps=1e-12)

    out = pl.pallas_call(
        kernel,
        out_shape=jax.ShapeDtypeStruct((B, 1, D), jnp.float32),
        grid=(B,),
        in_specs=[pl.BlockSpec((1, N, Cpp), lambda b: (b, 0, 0))]
                 + [resident(a) for a in weight_args],
        out_specs=pl.BlockSpec((1, 1, D), lambda b: (b, 0, 0)),
        scratch_shapes=[pltpu.VMEM((S_pad, D), jnp.float32),   # token slab
                        pltpu.VMEM((S_pad, D), jnp.float32)],  # attn output
        compiler_params=pltpu.CompilerParams(
            dimension_semantics=("parallel",)),
    )(patches, *weight_args)
    return out[:, 0, :]                                           # (B, D)


# ---------------------------------------------------------------------------
# Deterministic parameter init (synthetic, no checkpoint); QKV pre-fused,
# per-layer weights stacked on a leading layer axis, pos pre-padded to S_pad.
# ---------------------------------------------------------------------------
def init_params(key, cfg, s_pad):
    D = cfg["hidden"]
    I = cfg["inter"]
    C = cfg["channels"]
    p = cfg["patch"]
    L = cfg["layers"]
    N = (cfg["image"] // p) ** 2
    S_real = N + 1

    def nrm(k, shape, scale=0.02):
        return scale * jax.random.normal(k, shape, dtype=jnp.float32)

    keys = iter(jax.random.split(key, 16))
    pos = jnp.zeros((s_pad, D), jnp.float32)
    pos = pos.at[:S_real].set(nrm(next(keys), (S_real, D)))

    return {
        "patch_w": nrm(next(keys), (C * p * p, D)),
        "patch_b": jnp.zeros((1, D), jnp.float32),
        "cls": nrm(next(keys), (1, D)),
        "pos": pos,
        "ln1_g": jnp.ones((L, 1, D), jnp.float32),
        "ln1_b": jnp.zeros((L, 1, D), jnp.float32),
        "wqkv": nrm(next(keys), (L, D, 3 * D)),        # fused Wq|Wk|Wv
        "bqkv": jnp.zeros((L, 1, 3 * D), jnp.float32),
        "wo": nrm(next(keys), (L, D, D)),
        "bo": jnp.zeros((L, 1, D), jnp.float32),
        "ln2_g": jnp.ones((L, 1, D), jnp.float32),
        "ln2_b": jnp.zeros((L, 1, D), jnp.float32),
        "w1": nrm(next(keys), (L, D, I)),
        "b1": jnp.zeros((L, 1, I), jnp.float32),
        "w2": nrm(next(keys), (L, I, D)),
        "b2": jnp.zeros((L, 1, D), jnp.float32),
        "lnf_g": jnp.ones((1, D), jnp.float32),
        "lnf_b": jnp.zeros((1, D), jnp.float32),
        "pool_w": nrm(next(keys), (D, D)),
        "pool_b": jnp.zeros((1, D), jnp.float32),
    }


if __name__ == "__main__":
    cfg = dict(image=16, patch=4, channels=3, hidden=32, heads=4,
               inter=64, layers=2)
    S_real = (cfg["image"] // cfg["patch"]) ** 2 + 1
    S_pad = _round_up(S_real, 8)

    key = jax.random.PRNGKey(0)
    k_img, k_par = jax.random.split(key)
    image = jax.random.normal(
        k_img, (2, cfg["channels"], cfg["image"], cfg["image"]), jnp.float32)
    params = init_params(k_par, cfg, S_pad)

    pooled = jax.jit(functools.partial(vit_pooler_forward, cfg=cfg))(image,
                                                                     params)
    pooled = jax.block_until_ready(pooled)

    assert pooled.shape == (2, cfg["hidden"])
    assert bool(jnp.all(jnp.isfinite(pooled)))
    print("KERNEL_OK")
</pallas_src>

<mosaic_0001>
module attributes {stable_mosaic.version = 11 : i64} {
  func.func @_vit_fused_kernel(%arg0: i32, %arg1: memref<1x16x48xf32, #tpu.memory_space<vmem>>, %arg2: memref<48x32xf32, #tpu.memory_space<vmem>>, %arg3: memref<1x32xf32, #tpu.memory_space<vmem>>, %arg4: memref<1x32xf32, #tpu.memory_space<vmem>>, %arg5: memref<24x32xf32, #tpu.memory_space<vmem>>, %arg6: memref<2x1x32xf32, #tpu.memory_space<vmem>>, %arg7: memref<2x1x32xf32, #tpu.memory_space<vmem>>, %arg8: memref<2x32x96xf32, #tpu.memory_space<vmem>>, %arg9: memref<2x1x96xf32, #tpu.memory_space<vmem>>, %arg10: memref<2x32x32xf32, #tpu.memory_space<vmem>>, %arg11: memref<2x1x32xf32, #tpu.memory_space<vmem>>, %arg12: memref<2x1x32xf32, #tpu.memory_space<vmem>>, %arg13: memref<2x1x32xf32, #tpu.memory_space<vmem>>, %arg14: memref<2x32x64xf32, #tpu.memory_space<vmem>>, %arg15: memref<2x1x64xf32, #tpu.memory_space<vmem>>, %arg16: memref<2x64x32xf32, #tpu.memory_space<vmem>>, %arg17: memref<2x1x32xf32, #tpu.memory_space<vmem>>, %arg18: memref<1x32xf32, #tpu.memory_space<vmem>>, %arg19: memref<1x32xf32, #tpu.memory_space<vmem>>, %arg20: memref<32x32xf32, #tpu.memory_space<vmem>>, %arg21: memref<1x32xf32, #tpu.memory_space<vmem>>, %arg22: memref<1x1x32xf32, #tpu.memory_space<vmem>>, %arg23: memref<24x32xf32, #tpu.memory_space<vmem>>, %arg24: memref<24x32xf32, #tpu.memory_space<vmem>>) attributes {dimension_semantics = [#tpu.dimension_semantics<parallel>], iteration_bounds = array<i64: 2>, scalar_prefetch = 0 : i64, scratch_operands = 2 : i64, tpu.core_type = #tpu.core_type<tc>, window_params = [{transform_indices = @transform_0, window_bounds = array<i64: 1, 16, 48>}, {pipeline_mode = #tpu.pipeline_mode<synchronous>, transform_indices = @transform_1, window_bounds = array<i64: 48, 32>}, {pipeline_mode = #tpu.pipeline_mode<synchronous>, transform_indices = @transform_2, window_bounds = array<i64: 1, 32>}, {pipeline_mode = #tpu.pipeline_mode<synchronous>, transform_indices = @transform_3, window_bounds = array<i64: 1, 32>}, {pipeline_mode = #tpu.pipeline_mode<synchronous>, transform_indices = @transform_4, window_bounds = array<i64: 24, 32>}, {pipeline_mode = #tpu.pipeline_mode<synchronous>, transform_indices = @transform_5, window_bounds = array<i64: 2, 1, 32>}, {pipeline_mode = #tpu.pipeline_mode<synchronous>, transform_indices = @transform_6, window_bounds = array<i64: 2, 1, 32>}, {pipeline_mode = #tpu.pipeline_mode<synchronous>, transform_indices = @transform_7, window_bounds = array<i64: 2, 32, 96>}, {pipeline_mode = #tpu.pipeline_mode<synchronous>, transform_indices = @transform_8, window_bounds = array<i64: 2, 1, 96>}, {pipeline_mode = #tpu.pipeline_mode<synchronous>, transform_indices = @transform_9, window_bounds = array<i64: 2, 32, 32>}, {pipeline_mode = #tpu.pipeline_mode<synchronous>, transform_indices = @transform_10, window_bounds = array<i64: 2, 1, 32>}, {pipeline_mode = #tpu.pipeline_mode<synchronous>, transform_indices = @transform_11, window_bounds = array<i64: 2, 1, 32>}, {pipeline_mode = #tpu.pipeline_mode<synchronous>, transform_indices = @transform_12, window_bounds = array<i64: 2, 1, 32>}, {pipeline_mode = #tpu.pipeline_mode<synchronous>, transform_indices = @transform_13, window_bounds = array<i64: 2, 32, 64>}, {pipeline_mode = #tpu.pipeline_mode<synchronous>, transform_indices = @transform_14, window_bounds = array<i64: 2, 1, 64>}, {pipeline_mode = #tpu.pipeline_mode<synchronous>, transform_indices = @transform_15, window_bounds = array<i64: 2, 64, 32>}, {pipeline_mode = #tpu.pipeline_mode<synchronous>, transform_indices = @transform_16, window_bounds = array<i64: 2, 1, 32>}, {pipeline_mode = #tpu.pipeline_mode<synchronous>, transform_indices = @transform_17, window_bounds = array<i64: 1, 32>}, {pipeline_mode = #tpu.pipeline_mode<synchronous>, transform_indices = @transform_18, window_bounds = array<i64: 1, 32>}, {pipeline_mode = #tpu.pipeline_mode<synchronous>, transform_indices = @transform_19, window_bounds = array<i64: 32, 32>}, {pipeline_mode = #tpu.pipeline_mode<synchronous>, transform_indices = @transform_20, window_bounds = array<i64: 1, 32>}, {transform_indices = @transform_21, window_bounds = array<i64: 1, 1, 32>}]} {
    %c0 = arith.constant 0 : index
    %c0_0 = arith.constant 0 : index
    %c0_1 = arith.constant 0 : index
    %0 = vector.load %arg1[%c0, %c0_0, %c0_1] : memref<1x16x48xf32, #tpu.memory_space<vmem>>, vector<1x16x48xf32>
    %1 = vector.shape_cast %0 : vector<1x16x48xf32> to vector<16x48xf32>
    %c0_2 = arith.constant 0 : index
    %c0_3 = arith.constant 0 : index
    %2 = vector.load %arg2[%c0_2, %c0_3] : memref<48x32xf32, #tpu.memory_space<vmem>>, vector<48x32xf32>
    %cst = arith.constant dense<0.000000e+00> : vector<16x32xf32>
    %3 = tpu.matmul %1, %2, %cst {dimension_numbers = #tpu.dot_dimension_numbers<[1], [0], [0], [1], [0, 0, 1, 1], [], []>} : vector<16x48xf32>, vector<48x32xf32>, vector<16x32xf32> -> vector<16x32xf32>
    %c0_4 = arith.constant 0 : index
    %c0_5 = arith.constant 0 : index
    %4 = vector.load %arg3[%c0_4, %c0_5] : memref<1x32xf32, #tpu.memory_space<vmem>>, vector<1x32xf32>
    %5 = vector.broadcast %4 : vector<1x32xf32> to vector<16x32xf32>
    %6 = arith.addf %3, %5 : vector<16x32xf32>
    %c0_6 = arith.constant 0 : index
    %c0_7 = arith.constant 0 : index
    %7 = vector.load %arg5[%c0_6, %c0_7] : memref<24x32xf32, #tpu.memory_space<vmem>>, vector<24x32xf32>
    %c0_8 = arith.constant 0 : index
    %c0_9 = arith.constant 0 : index
    %8 = vector.load %arg23[%c0_8, %c0_9] : memref<24x32xf32, #tpu.memory_space<vmem>>, vector<24x32xf32>
    tpu.vector_store %arg23[%c0_8, %c0_9], %7 {strides = array<i32>} : memref<24x32xf32, #tpu.memory_space<vmem>>, vector<24x32xf32>,
    %c0_10 = arith.constant 0 : index
    %c0_11 = arith.constant 0 : index
    %9 = vector.load %arg23[%c0_10, %c0_11] : memref<24x32xf32, #tpu.memory_space<vmem>>, vector<1x32xf32>
    %c0_12 = arith.constant 0 : index
    %c0_13 = arith.constant 0 : index
    %10 = vector.load %arg4[%c0_12, %c0_13] : memref<1x32xf32, #tpu.memory_space<vmem>>, vector<1x32xf32>
    %11 = arith.addf %9, %10 : vector<1x32xf32>
    %c0_14 = arith.constant 0 : index
    %c0_15 = arith.constant 0 : index
    %12 = vector.load %arg23[%c0_14, %c0_15] : memref<24x32xf32, #tpu.memory_space<vmem>>, vector<1x32xf32>
    tpu.vector_store %arg23[%c0_14, %c0_15], %11 {strides = array<i32>} : memref<24x32xf32, #tpu.memory_space<vmem>>, vector<1x32xf32>,
    %c1 = arith.constant 1 : index
    %c0_16 = arith.constant 0 : index
    %13 = vector.load %arg23[%c1, %c0_16] : memref<24x32xf32, #tpu.memory_space<vmem>>, vector<16x32xf32>
    %14 = arith.addf %13, %6 : vector<16x32xf32>
    %c1_17 = arith.constant 1 : index
    %c0_18 = arith.constant 0 : index
    %15 = vector.load %arg23[%c1_17, %c0_18] : memref<24x32xf32, #tpu.memory_space<vmem>>, vector<16x32xf32>
    tpu.vector_store %arg23[%c1_17, %c0_18], %14 {strides = array<i32>} : memref<24x32xf32, #tpu.memory_space<vmem>>, vector<16x32xf32>,
    %c0_19 = arith.constant 0 : index
    %c0_20 = arith.constant 0 : index
    %16 = vector.load %arg23[%c0_19, %c0_20] : memref<24x32xf32, #tpu.memory_space<vmem>>, vector<24x32xf32>
    %17 = tpu.iota {dimensions = array<i32: 1>} : vector<24x24xi32>
    %c17_i32 = arith.constant 17 : i32
    %18 = vector.broadcast %c17_i32 : i32 to vector<24x24xi32>
    %19 = arith.cmpi slt, %17, %18 : vector<24x24xi32>
    %cst_21 = arith.constant 0.000000e+00 : f32
    %cst_22 = arith.constant -1.000000e+30 : f32
    %20 = vector.broadcast %cst_21 : f32 to vector<24x24xf32>
    %21 = vector.broadcast %cst_22 : f32 to vector<24x24xf32>
    %22 = arith.select %19, %20, %21 : vector<24x24xi1>, vector<24x24xf32>
    %c0_23 = arith.constant 0 : index
    %c0_24 = arith.constant 0 : index
    %c0_25 = arith.constant 0 : index
    %23 = vector.load %arg6[%c0_23, %c0_24, %c0_25] : memref<2x1x32xf32, #tpu.memory_space<vmem>>, vector<1x1x32xf32>
    %24 = vector.shape_cast %23 : vector<1x1x32xf32> to vector<1x32xf32>
    %c0_26 = arith.constant 0 : index
    %c0_27 = arith.constant 0 : index
    %c0_28 = arith.constant 0 : index
    %25 = vector.load %arg7[%c0_26, %c0_27, %c0_28] : memref<2x1x32xf32, #tpu.memory_space<vmem>>, vector<1x1x32xf32>
    %26 = vector.shape_cast %25 : vector<1x1x32xf32> to vector<1x32xf32>
    %cst_29 = arith.constant dense<0.000000e+00> : vector<24xf32>
    %27 = vector.multi_reduction <add>, %16, %cst_29 [1] : vector<24x32xf32> to vector<24xf32>
    %28 = vector.shape_cast %27 : vector<24xf32> to vector<24x1xf32>
    %cst_30 = arith.constant 3.200000e+01 : f32
    %29 = vector.broadcast %cst_30 : f32 to vector<24x1xf32>
    %30 = arith.divf %28, %29 : vector<24x1xf32>
    %31 = vector.broadcast %30 : vector<24x1xf32> to vector<24x32xf32>
    %32 = arith.subf %16, %31 : vector<24x32xf32>
    %33 = arith.mulf %32, %32 : vector<24x32xf32>
    %cst_31 = arith.constant dense<0.000000e+00> : vector<24xf32>
    %34 = vector.multi_reduction <add>, %33, %cst_31 [1] : vector<24x32xf32> to vector<24xf32>
    %35 = vector.shape_cast %34 : vector<24xf32> to vector<24x1xf32>
    %cst_32 = arith.constant 3.200000e+01 : f32
    %36 = vector.broadcast %cst_32 : f32 to vector<24x1xf32>
    %37 = arith.divf %35, %36 : vector<24x1xf32>
    %38 = vector.broadcast %30 : vector<24x1xf32> to vector<24x32xf32>
    %39 = arith.subf %16, %38 : vector<24x32xf32>
    %cst_33 = arith.constant 9.99999996E-13 : f32
    %40 = vector.broadcast %cst_33 : f32 to vector<24x1xf32>
    %41 = arith.addf %37, %40 : vector<24x1xf32>
    %42 = math.rsqrt %41 : vector<24x1xf32>
    %43 = vector.broadcast %42 : vector<24x1xf32> to vector<24x32xf32>
    %44 = arith.mulf %39, %43 : vector<24x32xf32>
    %45 = vector.broadcast %24 : vector<1x32xf32> to vector<24x32xf32>
    %46 = arith.mulf %44, %45 : vector<24x32xf32>
    %47 = vector.broadcast %26 : vector<1x32xf32> to vector<24x32xf32>
    %48 = arith.addf %46, %47 : vector<24x32xf32>
    %c0_34 = arith.constant 0 : index
    %c0_35 = arith.constant 0 : index
    %c0_36 = arith.constant 0 : index
    %49 = vector.load %arg8[%c0_34, %c0_35, %c0_36] : memref<2x32x96xf32, #tpu.memory_space<vmem>>, vector<1x32x96xf32>
    %50 = vector.shape_cast %49 : vector<1x32x96xf32> to vector<32x96xf32>
    %cst_37 = arith.constant dense<0.000000e+00> : vector<24x96xf32>
    %51 = tpu.matmul %48, %50, %cst_37 {dimension_numbers = #tpu.dot_dimension_numbers<[1], [0], [0], [1], [0, 0, 1, 1], [], []>} : vector<24x32xf32>, vector<32x96xf32>, vector<24x96xf32> -> vector<24x96xf32>
    %c0_38 = arith.constant 0 : index
    %c0_39 = arith.constant 0 : index
    %c0_40 = arith.constant 0 : index
    %52 = vector.load %arg9[%c0_38, %c0_39, %c0_40] : memref<2x1x96xf32, #tpu.memory_space<vmem>>, vector<1x1x96xf32>
    %53 = vector.shape_cast %52 : vector<1x1x96xf32> to vector<1x96xf32>
    %54 = vector.broadcast %53 : vector<1x96xf32> to vector<24x96xf32>
    %55 = arith.addf %51, %54 : vector<24x96xf32>
    %56 = vector.extract_strided_slice %55 {offsets = [0, 0], sizes = [24, 32], strides = [1, 1]} : vector<24x96xf32> to vector<24x32xf32>
    %57 = vector.extract_strided_slice %55 {offsets = [0, 32], sizes = [24, 32], strides = [1, 1]} : vector<24x96xf32> to vector<24x32xf32>
    %58 = vector.extract_strided_slice %55 {offsets = [0, 64], sizes = [24, 32], strides = [1, 1]} : vector<24x96xf32> to vector<24x32xf32>
    %59 = vector.extract_strided_slice %56 {offsets = [0, 0], sizes = [24, 8], strides = [1, 1]} : vector<24x32xf32> to vector<24x8xf32>
    %60 = vector.extract_strided_slice %57 {offsets = [0, 0], sizes = [24, 8], strides = [1, 1]} : vector<24x32xf32> to vector<24x8xf32>
    %61 = vector.extract_strided_slice %58 {offsets = [0, 0], sizes = [24, 8], strides = [1, 1]} : vector<24x32xf32> to vector<24x8xf32>
    %cst_41 = arith.constant dense<0.000000e+00> : vector<24x24xf32>
    %62 = tpu.matmul %59, %60, %cst_41 {dimension_numbers = #tpu.dot_dimension_numbers<[1], [1], [0], [0], [0, 0, 1, 0], [], []>} : vector<24x8xf32>, vector<24x8xf32>, vector<24x24xf32> -> vector<24x24xf32>
    %cst_42 = arith.constant 0.353553385 : f32
    %63 = vector.broadcast %cst_42 : f32 to vector<24x24xf32>
    %64 = arith.mulf %62, %63 : vector<24x24xf32>
    %65 = arith.addf %64, %22 : vector<24x24xf32>
    %cst_43 = arith.constant dense<0xFF800000> : vector<24xf32>
    %66 = vector.multi_reduction <maximumf>, %65, %cst_43 [1] : vector<24x24xf32> to vector<24xf32>
    %67 = vector.shape_cast %66 : vector<24xf32> to vector<24x1xf32>
    %68 = vector.broadcast %67 : vector<24x1xf32> to vector<24x24xf32>
    %69 = arith.subf %65, %68 : vector<24x24xf32>
    %70 = math.exp %69 : vector<24x24xf32>
    %cst_44 = arith.constant dense<0.000000e+00> : vector<24xf32>
    %71 = vector.multi_reduction <add>, %70, %cst_44 [1] : vector<24x24xf32> to vector<24xf32>
    %72 = vector.shape_cast %71 : vector<24xf32> to vector<24x1xf32>
    %73 = tpu.reciprocal %72 {approx = true} : vector<24x1xf32> -> vector<24x1xf32>
    %74 = vector.broadcast %73 : vector<24x1xf32> to vector<24x24xf32>
    %75 = arith.mulf %70, %74 : vector<24x24xf32>
    %cst_45 = arith.constant dense<0.000000e+00> : vector<24x8xf32>
    %76 = tpu.matmul %75, %61, %cst_45 {dimension_numbers = #tpu.dot_dimension_numbers<[1], [0], [0], [1], [0, 0, 1, 1], [], []>} : vector<24x24xf32>, vector<24x8xf32>, vector<24x8xf32> -> vector<24x8xf32>
    %c0_46 = arith.constant 0 : index
    %c0_47 = arith.constant 0 : index
    %77 = vector.load %arg24[%c0_46, %c0_47] : memref<24x32xf32, #tpu.memory_space<vmem>>, vector<24x8xf32>
    tpu.vector_store %arg24[%c0_46, %c0_47], %76 {strides = array<i32>} : memref<24x32xf32, #tpu.memory_space<vmem>>, vector<24x8xf32>,
    %78 = vector.extract_strided_slice %56 {offsets = [0, 8], sizes = [24, 8], strides = [1, 1]} : vector<24x32xf32> to vector<24x8xf32>
    %79 = vector.extract_strided_slice %57 {offsets = [0, 8], sizes = [24, 8], strides = [1, 1]} : vector<24x32xf32> to vector<24x8xf32>
    %80 = vector.extract_strided_slice %58 {offsets = [0, 8], sizes = [24, 8], strides = [1, 1]} : vector<24x32xf32> to vector<24x8xf32>
    %cst_48 = arith.constant dense<0.000000e+00> : vector<24x24xf32>
    %81 = tpu.matmul %78, %79, %cst_48 {dimension_numbers = #tpu.dot_dimension_numbers<[1], [1], [0], [0], [0, 0, 1, 0], [], []>} : vector<24x8xf32>, vector<24x8xf32>, vector<24x24xf32> -> vector<24x24xf32>
    %cst_49 = arith.constant 0.353553385 : f32
    %82 = vector.broadcast %cst_49 : f32 to vector<24x24xf32>
    %83 = arith.mulf %81, %82 : vector<24x24xf32>
    %84 = arith.addf %83, %22 : vector<24x24xf32>
    %cst_50 = arith.constant dense<0xFF800000> : vector<24xf32>
    %85 = vector.multi_reduction <maximumf>, %84, %cst_50 [1] : vector<24x24xf32> to vector<24xf32>
    %86 = vector.shape_cast %85 : vector<24xf32> to vector<24x1xf32>
    %87 = vector.broadcast %86 : vector<24x1xf32> to vector<24x24xf32>
    %88 = arith.subf %84, %87 : vector<24x24xf32>
    %89 = math.exp %88 : vector<24x24xf32>
    %cst_51 = arith.constant dense<0.000000e+00> : vector<24xf32>
    %90 = vector.multi_reduction <add>, %89, %cst_51 [1] : vector<24x24xf32> to vector<24xf32>
    %91 = vector.shape_cast %90 : vector<24xf32> to vector<24x1xf32>
    %92 = tpu.reciprocal %91 {approx = true} : vector<24x1xf32> -> vector<24x1xf32>
    %93 = vector.broadcast %92 : vector<24x1xf32> to vector<24x24xf32>
    %94 = arith.mulf %89, %93 : vector<24x24xf32>
    %cst_52 = arith.constant dense<0.000000e+00> : vector<24x8xf32>
    %95 = tpu.matmul %94, %80, %cst_52 {dimension_numbers = #tpu.dot_dimension_numbers<[1], [0], [0], [1], [0, 0, 1, 1], [], []>} : vector<24x24xf32>, vector<24x8xf32>, vector<24x8xf32> -> vector<24x8xf32>
    %c0_53 = arith.constant 0 : index
    %c8 = arith.constant 8 : index
    %96 = vector.load %arg24[%c0_53, %c8] : memref<24x32xf32, #tpu.memory_space<vmem>>, vector<24x8xf32>
    tpu.vector_store %arg24[%c0_53, %c8], %95 {strides = array<i32>} : memref<24x32xf32, #tpu.memory_space<vmem>>, vector<24x8xf32>,
    %97 = vector.extract_strided_slice %56 {offsets = [0, 16], sizes = [24, 8], strides = [1, 1]} : vector<24x32xf32> to vector<24x8xf32>
    %98 = vector.extract_strided_slice %57 {offsets = [0, 16], sizes = [24, 8], strides = [1, 1]} : vector<24x32xf32> to vector<24x8xf32>
    %99 = vector.extract_strided_slice %58 {offsets = [0, 16], sizes = [24, 8], strides = [1, 1]} : vector<24x32xf32> to vector<24x8xf32>
    %cst_54 = arith.constant dense<0.000000e+00> : vector<24x24xf32>
    %100 = tpu.matmul %97, %98, %cst_54 {dimension_numbers = #tpu.dot_dimension_numbers<[1], [1], [0], [0], [0, 0, 1, 0], [], []>} : vector<24x8xf32>, vector<24x8xf32>, vector<24x24xf32> -> vector<24x24xf32>
    %cst_55 = arith.constant 0.353553385 : f32
    %101 = vector.broadcast %cst_55 : f32 to vector<24x24xf32>
    %102 = arith.mulf %100, %101 : vector<24x24xf32>
    %103 = arith.addf %102, %22 : vector<24x24xf32>
    %cst_56 = arith.constant dense<0xFF800000> : vector<24xf32>
    %104 = vector.multi_reduction <maximumf>, %103, %cst_56 [1] : vector<24x24xf32> to vector<24xf32>
    %105 = vector.shape_cast %104 : vector<24xf32> to vector<24x1xf32>
    %106 = vector.broadcast %105 : vector<24x1xf32> to vector<24x24xf32>
    %107 = arith.subf %103, %106 : vector<24x24xf32>
    %108 = math.exp %107 : vector<24x24xf32>
    %cst_57 = arith.constant dense<0.000000e+00> : vector<24xf32>
    %109 = vector.multi_reduction <add>, %108, %cst_57 [1] : vector<24x24xf32> to vector<24xf32>
    %110 = vector.shape_cast %109 : vector<24xf32> to vector<24x1xf32>
    %111 = tpu.reciprocal %110 {approx = true} : vector<24x1xf32> -> vector<24x1xf32>
    %112 = vector.broadcast %111 : vector<24x1xf32> to vector<24x24xf32>
    %113 = arith.mulf %108, %112 : vector<24x24xf32>
    %cst_58 = arith.constant dense<0.000000e+00> : vector<24x8xf32>
    %114 = tpu.matmul %113, %99, %cst_58 {dimension_numbers = #tpu.dot_dimension_numbers<[1], [0], [0], [1], [0, 0, 1, 1], [], []>} : vector<24x24xf32>, vector<24x8xf32>, vector<24x8xf32> -> vector<24x8xf32>
    %c0_59 = arith.constant 0 : index
    %c16 = arith.constant 16 : index
    %115 = vector.load %arg24[%c0_59, %c16] : memref<24x32xf32, #tpu.memory_space<vmem>>, vector<24x8xf32>
    tpu.vector_store %arg24[%c0_59, %c16], %114 {strides = array<i32>} : memref<24x32xf32, #tpu.memory_space<vmem>>, vector<24x8xf32>,
    %116 = vector.extract_strided_slice %56 {offsets = [0, 24], sizes = [24, 8], strides = [1, 1]} : vector<24x32xf32> to vector<24x8xf32>
    %117 = vector.extract_strided_slice %57 {offsets = [0, 24], sizes = [24, 8], strides = [1, 1]} : vector<24x32xf32> to vector<24x8xf32>
    %118 = vector.extract_strided_slice %58 {offsets = [0, 24], sizes = [24, 8], strides = [1, 1]} : vector<24x32xf32> to vector<24x8xf32>
    %cst_60 = arith.constant dense<0.000000e+00> : vector<24x24xf32>
    %119 = tpu.matmul %116, %117, %cst_60 {dimension_numbers = #tpu.dot_dimension_numbers<[1], [1], [0], [0], [0, 0, 1, 0], [], []>} : vector<24x8xf32>, vector<24x8xf32>, vector<24x24xf32> -> vector<24x24xf32>
    %cst_61 = arith.constant 0.353553385 : f32
    %120 = vector.broadcast %cst_61 : f32 to vector<24x24xf32>
    %121 = arith.mulf %119, %120 : vector<24x24xf32>
    %122 = arith.addf %121, %22 : vector<24x24xf32>
    %cst_62 = arith.constant dense<0xFF800000> : vector<24xf32>
    %123 = vector.multi_reduction <maximumf>, %122, %cst_62 [1] : vector<24x24xf32> to vector<24xf32>
    %124 = vector.shape_cast %123 : vector<24xf32> to vector<24x1xf32>
    %125 = vector.broadcast %124 : vector<24x1xf32> to vector<24x24xf32>
    %126 = arith.subf %122, %125 : vector<24x24xf32>
    %127 = math.exp %126 : vector<24x24xf32>
    %cst_63 = arith.constant dense<0.000000e+00> : vector<24xf32>
    %128 = vector.multi_reduction <add>, %127, %cst_63 [1] : vector<24x24xf32> to vector<24xf32>
    %129 = vector.shape_cast %128 : vector<24xf32> to vector<24x1xf32>
    %130 = tpu.reciprocal %129 {approx = true} : vector<24x1xf32> -> vector<24x1xf32>
    %131 = vector.broadcast %130 : vector<24x1xf32> to vector<24x24xf32>
    %132 = arith.mulf %127, %131 : vector<24x24xf32>
    %cst_64 = arith.constant dense<0.000000e+00> : vector<24x8xf32>
    %133 = tpu.matmul %132, %118, %cst_64 {dimension_numbers = #tpu.dot_dimension_numbers<[1], [0], [0], [1], [0, 0, 1, 1], [], []>} : vector<24x24xf32>, vector<24x8xf32>, vector<24x8xf32> -> vector<24x8xf32>
    %c0_65 = arith.constant 0 : index
    %c24 = arith.constant 24 : index
    %134 = vector.load %arg24[%c0_65, %c24] : memref<24x32xf32, #tpu.memory_space<vmem>>, vector<24x8xf32>
    tpu.vector_store %arg24[%c0_65, %c24], %133 {strides = array<i32>} : memref<24x32xf32, #tpu.memory_space<vmem>>, vector<24x8xf32>,
    %c0_66 = arith.constant 0 : index
    %c0_67 = arith.constant 0 : index
    %135 = vector.load %arg24[%c0_66, %c0_67] : memref<24x32xf32, #tpu.memory_space<vmem>>, vector<24x32xf32>
    %c0_68 = arith.constant 0 : index
    %c0_69 = arith.constant 0 : index
    %c0_70 = arith.constant 0 : index
    %136 = vector.load %arg10[%c0_68, %c0_69, %c0_70] : memref<2x32x32xf32, #tpu.memory_space<vmem>>, vector<1x32x32xf32>
    %137 = vector.shape_cast %136 : vector<1x32x32xf32> to vector<32x32xf32>
    %cst_71 = arith.constant dense<0.000000e+00> : vector<24x32xf32>
    %138 = tpu.matmul %135, %137, %cst_71 {dimension_numbers = #tpu.dot_dimension_numbers<[1], [0], [0], [1], [0, 0, 1, 1], [], []>} : vector<24x32xf32>, vector<32x32xf32>, vector<24x32xf32> -> vector<24x32xf32>
    %c0_72 = arith.constant 0 : index
    %c0_73 = arith.constant 0 : index
    %c0_74 = arith.constant 0 : index
    %139 = vector.load %arg11[%c0_72, %c0_73, %c0_74] : memref<2x1x32xf32, #tpu.memory_space<vmem>>, vector<1x1x32xf32>
    %140 = vector.shape_cast %139 : vector<1x1x32xf32> to vector<1x32xf32>
    %141 = vector.broadcast %140 : vector<1x32xf32> to vector<24x32xf32>
    %142 = arith.addf %138, %141 : vector<24x32xf32>
    %143 = arith.addf %16, %142 : vector<24x32xf32>
    %c0_75 = arith.constant 0 : index
    %c0_76 = arith.constant 0 : index
    %c0_77 = arith.constant 0 : index
    %144 = vector.load %arg12[%c0_75, %c0_76, %c0_77] : memref<2x1x32xf32, #tpu.memory_space<vmem>>, vector<1x1x32xf32>
    %145 = vector.shape_cast %144 : vector<1x1x32xf32> to vector<1x32xf32>
    %c0_78 = arith.constant 0 : index
    %c0_79 = arith.constant 0 : index
    %c0_80 = arith.constant 0 : index
    %146 = vector.load %arg13[%c0_78, %c0_79, %c0_80] : memref<2x1x32xf32, #tpu.memory_space<vmem>>, vector<1x1x32xf32>
    %147 = vector.shape_cast %146 : vector<1x1x32xf32> to vector<1x32xf32>
    %cst_81 = arith.constant dense<0.000000e+00> : vector<24xf32>
    %148 = vector.multi_reduction <add>, %143, %cst_81 [1] : vector<24x32xf32> to vector<24xf32>
    %149 = vector.shape_cast %148 : vector<24xf32> to vector<24x1xf32>
    %cst_82 = arith.constant 3.200000e+01 : f32
    %150 = vector.broadcast %cst_82 : f32 to vector<24x1xf32>
    %151 = arith.divf %149, %150 : vector<24x1xf32>
    %152 = vector.broadcast %151 : vector<24x1xf32> to vector<24x32xf32>
    %153 = arith.subf %143, %152 : vector<24x32xf32>
    %154 = arith.mulf %153, %153 : vector<24x32xf32>
    %cst_83 = arith.constant dense<0.000000e+00> : vector<24xf32>
    %155 = vector.multi_reduction <add>, %154, %cst_83 [1] : vector<24x32xf32> to vector<24xf32>
    %156 = vector.shape_cast %155 : vector<24xf32> to vector<24x1xf32>
    %cst_84 = arith.constant 3.200000e+01 : f32
    %157 = vector.broadcast %cst_84 : f32 to vector<24x1xf32>
    %158 = arith.divf %156, %157 : vector<24x1xf32>
    %159 = vector.broadcast %151 : vector<24x1xf32> to vector<24x32xf32>
    %160 = arith.subf %143, %159 : vector<24x32xf32>
    %cst_85 = arith.constant 9.99999996E-13 : f32
    %161 = vector.broadcast %cst_85 : f32 to vector<24x1xf32>
    %162 = arith.addf %158, %161 : vector<24x1xf32>
    %163 = math.rsqrt %162 : vector<24x1xf32>
    %164 = vector.broadcast %163 : vector<24x1xf32> to vector<24x32xf32>
    %165 = arith.mulf %160, %164 : vector<24x32xf32>
    %166 = vector.broadcast %145 : vector<1x32xf32> to vector<24x32xf32>
    %167 = arith.mulf %165, %166 : vector<24x32xf32>
    %168 = vector.broadcast %147 : vector<1x32xf32> to vector<24x32xf32>
    %169 = arith.addf %167, %168 : vector<24x32xf32>
    %c0_86 = arith.constant 0 : index
    %c0_87 = arith.constant 0 : index
    %c0_88 = arith.constant 0 : index
    %170 = vector.load %arg14[%c0_86, %c0_87, %c0_88] : memref<2x32x64xf32, #tpu.memory_space<vmem>>, vector<1x32x64xf32>
    %171 = vector.shape_cast %170 : vector<1x32x64xf32> to vector<32x64xf32>
    %cst_89 = arith.constant dense<0.000000e+00> : vector<24x64xf32>
    %172 = tpu.matmul %169, %171, %cst_89 {dimension_numbers = #tpu.dot_dimension_numbers<[1], [0], [0], [1], [0, 0, 1, 1], [], []>} : vector<24x32xf32>, vector<32x64xf32>, vector<24x64xf32> -> vector<24x64xf32>
    %c0_90 = arith.constant 0 : index
    %c0_91 = arith.constant 0 : index
    %c0_92 = arith.constant 0 : index
    %173 = vector.load %arg15[%c0_90, %c0_91, %c0_92] : memref<2x1x64xf32, #tpu.memory_space<vmem>>, vector<1x1x64xf32>
    %174 = vector.shape_cast %173 : vector<1x1x64xf32> to vector<1x64xf32>
    %175 = vector.broadcast %174 : vector<1x64xf32> to vector<24x64xf32>
    %176 = arith.addf %172, %175 : vector<24x64xf32>
    %177 = arith.mulf %176, %176 : vector<24x64xf32>
    %178 = arith.mulf %176, %177 : vector<24x64xf32>
    %cst_93 = arith.constant 4.471500e-02 : f32
    %179 = vector.broadcast %cst_93 : f32 to vector<24x64xf32>
    %180 = arith.mulf %179, %178 : vector<24x64xf32>
    %181 = arith.addf %176, %180 : vector<24x64xf32>
    %cst_94 = arith.constant 0.797884583 : f32
    %182 = vector.broadcast %cst_94 : f32 to vector<24x64xf32>
    %183 = arith.mulf %182, %181 : vector<24x64xf32>
    %184 = math.tanh %183 : vector<24x64xf32>
    %cst_95 = arith.constant 1.000000e+00 : f32
    %185 = vector.broadcast %cst_95 : f32 to vector<24x64xf32>
    %186 = arith.addf %185, %184 : vector<24x64xf32>
    %cst_96 = arith.constant 5.000000e-01 : f32
    %187 = vector.broadcast %cst_96 : f32 to vector<24x64xf32>
    %188 = arith.mulf %187, %186 : vector<24x64xf32>
    %189 = arith.mulf %176, %188 : vector<24x64xf32>
    %c0_97 = arith.constant 0 : index
    %c0_98 = arith.constant 0 : index
    %c0_99 = arith.constant 0 : index
    %190 = vector.load %arg16[%c0_97, %c0_98, %c0_99] : memref<2x64x32xf32, #tpu.memory_space<vmem>>, vector<1x64x32xf32>
    %191 = vector.shape_cast %190 : vector<1x64x32xf32> to vector<64x32xf32>
    %cst_100 = arith.constant dense<0.000000e+00> : vector<24x32xf32>
    %192 = tpu.matmul %189, %191, %cst_100 {dimension_numbers = #tpu.dot_dimension_numbers<[1], [0], [0], [1], [0, 0, 1, 1], [], []>} : vector<24x64xf32>, vector<64x32xf32>, vector<24x32xf32> -> vector<24x32xf32>
    %c0_101 = arith.constant 0 : index
    %c0_102 = arith.constant 0 : index
    %c0_103 = arith.constant 0 : index
    %193 = vector.load %arg17[%c0_101, %c0_102, %c0_103] : memref<2x1x32xf32, #tpu.memory_space<vmem>>, vector<1x1x32xf32>
    %194 = vector.shape_cast %193 : vector<1x1x32xf32> to vector<1x32xf32>
    %195 = vector.broadcast %194 : vector<1x32xf32> to vector<24x32xf32>
    %196 = arith.addf %192, %195 : vector<24x32xf32>
    %197 = arith.addf %143, %196 : vector<24x32xf32>
    %c1_104 = arith.constant 1 : index
    %c0_105 = arith.constant 0 : index
    %c0_106 = arith.constant 0 : index
    %198 = vector.load %arg6[%c1_104, %c0_105, %c0_106] : memref<2x1x32xf32, #tpu.memory_space<vmem>>, vector<1x1x32xf32>
    %199 = vector.shape_cast %198 : vector<1x1x32xf32> to vector<1x32xf32>
    %c1_107 = arith.constant 1 : index
    %c0_108 = arith.constant 0 : index
    %c0_109 = arith.constant 0 : index
    %200 = vector.load %arg7[%c1_107, %c0_108, %c0_109] : memref<2x1x32xf32, #tpu.memory_space<vmem>>, vector<1x1x32xf32>
    %201 = vector.shape_cast %200 : vector<1x1x32xf32> to vector<1x32xf32>
    %cst_110 = arith.constant dense<0.000000e+00> : vector<24xf32>
    %202 = vector.multi_reduction <add>, %197, %cst_110 [1] : vector<24x32xf32> to vector<24xf32>
    %203 = vector.shape_cast %202 : vector<24xf32> to vector<24x1xf32>
    %cst_111 = arith.constant 3.200000e+01 : f32
    %204 = vector.broadcast %cst_111 : f32 to vector<24x1xf32>
    %205 = arith.divf %203, %204 : vector<24x1xf32>
    %206 = vector.broadcast %205 : vector<24x1xf32> to vector<24x32xf32>
    %207 = arith.subf %197, %206 : vector<24x32xf32>
    %208 = arith.mulf %207, %207 : vector<24x32xf32>
    %cst_112 = arith.constant dense<0.000000e+00> : vector<24xf32>
    %209 = vector.multi_reduction <add>, %208, %cst_112 [1] : vector<24x32xf32> to vector<24xf32>
    %210 = vector.shape_cast %209 : vector<24xf32> to vector<24x1xf32>
    %cst_113 = arith.constant 3.200000e+01 : f32
    %211 = vector.broadcast %cst_113 : f32 to vector<24x1xf32>
    %212 = arith.divf %210, %211 : vector<24x1xf32>
    %213 = vector.broadcast %205 : vector<24x1xf32> to vector<24x32xf32>
    %214 = arith.subf %197, %213 : vector<24x32xf32>
    %cst_114 = arith.constant 9.99999996E-13 : f32
    %215 = vector.broadcast %cst_114 : f32 to vector<24x1xf32>
    %216 = arith.addf %212, %215 : vector<24x1xf32>
    %217 = math.rsqrt %216 : vector<24x1xf32>
    %218 = vector.broadcast %217 : vector<24x1xf32> to vector<24x32xf32>
    %219 = arith.mulf %214, %218 : vector<24x32xf32>
    %220 = vector.broadcast %199 : vector<1x32xf32> to vector<24x32xf32>
    %221 = arith.mulf %219, %220 : vector<24x32xf32>
    %222 = vector.broadcast %201 : vector<1x32xf32> to vector<24x32xf32>
    %223 = arith.addf %221, %222 : vector<24x32xf32>
    %c1_115 = arith.constant 1 : index
    %c0_116 = arith.constant 0 : index
    %c0_117 = arith.constant 0 : index
    %224 = vector.load %arg8[%c1_115, %c0_116, %c0_117] : memref<2x32x96xf32, #tpu.memory_space<vmem>>, vector<1x32x96xf32>
    %225 = vector.shape_cast %224 : vector<1x32x96xf32> to vector<32x96xf32>
    %cst_118 = arith.constant dense<0.000000e+00> : vector<24x96xf32>
    %226 = tpu.matmul %223, %225, %cst_118 {dimension_numbers = #tpu.dot_dimension_numbers<[1], [0], [0], [1], [0, 0, 1, 1], [], []>} : vector<24x32xf32>, vector<32x96xf32>, vector<24x96xf32> -> vector<24x96xf32>
    %c1_119 = arith.constant 1 : index
    %c0_120 = arith.constant 0 : index
    %c0_121 = arith.constant 0 : index
    %227 = vector.load %arg9[%c1_119, %c0_120, %c0_121] : memref<2x1x96xf32, #tpu.memory_space<vmem>>, vector<1x1x96xf32>
    %228 = vector.shape_cast %227 : vector<1x1x96xf32> to vector<1x96xf32>
    %229 = vector.broadcast %228 : vector<1x96xf32> to vector<24x96xf32>
    %230 = arith.addf %226, %229 : vector<24x96xf32>
    %231 = vector.extract_strided_slice %230 {offsets = [0, 0], sizes = [24, 32], strides = [1, 1]} : vector<24x96xf32> to vector<24x32xf32>
    %232 = vector.extract_strided_slice %230 {offsets = [0, 32], sizes = [24, 32], strides = [1, 1]} : vector<24x96xf32> to vector<24x32xf32>
    %233 = vector.extract_strided_slice %230 {offsets = [0, 64], sizes = [24, 32], strides = [1, 1]} : vector<24x96xf32> to vector<24x32xf32>
    %234 = vector.extract_strided_slice %231 {offsets = [0, 0], sizes = [24, 8], strides = [1, 1]} : vector<24x32xf32> to vector<24x8xf32>
    %235 = vector.extract_strided_slice %232 {offsets = [0, 0], sizes = [24, 8], strides = [1, 1]} : vector<24x32xf32> to vector<24x8xf32>
    %236 = vector.extract_strided_slice %233 {offsets = [0, 0], sizes = [24, 8], strides = [1, 1]} : vector<24x32xf32> to vector<24x8xf32>
    %cst_122 = arith.constant dense<0.000000e+00> : vector<24x24xf32>
    %237 = tpu.matmul %234, %235, %cst_122 {dimension_numbers = #tpu.dot_dimension_numbers<[1], [1], [0], [0], [0, 0, 1, 0], [], []>} : vector<24x8xf32>, vector<24x8xf32>, vector<24x24xf32> -> vector<24x24xf32>
    %cst_123 = arith.constant 0.353553385 : f32
    %238 = vector.broadcast %cst_123 : f32 to vector<24x24xf32>
    %239 = arith.mulf %237, %238 : vector<24x24xf32>
    %240 = arith.addf %239, %22 : vector<24x24xf32>
    %cst_124 = arith.constant dense<0xFF800000> : vector<24xf32>
    %241 = vector.multi_reduction <maximumf>, %240, %cst_124 [1] : vector<24x24xf32> to vector<24xf32>
    %242 = vector.shape_cast %241 : vector<24xf32> to vector<24x1xf32>
    %243 = vector.broadcast %242 : vector<24x1xf32> to vector<24x24xf32>
    %244 = arith.subf %240, %243 : vector<24x24xf32>
    %245 = math.exp %244 : vector<24x24xf32>
    %cst_125 = arith.constant dense<0.000000e+00> : vector<24xf32>
    %246 = vector.multi_reduction <add>, %245, %cst_125 [1] : vector<24x24xf32> to vector<24xf32>
    %247 = vector.shape_cast %246 : vector<24xf32> to vector<24x1xf32>
    %248 = tpu.reciprocal %247 {approx = true} : vector<24x1xf32> -> vector<24x1xf32>
    %249 = vector.broadcast %248 : vector<24x1xf32> to vector<24x24xf32>
    %250 = arith.mulf %245, %249 : vector<24x24xf32>
    %cst_126 = arith.constant dense<0.000000e+00> : vector<24x8xf32>
    %251 = tpu.matmul %250, %236, %cst_126 {dimension_numbers = #tpu.dot_dimension_numbers<[1], [0], [0], [1], [0, 0, 1, 1], [], []>} : vector<24x24xf32>, vector<24x8xf32>, vector<24x8xf32> -> vector<24x8xf32>
    %c0_127 = arith.constant 0 : index
    %c0_128 = arith.constant 0 : index
    %252 = vector.load %arg24[%c0_127, %c0_128] : memref<24x32xf32, #tpu.memory_space<vmem>>, vector<24x8xf32>
    tpu.vector_store %arg24[%c0_127, %c0_128], %251 {strides = array<i32>} : memref<24x32xf32, #tpu.memory_space<vmem>>, vector<24x8xf32>,
    %253 = vector.extract_strided_slice %231 {offsets = [0, 8], sizes = [24, 8], strides = [1, 1]} : vector<24x32xf32> to vector<24x8xf32>
    %254 = vector.extract_strided_slice %232 {offsets = [0, 8], sizes = [24, 8], strides = [1, 1]} : vector<24x32xf32> to vector<24x8xf32>
    %255 = vector.extract_strided_slice %233 {offsets = [0, 8], sizes = [24, 8], strides = [1, 1]} : vector<24x32xf32> to vector<24x8xf32>
    %cst_129 = arith.constant dense<0.000000e+00> : vector<24x24xf32>
    %256 = tpu.matmul %253, %254, %cst_129 {dimension_numbers = #tpu.dot_dimension_numbers<[1], [1], [0], [0], [0, 0, 1, 0], [], []>} : vector<24x8xf32>, vector<24x8xf32>, vector<24x24xf32> -> vector<24x24xf32>
    %cst_130 = arith.constant 0.353553385 : f32
    %257 = vector.broadcast %cst_130 : f32 to vector<24x24xf32>
    %258 = arith.mulf %256, %257 : vector<24x24xf32>
    %259 = arith.addf %258, %22 : vector<24x24xf32>
    %cst_131 = arith.constant dense<0xFF800000> : vector<24xf32>
    %260 = vector.multi_reduction <maximumf>, %259, %cst_131 [1] : vector<24x24xf32> to vector<24xf32>
    %261 = vector.shape_cast %260 : vector<24xf32> to vector<24x1xf32>
    %262 = vector.broadcast %261 : vector<24x1xf32> to vector<24x24xf32>
    %263 = arith.subf %259, %262 : vector<24x24xf32>
    %264 = math.exp %263 : vector<24x24xf32>
    %cst_132 = arith.constant dense<0.000000e+00> : vector<24xf32>
    %265 = vector.multi_reduction <add>, %264, %cst_132 [1] : vector<24x24xf32> to vector<24xf32>
    %266 = vector.shape_cast %265 : vector<24xf32> to vector<24x1xf32>
    %267 = tpu.reciprocal %266 {approx = true} : vector<24x1xf32> -> vector<24x1xf32>
    %268 = vector.broadcast %267 : vector<24x1xf32> to vector<24x24xf32>
    %269 = arith.mulf %264, %268 : vector<24x24xf32>
    %cst_133 = arith.constant dense<0.000000e+00> : vector<24x8xf32>
    %270 = tpu.matmul %269, %255, %cst_133 {dimension_numbers = #tpu.dot_dimension_numbers<[1], [0], [0], [1], [0, 0, 1, 1], [], []>} : vector<24x24xf32>, vector<24x8xf32>, vector<24x8xf32> -> vector<24x8xf32>
    %c0_134 = arith.constant 0 : index
    %c8_135 = arith.constant 8 : index
    %271 = vector.load %arg24[%c0_134, %c8_135] : memref<24x32xf32, #tpu.memory_space<vmem>>, vector<24x8xf32>
    tpu.vector_store %arg24[%c0_134, %c8_135], %270 {strides = array<i32>} : memref<24x32xf32, #tpu.memory_space<vmem>>, vector<24x8xf32>,
    %272 = vector.extract_strided_slice %231 {offsets = [0, 16], sizes = [24, 8], strides = [1, 1]} : vector<24x32xf32> to vector<24x8xf32>
    %273 = vector.extract_strided_slice %232 {offsets = [0, 16], sizes = [24, 8], strides = [1, 1]} : vector<24x32xf32> to vector<24x8xf32>
    %274 = vector.extract_strided_slice %233 {offsets = [0, 16], sizes = [24, 8], strides = [1, 1]} : vector<24x32xf32> to vector<24x8xf32>
    %cst_136 = arith.constant dense<0.000000e+00> : vector<24x24xf32>
    %275 = tpu.matmul %272, %273, %cst_136 {dimension_numbers = #tpu.dot_dimension_numbers<[1], [1], [0], [0], [0, 0, 1, 0], [], []>} : vector<24x8xf32>, vector<24x8xf32>, vector<24x24xf32> -> vector<24x24xf32>
    %cst_137 = arith.constant 0.353553385 : f32
    %276 = vector.broadcast %cst_137 : f32 to vector<24x24xf32>
    %277 = arith.mulf %275, %276 : vector<24x24xf32>
    %278 = arith.addf %277, %22 : vector<24x24xf32>
    %cst_138 = arith.constant dense<0xFF800000> : vector<24xf32>
    %279 = vector.multi_reduction <maximumf>, %278, %cst_138 [1] : vector<24x24xf32> to vector<24xf32>
    %280 = vector.shape_cast %279 : vector<24xf32> to vector<24x1xf32>
    %281 = vector.broadcast %280 : vector<24x1xf32> to vector<24x24xf32>
    %282 = arith.subf %278, %281 : vector<24x24xf32>
    %283 = math.exp %282 : vector<24x24xf32>
    %cst_139 = arith.constant dense<0.000000e+00> : vector<24xf32>
    %284 = vector.multi_reduction <add>, %283, %cst_139 [1] : vector<24x24xf32> to vector<24xf32>
    %285 = vector.shape_cast %284 : vector<24xf32> to vector<24x1xf32>
    %286 = tpu.reciprocal %285 {approx = true} : vector<24x1xf32> -> vector<24x1xf32>
    %287 = vector.broadcast %286 : vector<24x1xf32> to vector<24x24xf32>
    %288 = arith.mulf %283, %287 : vector<24x24xf32>
    %cst_140 = arith.constant dense<0.000000e+00> : vector<24x8xf32>
    %289 = tpu.matmul %288, %274, %cst_140 {dimension_numbers = #tpu.dot_dimension_numbers<[1], [0], [0], [1], [0, 0, 1, 1], [], []>} : vector<24x24xf32>, vector<24x8xf32>, vector<24x8xf32> -> vector<24x8xf32>
    %c0_141 = arith.constant 0 : index
    %c16_142 = arith.constant 16 : index
    %290 = vector.load %arg24[%c0_141, %c16_142] : memref<24x32xf32, #tpu.memory_space<vmem>>, vector<24x8xf32>
    tpu.vector_store %arg24[%c0_141, %c16_142], %289 {strides = array<i32>} : memref<24x32xf32, #tpu.memory_space<vmem>>, vector<24x8xf32>,
    %291 = vector.extract_strided_slice %231 {offsets = [0, 24], sizes = [24, 8], strides = [1, 1]} : vector<24x32xf32> to vector<24x8xf32>
    %292 = vector.extract_strided_slice %232 {offsets = [0, 24], sizes = [24, 8], strides = [1, 1]} : vector<24x32xf32> to vector<24x8xf32>
    %293 = vector.extract_strided_slice %233 {offsets = [0, 24], sizes = [24, 8], strides = [1, 1]} : vector<24x32xf32> to vector<24x8xf32>
    %cst_143 = arith.constant dense<0.000000e+00> : vector<24x24xf32>
    %294 = tpu.matmul %291, %292, %cst_143 {dimension_numbers = #tpu.dot_dimension_numbers<[1], [1], [0], [0], [0, 0, 1, 0], [], []>} : vector<24x8xf32>, vector<24x8xf32>, vector<24x24xf32> -> vector<24x24xf32>
    %cst_144 = arith.constant 0.353553385 : f32
    %295 = vector.broadcast %cst_144 : f32 to vector<24x24xf32>
    %296 = arith.mulf %294, %295 : vector<24x24xf32>
    %297 = arith.addf %296, %22 : vector<24x24xf32>
    %cst_145 = arith.constant dense<0xFF800000> : vector<24xf32>
    %298 = vector.multi_reduction <maximumf>, %297, %cst_145 [1] : vector<24x24xf32> to vector<24xf32>
    %299 = vector.shape_cast %298 : vector<24xf32> to vector<24x1xf32>
    %300 = vector.broadcast %299 : vector<24x1xf32> to vector<24x24xf32>
    %301 = arith.subf %297, %300 : vector<24x24xf32>
    %302 = math.exp %301 : vector<24x24xf32>
    %cst_146 = arith.constant dense<0.000000e+00> : vector<24xf32>
    %303 = vector.multi_reduction <add>, %302, %cst_146 [1] : vector<24x24xf32> to vector<24xf32>
    %304 = vector.shape_cast %303 : vector<24xf32> to vector<24x1xf32>
    %305 = tpu.reciprocal %304 {approx = true} : vector<24x1xf32> -> vector<24x1xf32>
    %306 = vector.broadcast %305 : vector<24x1xf32> to vector<24x24xf32>
    %307 = arith.mulf %302, %306 : vector<24x24xf32>
    %cst_147 = arith.constant dense<0.000000e+00> : vector<24x8xf32>
    %308 = tpu.matmul %307, %293, %cst_147 {dimension_numbers = #tpu.dot_dimension_numbers<[1], [0], [0], [1], [0, 0, 1, 1], [], []>} : vector<24x24xf32>, vector<24x8xf32>, vector<24x8xf32> -> vector<24x8xf32>
    %c0_148 = arith.constant 0 : index
    %c24_149 = arith.constant 24 : index
    %309 = vector.load %arg24[%c0_148, %c24_149] : memref<24x32xf32, #tpu.memory_space<vmem>>, vector<24x8xf32>
    tpu.vector_store %arg24[%c0_148, %c24_149], %308 {strides = array<i32>} : memref<24x32xf32, #tpu.memory_space<vmem>>, vector<24x8xf32>,
    %c0_150 = arith.constant 0 : index
    %c0_151 = arith.constant 0 : index
    %310 = vector.load %arg24[%c0_150, %c0_151] : memref<24x32xf32, #tpu.memory_space<vmem>>, vector<24x32xf32>
    %c1_152 = arith.constant 1 : index
    %c0_153 = arith.constant 0 : index
    %c0_154 = arith.constant 0 : index
    %311 = vector.load %arg10[%c1_152, %c0_153, %c0_154] : memref<2x32x32xf32, #tpu.memory_space<vmem>>, vector<1x32x32xf32>
    %312 = vector.shape_cast %311 : vector<1x32x32xf32> to vector<32x32xf32>
    %cst_155 = arith.constant dense<0.000000e+00> : vector<24x32xf32>
    %313 = tpu.matmul %310, %312, %cst_155 {dimension_numbers = #tpu.dot_dimension_numbers<[1], [0], [0], [1], [0, 0, 1, 1], [], []>} : vector<24x32xf32>, vector<32x32xf32>, vector<24x32xf32> -> vector<24x32xf32>
    %c1_156 = arith.constant 1 : index
    %c0_157 = arith.constant 0 : index
    %c0_158 = arith.constant 0 : index
    %314 = vector.load %arg11[%c1_156, %c0_157, %c0_158] : memref<2x1x32xf32, #tpu.memory_space<vmem>>, vector<1x1x32xf32>
    %315 = vector.shape_cast %314 : vector<1x1x32xf32> to vector<1x32xf32>
    %316 = vector.broadcast %315 : vector<1x32xf32> to vector<24x32xf32>
    %317 = arith.addf %313, %316 : vector<24x32xf32>
    %318 = arith.addf %197, %317 : vector<24x32xf32>
    %c1_159 = arith.constant 1 : index
    %c0_160 = arith.constant 0 : index
    %c0_161 = arith.constant 0 : index
    %319 = vector.load %arg12[%c1_159, %c0_160, %c0_161] : memref<2x1x32xf32, #tpu.memory_space<vmem>>, vector<1x1x32xf32>
    %320 = vector.shape_cast %319 : vector<1x1x32xf32> to vector<1x32xf32>
    %c1_162 = arith.constant 1 : index
    %c0_163 = arith.constant 0 : index
    %c0_164 = arith.constant 0 : index
    %321 = vector.load %arg13[%c1_162, %c0_163, %c0_164] : memref<2x1x32xf32, #tpu.memory_space<vmem>>, vector<1x1x32xf32>
    %322 = vector.shape_cast %321 : vector<1x1x32xf32> to vector<1x32xf32>
    %cst_165 = arith.constant dense<0.000000e+00> : vector<24xf32>
    %323 = vector.multi_reduction <add>, %318, %cst_165 [1] : vector<24x32xf32> to vector<24xf32>
    %324 = vector.shape_cast %323 : vector<24xf32> to vector<24x1xf32>
    %cst_166 = arith.constant 3.200000e+01 : f32
    %325 = vector.broadcast %cst_166 : f32 to vector<24x1xf32>
    %326 = arith.divf %324, %325 : vector<24x1xf32>
    %327 = vector.broadcast %326 : vector<24x1xf32> to vector<24x32xf32>
    %328 = arith.subf %318, %327 : vector<24x32xf32>
    %329 = arith.mulf %328, %328 : vector<24x32xf32>
    %cst_167 = arith.constant dense<0.000000e+00> : vector<24xf32>
    %330 = vector.multi_reduction <add>, %329, %cst_167 [1] : vector<24x32xf32> to vector<24xf32>
    %331 = vector.shape_cast %330 : vector<24xf32> to vector<24x1xf32>
    %cst_168 = arith.constant 3.200000e+01 : f32
    %332 = vector.broadcast %cst_168 : f32 to vector<24x1xf32>
    %333 = arith.divf %331, %332 : vector<24x1xf32>
    %334 = vector.broadcast %326 : vector<24x1xf32> to vector<24x32xf32>
    %335 = arith.subf %318, %334 : vector<24x32xf32>
    %cst_169 = arith.constant 9.99999996E-13 : f32
    %336 = vector.broadcast %cst_169 : f32 to vector<24x1xf32>
    %337 = arith.addf %333, %336 : vector<24x1xf32>
    %338 = math.rsqrt %337 : vector<24x1xf32>
    %339 = vector.broadcast %338 : vector<24x1xf32> to vector<24x32xf32>
    %340 = arith.mulf %335, %339 : vector<24x32xf32>
    %341 = vector.broadcast %320 : vector<1x32xf32> to vector<24x32xf32>
    %342 = arith.mulf %340, %341 : vector<24x32xf32>
    %343 = vector.broadcast %322 : vector<1x32xf32> to vector<24x32xf32>
    %344 = arith.addf %342, %343 : vector<24x32xf32>
    %c1_170 = arith.constant 1 : index
    %c0_171 = arith.constant 0 : index
    %c0_172 = arith.constant 0 : index
    %345 = vector.load %arg14[%c1_170, %c0_171, %c0_172] : memref<2x32x64xf32, #tpu.memory_space<vmem>>, vector<1x32x64xf32>
    %346 = vector.shape_cast %345 : vector<1x32x64xf32> to vector<32x64xf32>
    %cst_173 = arith.constant dense<0.000000e+00> : vector<24x64xf32>
    %347 = tpu.matmul %344, %346, %cst_173 {dimension_numbers = #tpu.dot_dimension_numbers<[1], [0], [0], [1], [0, 0, 1, 1], [], []>} : vector<24x32xf32>, vector<32x64xf32>, vector<24x64xf32> -> vector<24x64xf32>
    %c1_174 = arith.constant 1 : index
    %c0_175 = arith.constant 0 : index
    %c0_176 = arith.constant 0 : index
    %348 = vector.load %arg15[%c1_174, %c0_175, %c0_176] : memref<2x1x64xf32, #tpu.memory_space<vmem>>, vector<1x1x64xf32>
    %349 = vector.shape_cast %348 : vector<1x1x64xf32> to vector<1x64xf32>
    %350 = vector.broadcast %349 : vector<1x64xf32> to vector<24x64xf32>
    %351 = arith.addf %347, %350 : vector<24x64xf32>
    %352 = arith.mulf %351, %351 : vector<24x64xf32>
    %353 = arith.mulf %351, %352 : vector<24x64xf32>
    %cst_177 = arith.constant 4.471500e-02 : f32
    %354 = vector.broadcast %cst_177 : f32 to vector<24x64xf32>
    %355 = arith.mulf %354, %353 : vector<24x64xf32>
    %356 = arith.addf %351, %355 : vector<24x64xf32>
    %cst_178 = arith.constant 0.797884583 : f32
    %357 = vector.broadcast %cst_178 : f32 to vector<24x64xf32>
    %358 = arith.mulf %357, %356 : vector<24x64xf32>
    %359 = math.tanh %358 : vector<24x64xf32>
    %cst_179 = arith.constant 1.000000e+00 : f32
    %360 = vector.broadcast %cst_179 : f32 to vector<24x64xf32>
    %361 = arith.addf %360, %359 : vector<24x64xf32>
    %cst_180 = arith.constant 5.000000e-01 : f32
    %362 = vector.broadcast %cst_180 : f32 to vector<24x64xf32>
    %363 = arith.mulf %362, %361 : vector<24x64xf32>
    %364 = arith.mulf %351, %363 : vector<24x64xf32>
    %c1_181 = arith.constant 1 : index
    %c0_182 = arith.constant 0 : index
    %c0_183 = arith.constant 0 : index
    %365 = vector.load %arg16[%c1_181, %c0_182, %c0_183] : memref<2x64x32xf32, #tpu.memory_space<vmem>>, vector<1x64x32xf32>
    %366 = vector.shape_cast %365 : vector<1x64x32xf32> to vector<64x32xf32>
    %cst_184 = arith.constant dense<0.000000e+00> : vector<24x32xf32>
    %367 = tpu.matmul %364, %366, %cst_184 {dimension_numbers = #tpu.dot_dimension_numbers<[1], [0], [0], [1], [0, 0, 1, 1], [], []>} : vector<24x64xf32>, vector<64x32xf32>, vector<24x32xf32> -> vector<24x32xf32>
    %c1_185 = arith.constant 1 : index
    %c0_186 = arith.constant 0 : index
    %c0_187 = arith.constant 0 : index
    %368 = vector.load %arg17[%c1_185, %c0_186, %c0_187] : memref<2x1x32xf32, #tpu.memory_space<vmem>>, vector<1x1x32xf32>
    %369 = vector.shape_cast %368 : vector<1x1x32xf32> to vector<1x32xf32>
    %370 = vector.broadcast %369 : vector<1x32xf32> to vector<24x32xf32>
    %371 = arith.addf %367, %370 : vector<24x32xf32>
    %372 = arith.addf %318, %371 : vector<24x32xf32>
    %c0_188 = arith.constant 0 : index
    %c0_189 = arith.constant 0 : index
    %373 = vector.load %arg18[%c0_188, %c0_189] : memref<1x32xf32, #tpu.memory_space<vmem>>, vector<1x32xf32>
    %c0_190 = arith.constant 0 : index
    %c0_191 = arith.constant 0 : index
    %374 = vector.load %arg19[%c0_190, %c0_191] : memref<1x32xf32, #tpu.memory_space<vmem>>, vector<1x32xf32>
    %cst_192 = arith.constant dense<0.000000e+00> : vector<24xf32>
    %375 = vector.multi_reduction <add>, %372, %cst_192 [1] : vector<24x32xf32> to vector<24xf32>
    %376 = vector.shape_cast %375 : vector<24xf32> to vector<24x1xf32>
    %cst_193 = arith.constant 3.200000e+01 : f32
    %377 = vector.broadcast %cst_193 : f32 to vector<24x1xf32>
    %378 = arith.divf %376, %377 : vector<24x1xf32>
    %379 = vector.broadcast %378 : vector<24x1xf32> to vector<24x32xf32>
    %380 = arith.subf %372, %379 : vector<24x32xf32>
    %381 = arith.mulf %380, %380 : vector<24x32xf32>
    %cst_194 = arith.constant dense<0.000000e+00> : vector<24xf32>
    %382 = vector.multi_reduction <add>, %381, %cst_194 [1] : vector<24x32xf32> to vector<24xf32>
    %383 = vector.shape_cast %382 : vector<24xf32> to vector<24x1xf32>
    %cst_195 = arith.constant 3.200000e+01 : f32
    %384 = vector.broadcast %cst_195 : f32 to vector<24x1xf32>
    %385 = arith.divf %383, %384 : vector<24x1xf32>
    %386 = vector.broadcast %378 : vector<24x1xf32> to vector<24x32xf32>
    %387 = arith.subf %372, %386 : vector<24x32xf32>
    %cst_196 = arith.constant 9.99999996E-13 : f32
    %388 = vector.broadcast %cst_196 : f32 to vector<24x1xf32>
    %389 = arith.addf %385, %388 : vector<24x1xf32>
    %390 = math.rsqrt %389 : vector<24x1xf32>
    %391 = vector.broadcast %390 : vector<24x1xf32> to vector<24x32xf32>
    %392 = arith.mulf %387, %391 : vector<24x32xf32>
    %393 = vector.broadcast %373 : vector<1x32xf32> to vector<24x32xf32>
    %394 = arith.mulf %392, %393 : vector<24x32xf32>
    %395 = vector.broadcast %374 : vector<1x32xf32> to vector<24x32xf32>
    %396 = arith.addf %394, %395 : vector<24x32xf32>
    %397 = vector.extract_strided_slice %396 {offsets = [0, 0], sizes = [1, 32], strides = [1, 1]} : vector<24x32xf32> to vector<1x32xf32>
    %c0_197 = arith.constant 0 : index
    %c0_198 = arith.constant 0 : index
    %398 = vector.load %arg20[%c0_197, %c0_198] : memref<32x32xf32, #tpu.memory_space<vmem>>, vector<32x32xf32>
    %cst_199 = arith.constant dense<0.000000e+00> : vector<1x32xf32>
    %399 = tpu.matmul %397, %398, %cst_199 {dimension_numbers = #tpu.dot_dimension_numbers<[1], [0], [0], [1], [0, 0, 1, 1], [], []>} : vector<1x32xf32>, vector<32x32xf32>, vector<1x32xf32> -> vector<1x32xf32>
    %c0_200 = arith.constant 0 : index
    %c0_201 = arith.constant 0 : index
    %400 = vector.load %arg21[%c0_200, %c0_201] : memref<1x32xf32, #tpu.memory_space<vmem>>, vector<1x32xf32>
    %401 = arith.addf %399, %400 : vector<1x32xf32>
    %402 = math.tanh %401 : vector<1x32xf32>
    %c0_202 = arith.constant 0 : index
    %c0_203 = arith.constant 0 : index
    %c0_204 = arith.constant 0 : index
    %403 = vector.load %arg22[%c0_202, %c0_203, %c0_204] : memref<1x1x32xf32, #tpu.memory_space<vmem>>, vector<1x1x32xf32>
    %404 = vector.shape_cast %403 : vector<1x1x32xf32> to vector<1x32xf32>
    %405 = vector.shape_cast %402 : vector<1x32xf32> to vector<1x1x32xf32>
    tpu.vector_store %arg22[%c0_202, %c0_203, %c0_204], %405 {strides = array<i32>} : memref<1x1x32xf32, #tpu.memory_space<vmem>>, vector<1x1x32xf32>,
    return
  }
  func.func @transform_0(%arg0: i32) -> (i32, i32, i32) {
    %c0_i32 = arith.constant 0 : i32
    %c0_i32_0 = arith.constant 0 : i32
    %c0_i32_1 = arith.constant 0 : i32
    return %arg0, %c0_i32, %c0_i32_0 : i32, i32, i32
  }
  func.func @transform_1(%arg0: i32) -> (i32, i32) {
    %c0_i32 = arith.constant 0 : i32
    %c0_i32_0 = arith.constant 0 : i32
    %c0_i32_1 = arith.constant 0 : i32
    return %c0_i32, %c0_i32_0 : i32, i32
  }
  func.func @transform_2(%arg0: i32) -> (i32, i32) {
    %c0_i32 = arith.constant 0 : i32
    %c0_i32_0 = arith.constant 0 : i32
    %c0_i32_1 = arith.constant 0 : i32
    return %c0_i32, %c0_i32_0 : i32, i32
  }
  func.func @transform_3(%arg0: i32) -> (i32, i32) {
    %c0_i32 = arith.constant 0 : i32
    %c0_i32_0 = arith.constant 0 : i32
    %c0_i32_1 = arith.constant 0 : i32
    return %c0_i32, %c0_i32_0 : i32, i32
  }
  func.func @transform_4(%arg0: i32) -> (i32, i32) {
    %c0_i32 = arith.constant 0 : i32
    %c0_i32_0 = arith.constant 0 : i32
    %c0_i32_1 = arith.constant 0 : i32
    return %c0_i32, %c0_i32_0 : i32, i32
  }
  func.func @transform_5(%arg0: i32) -> (i32, i32, i32) {
    %c0_i32 = arith.constant 0 : i32
    %c0_i32_0 = arith.constant 0 : i32
    %c0_i32_1 = arith.constant 0 : i32
    %c0_i32_2 = arith.constant 0 : i32
    return %c0_i32, %c0_i32_0, %c0_i32_1 : i32, i32, i32
  }
  func.func @transform_6(%arg0: i32) -> (i32, i32, i32) {
    %c0_i32 = arith.constant 0 : i32
    %c0_i32_0 = arith.constant 0 : i32
    %c0_i32_1 = arith.constant 0 : i32
    %c0_i32_2 = arith.constant 0 : i32
    return %c0_i32, %c0_i32_0, %c0_i32_1 : i32, i32, i32
  }
  func.func @transform_7(%arg0: i32) -> (i32, i32, i32) {
    %c0_i32 = arith.constant 0 : i32
    %c0_i32_0 = arith.constant 0 : i32
    %c0_i32_1 = arith.constant 0 : i32
    %c0_i32_2 = arith.constant 0 : i32
    return %c0_i32, %c0_i32_0, %c0_i32_1 : i32, i32, i32
  }
  func.func @transform_8(%arg0: i32) -> (i32, i32, i32) {
    %c0_i32 = arith.constant 0 : i32
    %c0_i32_0 = arith.constant 0 : i32
    %c0_i32_1 = arith.constant 0 : i32
    %c0_i32_2 = arith.constant 0 : i32
    return %c0_i32, %c0_i32_0, %c0_i32_1 : i32, i32, i32
  }
  func.func @transform_9(%arg0: i32) -> (i32, i32, i32) {
    %c0_i32 = arith.constant 0 : i32
    %c0_i32_0 = arith.constant 0 : i32
    %c0_i32_1 = arith.constant 0 : i32
    %c0_i32_2 = arith.constant 0 : i32
    return %c0_i32, %c0_i32_0, %c0_i32_1 : i32, i32, i32
  }
  func.func @transform_10(%arg0: i32) -> (i32, i32, i32) {
    %c0_i32 = arith.constant 0 : i32
    %c0_i32_0 = arith.constant 0 : i32
    %c0_i32_1 = arith.constant 0 : i32
    %c0_i32_2 = arith.constant 0 : i32
    return %c0_i32, %c0_i32_0, %c0_i32_1 : i32, i32, i32
  }
  func.func @transform_11(%arg0: i32) -> (i32, i32, i32) {
    %c0_i32 = arith.constant 0 : i32
    %c0_i32_0 = arith.constant 0 : i32
    %c0_i32_1 = arith.constant 0 : i32
    %c0_i32_2 = arith.constant 0 : i32
    return %c0_i32, %c0_i32_0, %c0_i32_1 : i32, i32, i32
  }
  func.func @transform_12(%arg0: i32) -> (i32, i32, i32) {
    %c0_i32 = arith.constant 0 : i32
    %c0_i32_0 = arith.constant 0 : i32
    %c0_i32_1 = arith.constant 0 : i32
    %c0_i32_2 = arith.constant 0 : i32
    return %c0_i32, %c0_i32_0, %c0_i32_1 : i32, i32, i32
  }
  func.func @transform_13(%arg0: i32) -> (i32, i32, i32) {
    %c0_i32 = arith.constant 0 : i32
    %c0_i32_0 = arith.constant 0 : i32
    %c0_i32_1 = arith.constant 0 : i32
    %c0_i32_2 = arith.constant 0 : i32
    return %c0_i32, %c0_i32_0, %c0_i32_1 : i32, i32, i32
  }
  func.func @transform_14(%arg0: i32) -> (i32, i32, i32) {
    %c0_i32 = arith.constant 0 : i32
    %c0_i32_0 = arith.constant 0 : i32
    %c0_i32_1 = arith.constant 0 : i32
    %c0_i32_2 = arith.constant 0 : i32
    return %c0_i32, %c0_i32_0, %c0_i32_1 : i32, i32, i32
  }
  func.func @transform_15(%arg0: i32) -> (i32, i32, i32) {
    %c0_i32 = arith.constant 0 : i32
    %c0_i32_0 = arith.constant 0 : i32
    %c0_i32_1 = arith.constant 0 : i32
    %c0_i32_2 = arith.constant 0 : i32
    return %c0_i32, %c0_i32_0, %c0_i32_1 : i32, i32, i32
  }
  func.func @transform_16(%arg0: i32) -> (i32, i32, i32) {
    %c0_i32 = arith.constant 0 : i32
    %c0_i32_0 = arith.constant 0 : i32
    %c0_i32_1 = arith.constant 0 : i32
    %c0_i32_2 = arith.constant 0 : i32
    return %c0_i32, %c0_i32_0, %c0_i32_1 : i32, i32, i32
  }
  func.func @transform_17(%arg0: i32) -> (i32, i32) {
    %c0_i32 = arith.constant 0 : i32
    %c0_i32_0 = arith.constant 0 : i32
    %c0_i32_1 = arith.constant 0 : i32
    return %c0_i32, %c0_i32_0 : i32, i32
  }
  func.func @transform_18(%arg0: i32) -> (i32, i32) {
    %c0_i32 = arith.constant 0 : i32
    %c0_i32_0 = arith.constant 0 : i32
    %c0_i32_1 = arith.constant 0 : i32
    return %c0_i32, %c0_i32_0 : i32, i32
  }
  func.func @transform_19(%arg0: i32) -> (i32, i32) {
    %c0_i32 = arith.constant 0 : i32
    %c0_i32_0 = arith.constant 0 : i32
    %c0_i32_1 = arith.constant 0 : i32
    return %c0_i32, %c0_i32_0 : i32, i32
  }
  func.func @transform_20(%arg0: i32) -> (i32, i32) {
    %c0_i32 = arith.constant 0 : i32
    %c0_i32_0 = arith.constant 0 : i32
    %c0_i32_1 = arith.constant 0 : i32
    return %c0_i32, %c0_i32_0 : i32, i32
  }
  func.func @transform_21(%arg0: i32) -> (i32, i32, i32) {
    %c0_i32 = arith.constant 0 : i32
    %c0_i32_0 = arith.constant 0 : i32
    %c0_i32_1 = arith.constant 0 : i32
    return %arg0, %c0_i32, %c0_i32_0 : i32, i32, i32
  }
}

</mosaic_0001>

<bundles_post_ra>
// kernel: vit_pooler_forward.1
= control target key start
LH: loop header
LB: loop body
LE: loop exit
PB: predicated region body
PF: predicated region fallthrough
CT: control target
= control target key end

     0   :  { %s6504_s0 = inlined_call_operand.vmem [shape: f32[2,16,48], index: 0, kind: input, shape index: {}]   ;;  %s6505_s1 = inlined_call_operand.vmem [shape: f32[48,32], index: 1, kind: input, shape index: {}]   ;;  %s6506_s2 = inlined_call_operand.vmem [shape: f32[1,32], index: 2, kind: input, shape index: {}]   ;;  %s6507_s3 = inlined_call_operand.vmem [shape: f32[1,32], index: 3, kind: input, shape index: {}]   ;;  %s6508_s4 = inlined_call_operand.vmem [shape: f32[24,32], index: 4, kind: input, shape index: {}]   ;;  %s6509_s5 = inlined_call_operand.vmem [shape: f32[2,1,32], index: 5, kind: input, shape index: {}]   ;;  %s6510_s6 = inlined_call_operand.vmem [shape: f32[2,1,32], index: 6, kind: input, shape index: {}]   ;;  %s6511_s7 = inlined_call_operand.vmem [shape: f32[2,32,96], index: 7, kind: input, shape index: {}]   ;;  %s6512_s8 = inlined_call_operand.vmem [shape: f32[2,1,96], index: 8, kind: input, shape index: {}]   ;;  %s6513_s9 = inlined_call_operand.vmem [shape: f32[2,32,32], index: 9, kind: input, shape index: {}]   ;;  %s6514_s10 = inlined_call_operand.vmem [shape: f32[2,1,32], index: 10, kind: input, shape index: {}]   ;;  %s6515_s11 = inlined_call_operand.vmem [shape: f32[2,1,32], index: 11, kind: input, shape index: {}]   ;;  %s6516_s12 = inlined_call_operand.vmem [shape: f32[2,1,32], index: 12, kind: input, shape index: {}]   ;;  %s6517_s13 = inlined_call_operand.vmem [shape: f32[2,32,64], index: 13, kind: input, shape index: {}]   ;;  %s6518_s14 = inlined_call_operand.vmem [shape: f32[2,1,64], index: 14, kind: input, shape index: {}]   ;;  %s6519_s15 = inlined_call_operand.vmem [shape: f32[2,64,32], index: 15, kind: input, shape index: {}]   ;;  %s6520_s16 = inlined_call_operand.vmem [shape: f32[2,1,32], index: 16, kind: input, shape index: {}]   ;;  %s6521_s17 = inlined_call_operand.vmem [shape: f32[1,32], index: 17, kind: input, shape index: {}]   ;;  %s6522_s18 = inlined_call_operand.vmem [shape: f32[1,32], index: 18, kind: input, shape index: {}]   ;;  %s6523_s19 = inlined_call_operand.vmem [shape: f32[32,32], index: 19, kind: input, shape index: {}]   ;;  %s6524_s20 = inlined_call_operand.vmem [shape: f32[1,32], index: 20, kind: input, shape index: {}]   ;;  %s6525_s21 = inlined_call_operand.hbm [shape: f32[2,1,32], index: 21, kind: output, shape index: {}]  }
   0x1   :  { %6563 = sst [smem:[#allocation12_spill]] %s6504_s0 }
   0x2   :  { %6564 = sst [smem:[#allocation13_spill]] %s6505_s1 }
   0x3   :  { %6565 = sst [smem:[#allocation14_spill]] %s6506_s2 }
   0x4   :  { %6566 = sst [smem:[#allocation15_spill]] %s6507_s3 }
   0x5   :  { %6567 = sst [smem:[#allocation16_spill]] %s6508_s4 }
   0x6   :  { %6568 = sst [smem:[#allocation17_spill]] %s6509_s5 }
   0x7   :  { %6569 = sst [smem:[#allocation18_spill]] %s6510_s6 }
   0x8   :  { %26 = vsyncpa [#allocation5], 0 }
   0x9   :  { %28 = vsyncpa [#allocation5 + $0x1], 0  ;;  %s5456_s2 = smov 0   ;;  %s5458_s25 = smov 0  }
   0xa   :  { %s5460_s26 = smov 0   ;;  %s5462_s27 = smov 0  }
   0xb LB: > { %6570 = sst [smem:[#allocation7_spill]] %s5313_s2  ;;  %s5477_s3 = sadd.s32 4294967295, %s5325_s27   ;;  %s5325_s27 = sphi %s5462_s27, %s6602_s27   ;;  %s5321_s26 = sphi %s5460_s26, %s6604_s26   ;;  %s5317_s25 = sphi %s5458_s25, %s6606_s25   ;;  %s5313_s2 = sphi %s5456_s2, %s6605_s2  }
   0xc   : > { %6571 = sst [smem:[#allocation8_spill]] %s5321_s26  ;;  %s4102_s28 = sadd.s32 4294967294, %s5325_s27  }
   0xd   : > { %s5481_s29 = sadd.s32 1, %s5325_s27   ;;  %s487_s0 = sadd.s32 1, %s5321_s26 }
   0xe   : > { %6572 = sst [smem:[#allocation9_spill]] %s5481_s29  ;;  %s484_s4 = ssub.s32 %s5325_s27, %s5481_s29 }
   0xf   : > { %p497_p0 = scmp.ne.s32.totalorder %s5321_s26, %s5317_s25  ;;  %p485_p1 = scmp.eq.s32.totalorder %s484_s4, 0 }
  0x10   : > { %p498_p2 = scmp.eq.s32.totalorder %s5477_s3, 1  ;;  %p503_p3 = scmp.ne.s32.totalorder %s5317_s25, %s5313_s2 }
  0x11   : > { %p504_p4 = scmp.eq.s32.totalorder %s4102_s28, 1  ;;  %p4105_p7 = scmp.ge.s32.totalorder %s5325_s27, 1 }
  0x12   : > { %s5492_s30 = scalar_select %p485_p1, %s5321_s26, %s487_s0  }
  0x13   : > { %p5494_p5 = por %p498_p2, %p497_p0  ;;  %p5498_p6 = por %p504_p4, %p503_p3 }
  0x14   : > { %6573 = sst [smem:[#allocation10_spill]] %s5492_s30  ;;  %p590_p8 = scmp.lt.s32.totalorder %s5325_s27, 3 }
  0x15   : > { %s6575_s22 = scalar_select %p5498_p6, 1, 0 }
  0x16   : > { %p591_p9 = pnand %p4105_p7, %p590_p8 }
  0x17   : > { %6576 = sst [smem:[#allocation11_spill]] %s6575_s22  ;;  %s6577_s24 = sld [smem:[#allocation13_spill]] (!%p591_p9)  ;;  %vm669_vm0 = vcmask (!%p591_p9), 392192   ;;  %vm754_vm1 = vcmask (!%p591_p9), 261120   ;;  %vm761_vm2 = vcmask (!%p591_p9), 253952   ;;  %v836_v47 = vld [vmem:[%s6511_s7] sm:$0xff] (!%p591_p9) }
  0x18   : > { %594 = sbr.rel (%p591_p9) target bundleno = 7121 (0x1bd1), region = 104  ;;  %p649_p10 = scmp.lt.s32.totalorder (!%p591_p9), %s5477_s3, 1  ;;  %v837_v48 = vld [vmem:[%s6511_s7 + $0x8] sm:$0xff] (!%p591_p9)  ;;  %v838_v49 = vld [vmem:[%s6511_s7 + $0x10] sm:$0xff] (!%p591_p9)  ;;  %v5327_v50 = vmov (!%p591_p9), 0.0|0.0   ;;  %v839_v52 = vld [vmem:[%s6511_s7 + $0x18] sm:$0xff] (!%p591_p9) }
  0x19   : > { %s6578_s26 = sld [smem:[#allocation12_spill]] (!%p591_p9)  ;;  %s6579_s23 = sld [smem:[#allocation16_spill]] (!%p591_p9)  ;;  %4861 = vmatprep.subr.bf16.mxu1 (!%p591_p9), %v5327_v50  ;;  %v4862_v51 = vpack.c.bf16 (!%p591_p9), %v837_v48, %v836_v47  ;;  %vm5328_vm3 = vmmov (!%p591_p9), 0   ;;  %v5329_v53 = vmov (!%p591_p9), 0.0   ;;  %v4865_v54 = vpack.c.bf16 (!%p591_p9), %v839_v52, %v838_v49 }
  0x1a   : > { %s6581_s1 = sld [smem:[#allocation14_spill]] (!%p591_p9)  ;;  %4454 = vmatprep.mubr.msk.f32.mxu1 (!%p591_p9), %vm5328_vm3, %v5329_v53  ;;  %s6583_s6 = sld [smem:[#allocation18_spill]] (!%p591_p9)  ;;  %vm945_vm4 = vcmask (!%p591_p9), 64512   ;;  %vm1044_vm7 = vcmask (!%p591_p9), 195584   ;;  %vm1432_vm8 = vcmask (!%p591_p9), 130112   ;;  %vm1689_vm9 = vcmask (!%p591_p9), 195712  }
  0x1b   : > { %4863 = vmatpush3.bf16.msra.mxu1 (!%p591_p9), %v4862_v51  ;;  %s6554_s2 = smov (!%p591_p9), 96   ;;  %vm5608_vm5 = vmpackc.low (!%p591_p9), %vm945_vm4, %vm945_vm4  ;;  %s6544_s22 = smov (!%p591_p9), 64   ;;  %vm1946_vm10 = vcmask (!%p591_p9), 261312   ;;  %vm2257_vm11 = vcmask (!%p591_p9), 523264  }
  0x1c   : > { %4864 = vmatprep.subr.bf16.mxu1 (!%p591_p9), %v5327_v50  ;;  %s6550_s0 = smov (!%p591_p9), 120   ;;  %s6548_s4 = smov (!%p591_p9), 112  }
  0x1d   : > { %v656_v0 = vld [vmem:[%s6577_s24] sm:$0xff] (!%p591_p9)  ;;  %v657_v1 = vld [vmem:[%s6577_s24 + $0x8] sm:$0xff] (!%p591_p9)  ;;  %v658_v2 = vld [vmem:[%s6577_s24 + $0x10] sm:$0xff] (!%p591_p9) }
  0x1e   : > { %v4849_v3 = vpack.c.bf16 (!%p591_p9), %v657_v1, %v656_v0  ;;  %v659_v4 = vld [vmem:[%s6577_s24 + $0x18] sm:$0xff] (!%p591_p9)  ;;  %v660_v6 = vld [vmem:[%s6577_s24 + $0x20] sm:$0xff] (!%p591_p9)  ;;  %v661_v7 = vld [vmem:[%s6577_s24 + $0x28] sm:$0xff] (!%p591_p9) }
  0x1f   : > { %v4853_v5 = vpack.c.bf16 %v659_v4, %v658_v2  ;;  %s650_s28 = scalar_select %p649_p10, %s5477_s3, 1  ;;  %v4857_v8 = vpack.c.bf16 %v661_v7, %v660_v6  ;;  %v752_v11 = vld [vmem:[%s6579_s23 + $0x8] sm:$0xff]  ;;  %v753_v12 = vld [vmem:[%s6579_s23 + $0x10] sm:$0xff]  ;;  %v751_v13 = vld [vmem:[%s6579_s23] sm:$0xff]  ;;  %4866 = vmatpush3.bf16.msra.mxu1 %v4865_v54 }
  0x20   : > { %4850 = vmatprep.subr.bf16.mxu0 %v4849_v3  ;;  %756 = vst.msk [vmem:[#allocation2 + $0x8] sm:$0xff] %vm754_vm1, %v752_v11  ;;  %757 = vst.msk [vmem:[#allocation2 + $0x10] sm:$0xff] %vm754_vm1, %v753_v12  ;;  %v4108_v17 = vld [vmem:[%s6581_s1] ss:$0 sm:$0xff]  ;;  %4867 = vmatprep.subr.bf16.mxu1 %v5327_v50  ;;  %s6546_s1 = smov 88   ;;  %s6589_s23 = smov 120  }
  0x21   : > { %4852 = vmatpush3.bf16.msra.mxu0 %v4849_v3  ;;  %s4257_s30 = sshll.u32 %s650_s28, 4  ;;  %755 = vst.msk [vmem:[#allocation2] sm:$0xff] %vm754_vm1, %v751_v13  ;;  %v4112_v3 = vld [vmem:[%s6583_s6] ss:$0 sm:$0xff]  ;;  %s6552_s28 = smov 80  }
  0x22   : > { %4854 = vmatprep.subr.bf16.mxu0 %v4853_v5  ;;  %s653_s29 = scalar_lea.vmem %s6578_s26, %s4257_s30  ;;  %s6582_s30 = sld [smem:[#allocation17_spill]] }
  0x23   : > { %v654_v9 = vld [vmem:[%s653_s29] sm:$0xff]  ;;  %v655_v10 = vld [vmem:[%s653_s29 + $0x8] sm:$0xff]  ;;  %s6580_s29 = sld [smem:[#allocation15_spill]]  ;;  %s6534_s26 = smov 104  }
  0x24   : > { %4443 = vmatprep.mubr.msk.f32.mxu0 %vm669_vm0, %v654_v9 }
  0x25   : > { %4856 = vmatpush3.bf16.msra.mxu0 %v4853_v5 }
  0x26   : > { %4858 = vmatprep.subr.bf16.mxu0 %v4857_v8 }
  0x27   : > { %v764_v19 = vld [vmem:[#allocation2 + $0x9] sm:$0xff] }
  0x28   : > { %v758_v14 = vld [vmem:[#allocation2] sm:$0x1]  ;;  %v763_v22 = vld [vmem:[#allocation2 + $0x1] sm:$0xff] }
  0x29   : > { %4860 = vmatpush3.bf16.msra.mxu0 %v4857_v8  ;;  %v759_v15 = vld [vmem:[%s6580_s29] sm:$0x1]  ;;  %s6536_s29 = smov 72  }
  0x2a   : > { %v760_v16 = vadd.f32 %v759_v15, %v758_v14  ;;  %4871 = vmatprep.subr.bf16.mxu0 %v5327_v50  ;;  %v4111_v1 = vld [vmem:[%s6582_s30] ss:$0 sm:$0xff] }
  0x2c   : > { %4444 = vmatmul.mubr.msk.f32.vlgmr.msra.gmra.mrb[0].mxu0 %vm669_vm0, %v655_v10  ;;  %762 = vst.msk [vmem:[#allocation2] sm:$0x1] %vm761_vm2, %v760_v16  ;;  %v4113_v16 = vld [vmem:[%s6512_s8] ss:$0 sm:$0xff] }
  0x2d   : > { %4484 = vmatprep.mubr.msk.f32.mxu0 %vm5328_vm3, %v5329_v53 }
  0xff   : > { %v4445_v18 = vpop.f32.mrb[0].mxu0 }
 0x100   : > { %v748_v20 = vadd.f32 %v4445_v18, %v4108_v17  ;;  %v742_v21 = vpop.f32.mrb[1].mxu0 }
 0x101   : > { %v743_v23 = vadd.f32 %v4108_v17, %v742_v21 }
 0x102   : > { %v766_v24 = vadd.f32 %v764_v19, %v748_v20 }
 0x103   : > { %v765_v25 = vadd.f32 %v763_v22, %v743_v23 }
 0x104   : > { %768 = vst.msk [vmem:[#allocation2 + $0x9] sm:$0xff] %vm754_vm1, %v766_v24 }
 0x105   : > { %767 = vst.msk [vmem:[#allocation2 + $0x1] sm:$0xff] %vm754_vm1, %v765_v25 }
 0x10b   : > { %v771_v26 = vld [vmem:[#allocation2 + $0x10] sm:$0xff] }
 0x10c   : > { %v784_v27 = vsel %vm754_vm1, %v771_v26, 0.0  ;;  %v769_v28 = vld [vmem:[#allocation2] sm:$0xff]  ;;  %v770_v30 = vld [vmem:[#allocation2 + $0x8] sm:$0xff] }
 0x10d   : > { %785 = vadd.xlane.f32.xlu1 %v784_v27  ;;  %v778_v29 = vsel %vm754_vm1, %v769_v28, 0.0  ;;  %v781_v31 = vsel %vm754_vm1, %v770_v30, 0.0 }
 0x10e   : > { %779 = vadd.xlane.f32.xlu0 %v778_v29 }
 0x112   : > { %782 = vadd.xlane.f32.xlu0 %v781_v31  ;;  %v772_v31 = vlaneseq }
 0x19a   : > { %v786_v32 = vpop.xlane.xlu1 %785 }
 0x19b   : > { %v790_v33 = vmul.f32 0.03125, %v786_v32  ;;  %v780_v34 = vpop.xlane.xlu0 %779  ;;  %v773_v32 = vand.u32 127, %v772_v31 }
 0x19c   : > { %v788_v35 = vmul.f32 0.03125, %v780_v34  ;;  %v5331_v34 = vmov -1e+30  }
 0x19d   : > { %v793_v36 = vsub.f32 %v771_v26, %v790_v33  ;;  %vm774_vm6 = vcmp.lt.s32.totalorder %v773_v32, 17 }
 0x19e   : > { %v791_v37 = vsub.f32 %v769_v28, %v788_v35  ;;  %v5629_v35 = vsel %vm774_vm6, 0.0, %v5331_v34 }
 0x19f   : > { %v783_v38 = vpop.xlane.xlu0 %782  ;;  %v796_v43 = vmul.f32 %v793_v36, %v793_v36 }
 0x1a0   : > { %v789_v39 = vmul.f32 0.03125, %v783_v38  ;;  %v794_v40 = vmul.f32 %v791_v37, %v791_v37 }
 0x1a1   : > { %v803_v45 = vsel %vm754_vm1, %v796_v43, 0.0 }
 0x1a2   : > { %v792_v41 = vsub.f32 %v770_v30, %v789_v39  ;;  %v797_v42 = vsel %vm754_vm1, %v794_v40, 0.0 }
 0x1a3   : > { %798 = vadd.xlane.f32.xlu1 %v797_v42 }
 0x1a4   : > { %v795_v44 = vmul.f32 %v792_v41, %v792_v41 }
 0x1a6   : > { %v800_v46 = vsel %vm754_vm1, %v795_v44, 0.0 }
 0x1a7   : > { %804 = vadd.xlane.f32.xlu1 %v803_v45  ;;  %801 = vadd.xlane.f32.xlu0 %v800_v46 }
 0x230   : > { %v799_v55 = vpop.xlane.xlu1 %798 }
 0x231   : > { %v806_v56 = vmul.f32 0.03125, %v799_v55 }
 0x233   : > { %v809_v57 = vadd.f32 1e-12, %v806_v56 }
 0x234   : > { %v805_v58 = vpop.xlane.xlu1 %804  ;;  %v802_v59 = vpop.xlane.xlu0 %801 }
 0x235   : > { %5124 = vrsqrt.f32 %v809_v57  ;;  %v808_v60 = vmul.f32 0.03125, %v805_v58  ;;  %v807_v61 = vmul.f32 0.03125, %v802_v59 }
 0x237   : > { %v811_v62 = vadd.f32 1e-12, %v808_v60  ;;  %v810_v63 = vadd.f32 1e-12, %v807_v61 }
 0x239   : > { %5126 = vrsqrt.f32 %v811_v62 }
 0x23a   : > { %5128 = vrsqrt.f32 %v810_v63 }
 0x23f   : > { %v5125_v0 = vpop.eup %5124 }
 0x240   : > { %v815_v2 = vmul.f32 %v5125_v0, %v791_v37 }
 0x242   : > { %v824_v4 = vmul.f32 %v4111_v1, %v815_v2 }
 0x243   : > { %v5127_v5 = vpop.eup %5126 }
 0x244   : > { %v5129_v6 = vpop.eup %5128  ;;  %v833_v7 = vadd.f32 %v4112_v3, %v824_v4  ;;  %v817_v9 = vmul.f32 %v5127_v5, %v793_v36 }
 0x245   : > { %v816_v8 = vmul.f32 %v5129_v6, %v792_v41 }
 0x246   : > { %4455 = vmatmul.mubr.msk.f32.vlgmr.msra.gmra.mrb[0].mxu1 %vm754_vm1, %v833_v7  ;;  %v826_v12 = vmul.f32 %v4111_v1, %v817_v9 }
 0x247   : > { %4457 = vmatprep.mubr.msk.f32.mxu1 %vm5328_vm3, %v5329_v53  ;;  %v825_v10 = vmul.f32 %v4111_v1, %v816_v8 }
 0x248   : > { %v835_v13 = vadd.f32 %v4112_v3, %v826_v12 }
 0x249   : > { %v834_v11 = vadd.f32 %v4112_v3, %v825_v10 }
 0x24b   : > { %4458 = vmatmul.mubr.msk.f32.gmra.mrb[2].mxu1 %vm754_vm1, %v834_v11 }
 0x24c   : > { %4460 = vmatprep.mubr.msk.f32.mxu1 %vm5328_vm3, %v5329_v53 }
 0x24f   : > { %4461 = vmatmul.mubr.msk.f32.gmra.mrb[4].mxu1 %vm754_vm1, %v835_v13 }
 0x250   : > { %4469 = vmatprep.mubr.msk.f32.mxu1 %vm5328_vm3, %v5329_v53 }
 0x319   : > { %v922_v14 = vpop.f32.mrb[0].mxu1 }
 0x31a   : > { %v4456_v15 = vpop.f32.mrb[1].mxu1  ;;  %v5592_v18 = vadd.f32 %v4113_v16, %v922_v14 }
 0x31e   : > { %v927_v17 = vpop.f32.mrb[2].mxu1 }
 0x31f   : > { %v5594_v19 = vadd.f32 %v4113_v16, %v927_v17  ;;  %v4459_v20 = vpop.f32.mrb[3].mxu1 }
 0x321   : > { %v5598_v21 = vpack.i.bf16 %v5594_v19, %v5592_v18 }
 0x322   : > { %v932_v22 = vpop.f32.mrb[4].mxu1 }
 0x323   : > { %v5600_v23 = vadd.f32 %v4113_v16, %v932_v22  ;;  %5045 = vrot.lane.b32.xlu0 %v5598_v21, %s6554_s2  ;;  %v4462_v24 = vpop.f32.mrb[5].mxu1 }
 0x325   : > { %943 = vrot.lane.b32.xlu1 %v5600_v23, %s6554_s2  ;;  %s6586_s2 = smov 8  }
 0x395   : > { %v5046_v25 = vpop.permute.xlu0 %5045 }
 0x396   : > { %v5048_v26 = vunpack.i.h.bf16 %v5046_v25  ;;  %v5047_v27 = vunpack.i.l.bf16 %v5046_v25 }
 0x397   : > { %v944_v30 = vpop.permute.xlu1 %943 }
 0x398   : > { %v4868_v29 = vpack.c.bf16 %v5048_v26, %v5047_v27 }
 0x39a   : > { %4870 = vmatpush3.bf16.xpose.msk.msra.mxu1 %vm5608_vm5, %v4868_v29 }
 0x39b   : > { %4467 = vmatprep.subr.mxu1 %v5329_v53 }
 0x3a2   : > { %4468 = vmatpush3.xpose.msk.msra.mxu1 %vm945_vm4, %v944_v30 }
 0x3a3   : > { %4878 = vmatprep.subr.bf16.mxu1 %v5327_v50 }
 0x3a5   : > { %4470 = vmatmul.mubr.msk.f32.vlgmr.msra.gmra.mrb[6].mxu1 %vm945_vm4, %v5592_v18 }
 0x3a6   : > { %4472 = vmatprep.mubr.msk.f32.mxu1 %vm5328_vm3, %v5329_v53 }
 0x3a9   : > { %4473 = vmatmul.mubr.msk.f32.gmra.mrb[8].mxu1 %vm945_vm4, %v5594_v19 }
 0x3aa   : > { %4475 = vmatprep.mubr.msk.f32.mxu1 %vm5328_vm3, %v5329_v53 }
 0x3ad   : > { %4476 = vmatmul.mubr.msk.f32.gmra.mrb[10].mxu1 %vm945_vm4, %v5600_v23 }
 0x3ae   : > { %4514 = vmatprep.mubr.msk.f32.mxu1 %vm5328_vm3, %v5329_v53 }
 0x478   : > { %v1024_v33 = vpop.f32.mrb[6].mxu1 }
 0x479   : > { %v1038_v36 = vmul.f32 0.35355338, %v1024_v33  ;;  %v4471_v37 = vpop.f32.mrb[7].mxu1 }
 0x47b   : > { %v1041_v38 = vadd.f32 %v1038_v36, %v5629_v35 }
 0x47c   : > { %v1029_v39 = vpop.f32.mrb[8].mxu1 }
 0x47d   : > { %v1039_v40 = vmul.f32 0.35355338, %v1029_v39  ;;  %v4474_v41 = vpop.f32.mrb[9].mxu1  ;;  %v1045_v42 = vsel %vm1044_vm7, %v1041_v38, -inf }
 0x47e   : > { %1046 = vmax.xlane.f32.xlu1 %v1045_v42 }
 0x47f   : > { %v1042_v43 = vadd.f32 %v1039_v40, %v5629_v35 }
 0x480   : > { %v1034_v44 = vpop.f32.mrb[10].mxu1 }
 0x481   : > { %v1040_v45 = vmul.f32 0.35355338, %v1034_v44  ;;  %v4477_v46 = vpop.f32.mrb[11].mxu1  ;;  %v1048_v47 = vsel %vm1044_vm7, %v1042_v43, -inf }
 0x482   : > { %1049 = vmax.xlane.f32.xlu0 %v1048_v47 }
 0x483   : > { %v1043_v48 = vadd.f32 %v1040_v45, %v5629_v35 }
 0x485   : > { %v1051_v49 = vsel %vm1044_vm7, %v1043_v48, -inf }
 0x486   : > { %1052 = vmax.xlane.f32.xlu0 %v1051_v49 }
 0x50b   : > { %v1047_v51 = vpop.xlane.xlu1 %1046 }
 0x50c   : > { %v1054_v52 = vsub.f32 %v1041_v38, %v1047_v51 }
 0x50e   : > { %v1057_v54 = vmul.f32 1.442695, %v1054_v52 }
 0x50f   : > { %v1050_v55 = vpop.xlane.xlu0 %1049 }
 0x510   : > { %5130 = vpow2.f32 %v1057_v54  ;;  %v1055_v56 = vsub.f32 %v1042_v43, %v1050_v55 }
 0x512   : > { %v1059_v57 = vmul.f32 1.442695, %v1055_v56 }
 0x513   : > { %v1053_v62 = vpop.xlane.xlu0 %1052 }
 0x514   : > { %5132 = vpow2.f32 %v1059_v57  ;;  %v1056_v63 = vsub.f32 %v1043_v48, %v1053_v62 }
 0x516   : > { %v1061_v0 = vmul.f32 1.442695, %v1056_v63 }
 0x518   : > { %5134 = vpow2.f32 %v1061_v0 }
 0x51a   : > { %v5131_v58 = vpop.eup %5130 }
 0x51b   : > { %v1063_v59 = vsel %vm1044_vm7, %v5131_v58, 0.0 }
 0x51c   : > { %1064 = vadd.xlane.f32.xlu1 %v1063_v59 }
 0x51e   : > { %v5133_v60 = vpop.eup %5132 }
 0x51f   : > { %v1066_v61 = vsel %vm1044_vm7, %v5133_v60, 0.0 }
 0x520   : > { %1067 = vadd.xlane.f32.xlu0 %v1066_v61 }
 0x522   : > { %v5135_v1 = vpop.eup %5134 }
 0x523   : > { %v1069_v2 = vsel %vm1044_vm7, %v5135_v1, 0.0 }
 0x52d   : > { %1082 = vrot.lane.b32.xlu1 %v5600_v23, %s6544_s22 }
 0x531   : > { %5055 = vrot.lane.b32.xlu1 %v5598_v21, %s6546_s1 }
 0x535   : > { %1189 = vrot.lane.b32.xlu1 %v5600_v23, %s6546_s1  ;;  %s6558_s1 = smov 24  }
 0x536   : > { %5050 = vrot.lane.b32.xlu0 %v5598_v21, %s6544_s22  ;;  %s6594_s22 = smov 48  }
 0x53a   : > { %5060 = vrot.lane.b32.xlu0 %v5598_v21, %s6552_s28 }
 0x53e   : > { %1181 = vrot.lane.b32.xlu0 %v5594_v19, %s6550_s0 }
 0x542   : > { %1446 = vrot.lane.b32.xlu0 %v5600_v23, %s6552_s28  ;;  %s6587_s28 = smov 96  }
 0x546   : > { %1436 = vrot.lane.b32.xlu0 %v5592_v18, %s6548_s4 }
 0x54a   : > { %1440 = vrot.lane.b32.xlu0 %v5600_v23, %s6548_s4 }
 0x54e   : > { %1693 = vrot.lane.b32.xlu0 %v5592_v18, %s6534_s26 }
 0x552   : > { %1697 = vrot.lane.b32.xlu0 %v5600_v23, %s6534_s26 }
 0x559   : > { %1070 = vadd.xlane.f32.xlu1 %v1069_v2 }
 0x56a   : > { %1179 = vrot.lane.b32.xlu1 %v5592_v18, %s6550_s0 }
 0x56e   : > { %1183 = vrot.lane.b32.xlu1 %v5600_v23, %s6550_s0  ;;  %s6560_s0 = smov 16  }
 0x572   : > { %5065 = vrot.lane.b32.xlu1 %v5598_v21, %s6536_s29 }
 0x576   : > { %1438 = vrot.lane.b32.xlu1 %v5594_v19, %s6548_s4  ;;  %s6588_s4 = smov 80  }
 0x57a   : > { %1703 = vrot.lane.b32.xlu1 %v5600_v23, %s6536_s29  ;;  %s6542_s29 = smov 48  }
 0x57e   : > { %1695 = vrot.lane.b32.xlu1 %v5594_v19, %s6534_s26  ;;  %s6538_s26 = smov 56  }
 0x5a9   : > { %v1065_v3 = vpop.xlane.xlu1 %1064 }
 0x5aa   : > { %5136 = vrcp.f32 %v1065_v3 }
 0x5ad   : > { %v1068_v4 = vpop.xlane.xlu0 %1067  ;;  %v1083_v6 = vpop.permute.xlu1 %1082 }
 0x5ae   : > { %5138 = vrcp.f32 %v1068_v4 }
 0x5b1   : > { %v5051_v5 = vpop.permute.xlu0 %5050  ;;  %v5056_v11 = vpop.permute.xlu1 %5055 }
 0x5b2   : > { %v5053_v7 = vunpack.i.h.bf16 %v5051_v5  ;;  %v5052_v8 = vunpack.i.l.bf16 %v5051_v5  ;;  %v5058_v14 = vunpack.i.h.bf16 %v5056_v11  ;;  %v5057_v15 = vunpack.i.l.bf16 %v5056_v11 }
 0x5b4   : > { %v4872_v9 = vpack.c.bf16 %v5053_v7, %v5052_v8  ;;  %v5137_v10 = vpop.eup %5136  ;;  %v4875_v17 = vpack.c.bf16 %v5058_v14, %v5057_v15 }
 0x5b5   : > { %v1075_v12 = vmul.f32 %v5137_v10, %v5131_v58  ;;  %v1190_v18 = vpop.permute.xlu1 %1189  ;;  %v5061_v20 = vpop.permute.xlu0 %5060 }
 0x5b6   : > { %4873 = vmatpush3.bf16.msra.mxu0 %v4872_v9  ;;  %v5063_v26 = vunpack.i.h.bf16 %v5061_v20  ;;  %v5062_v27 = vunpack.i.l.bf16 %v5061_v20 }
 0x5b7   : > { %4482 = vmatprep.subr.mxu0 %v5329_v53 }
 0x5b8   : > { %v5139_v13 = vpop.eup %5138  ;;  %v4882_v30 = vpack.c.bf16 %v5063_v26, %v5062_v27 }
 0x5b9   : > { %v1076_v16 = vmul.f32 %v5139_v13, %v5133_v60  ;;  %v1182_v31 = vpop.permute.xlu0 %1181 }
 0x5ba   : > { %4483 = vmatpush3.msra.mxu0 %v1083_v6 }
 0x5bb   : > { %4485 = vmatmul.mubr.msk.f32.vlgmr.msra.gmra.mrb[2].mxu0 %vm1044_vm7, %v1075_v12  ;;  %4874 = vmatprep.subr.bf16.mxu0 %v5327_v50 }
 0x5bc   : > { %4487 = vmatprep.mubr.msk.f32.mxu0 %vm5328_vm3, %v5329_v53 }
 0x5bd   : > { %v1447_v33 = vpop.permute.xlu0 %1446 }
 0x5bf   : > { %4488 = vmatmul.mubr.msk.f32.gmra.mrb[4].mxu0 %vm1044_vm7, %v1076_v16 }
 0x5c0   : > { %4490 = vmatprep.mubr.msk.f32.mxu0 %vm5328_vm3, %v5329_v53 }
 0x5c1   : > { %4877 = vmatpush3.bf16.xpose.msk.msra.mxu0 %vm5608_vm5, %v4875_v17  ;;  %v1437_v37 = vpop.permute.xlu0 %1436 }
 0x5c2   : > { %4497 = vmatprep.subr.mxu0 %v5329_v53 }
 0x5c5   : > { %v1441_v40 = vpop.permute.xlu0 %1440 }
 0x5c9   : > { %4498 = vmatpush3.xpose.msk.msra.mxu0 %vm945_vm4, %v1190_v18  ;;  %v1694_v42 = vpop.permute.xlu0 %1693 }
 0x5ca   : > { %4881 = vmatprep.subr.bf16.mxu0 %v5327_v50 }
 0x5cd   : > { %v1698_v44 = vpop.permute.xlu0 %1697 }
 0x5e6   : > { %v1071_v19 = vpop.xlane.xlu1 %1070 }
 0x5e7   : > { %5140 = vrcp.f32 %v1071_v19 }
 0x5ea   : > { %v1180_v22 = vpop.permute.xlu1 %1179 }
 0x5ee   : > { %v1184_v29 = vpop.permute.xlu1 %1183 }
 0x5f1   : > { %v5141_v24 = vpop.eup %5140 }
 0x5f2   : > { %v1077_v25 = vmul.f32 %v5141_v24, %v5135_v1  ;;  %v5066_v32 = vpop.permute.xlu1 %5065 }
 0x5f3   : > { %v5068_v34 = vunpack.i.h.bf16 %v5066_v32  ;;  %v5067_v36 = vunpack.i.l.bf16 %v5066_v32 }
 0x5f4   : > { %4491 = vmatmul.mubr.msk.f32.gmra.mrb[6].mxu0 %vm1044_vm7, %v1077_v25 }
 0x5f5   : > { %4499 = vmatprep.mubr.msk.f32.mxu0 %vm5328_vm3, %v5329_v53  ;;  %v4889_v38 = vpack.c.bf16 %v5068_v34, %v5067_v36 }
 0x5f6   : > { %v1439_v39 = vpop.permute.xlu1 %1438 }
 0x5f8   : > { %4500 = vmatmul.mubr.msk.f32.vlgmr.msra.gmra.mrb[8].mxu0 %vm945_vm4, %v1180_v22 }
 0x5f9   : > { %4884 = vmatpush3.bf16.xpose.msk.msra.mxu0 %vm5608_vm5, %v4882_v30  ;;  %4502 = vmatprep.mubr.msk.f32.mxu0 %vm5328_vm3, %v5329_v53 }
 0x5fa   : > { %4527 = vmatprep.subr.mxu0 %v5329_v53  ;;  %v1704_v41 = vpop.permute.xlu1 %1703 }
 0x5fc   : > { %4503 = vmatmul.mubr.msk.f32.gmra.mrb[10].mxu0 %vm945_vm4, %v1182_v31 }
 0x5fd   : > { %4505 = vmatprep.mubr.msk.f32.mxu0 %vm5328_vm3, %v5329_v53 }
 0x5fe   : > { %v1696_v43 = vpop.permute.xlu1 %1695 }
 0x600   : > { %4506 = vmatmul.mubr.msk.f32.gmra.mrb[12].mxu0 %vm945_vm4, %v1184_v29 }
 0x601   : > { %4528 = vmatpush3.xpose.msk.msra.mxu0 %vm945_vm4, %v1447_v33  ;;  %4529 = vmatprep.mubr.msk.f32.mxu0 %vm5328_vm3, %v5329_v53 }
 0x602   : > { %4888 = vmatprep.subr.bf16.mxu0 %v5327_v50 }
 0x604   : > { %4530 = vmatmul.mubr.msk.f32.vlgmr.msra.gmra.mrb[14].mxu0 %vm945_vm4, %v1437_v37 }
 0x605   : > { %4891 = vmatpush3.bf16.xpose.msk.msra.mxu0 %vm5608_vm5, %v4889_v38  ;;  %4532 = vmatprep.mubr.msk.f32.mxu0 %vm5328_vm3, %v5329_v53 }
 0x606   : > { %4557 = vmatprep.subr.mxu0 %v5329_v53 }
 0x608   : > { %4533 = vmatmul.mubr.msk.f32.gmra.mrb[16].mxu0 %vm945_vm4, %v1439_v39 }
 0x609   : > { %4535 = vmatprep.mubr.msk.f32.mxu0 %vm5328_vm3, %v5329_v53 }
 0x60c   : > { %4536 = vmatmul.mubr.msk.f32.gmra.mrb[18].mxu0 %vm945_vm4, %v1441_v40 }
 0x60d   : > { %4558 = vmatpush3.xpose.msk.msra.mxu0 %vm945_vm4, %v1704_v41  ;;  %4559 = vmatprep.mubr.msk.f32.mxu0 %vm5328_vm3, %v5329_v53 }
 0x60e   : > { %4895 = vmatprep.subr.bf16.mxu0 %v5327_v50 }
 0x610   : > { %4560 = vmatmul.mubr.msk.f32.vlgmr.msra.gmra.mrb[20].mxu0 %vm945_vm4, %v1694_v42 }
 0x611   : > { %4562 = vmatprep.mubr.msk.f32.mxu0 %vm5328_vm3, %v5329_v53 }
 0x614   : > { %4563 = vmatmul.mubr.msk.f32.gmra.mrb[22].mxu0 %vm945_vm4, %v1696_v43 }
 0x615   : > { %4565 = vmatprep.mubr.msk.f32.mxu0 %vm5328_vm3, %v5329_v53 }
 0x618   : > { %4566 = vmatmul.mubr.msk.f32.gmra.mrb[24].mxu0 %vm945_vm4, %v1698_v44 }
 0x619   : > { %4591 = vmatprep.mubr.msk.f32.mxu0 %vm5328_vm3, %v5329_v53 }
 0x68e   : > { %v1162_v45 = vpop.f32.mrb[2].mxu0 }
 0x68f   : > { %1176 = vst.msk [vmem:[#allocation3] sm:$0xff] %vm945_vm4, %v1162_v45  ;;  %v4486_v46 = vpop.f32.mrb[3].mxu0 }
 0x692   : > { %v1167_v47 = vpop.f32.mrb[4].mxu0 }
 0x693   : > { %1177 = vst.msk [vmem:[#allocation3 + $0x8] sm:$0xff] %vm945_vm4, %v1167_v47  ;;  %v4489_v48 = vpop.f32.mrb[5].mxu0 }
 0x6c7   : > { %v1172_v49 = vpop.f32.mrb[6].mxu0 }
 0x6c8   : > { %1178 = vst.msk [vmem:[#allocation3 + $0x10] sm:$0xff] %vm945_vm4, %v1172_v49  ;;  %v4492_v51 = vpop.f32.mrb[7].mxu0 }
 0x6cb   : > { %v1269_v52 = vpop.f32.mrb[8].mxu0 }
 0x6cc   : > { %v1283_v54 = vmul.f32 0.35355338, %v1269_v52  ;;  %v4501_v55 = vpop.f32.mrb[9].mxu0 }
 0x6ce   : > { %v1286_v56 = vadd.f32 %v1283_v54, %v5629_v35 }
 0x6cf   : > { %v1274_v57 = vpop.f32.mrb[10].mxu0 }
 0x6d0   : > { %v1284_v58 = vmul.f32 0.35355338, %v1274_v57  ;;  %v4504_v59 = vpop.f32.mrb[11].mxu0  ;;  %v1289_v60 = vsel %vm1044_vm7, %v1286_v56, -inf }
 0x6d1   : > { %1290 = vmax.xlane.f32.xlu1 %v1289_v60 }
 0x6d2   : > { %v1287_v61 = vadd.f32 %v1284_v58, %v5629_v35 }
 0x6d3   : > { %v1279_v62 = vpop.f32.mrb[12].mxu0 }
 0x6d4   : > { %v1285_v63 = vmul.f32 0.35355338, %v1279_v62  ;;  %v4507_v0 = vpop.f32.mrb[13].mxu0  ;;  %v1292_v1 = vsel %vm1044_vm7, %v1287_v61, -inf }
 0x6d5   : > { %1293 = vmax.xlane.f32.xlu0 %v1292_v1 }
 0x6d6   : > { %v1288_v2 = vadd.f32 %v1285_v63, %v5629_v35 }
 0x6d7   : > { %v1526_v3 = vpop.f32.mrb[14].mxu0 }
 0x6d8   : > { %v1540_v4 = vmul.f32 0.35355338, %v1526_v3  ;;  %v4531_v5 = vpop.f32.mrb[15].mxu0  ;;  %v1295_v6 = vsel %vm1044_vm7, %v1288_v2, -inf }
 0x6d9   : > { %1296 = vmax.xlane.f32.xlu0 %v1295_v6 }
 0x6da   : > { %v1543_v7 = vadd.f32 %v1540_v4, %v5629_v35 }
 0x6db   : > { %v1531_v8 = vpop.f32.mrb[16].mxu0 }
 0x6dc   : > { %v1541_v9 = vmul.f32 0.35355338, %v1531_v8  ;;  %v4534_v10 = vpop.f32.mrb[17].mxu0  ;;  %v1546_v11 = vsel %vm1044_vm7, %v1543_v7, -inf }
 0x6dd   : > { %1547 = vmax.xlane.f32.xlu0 %v1546_v11 }
 0x6de   : > { %v1544_v12 = vadd.f32 %v1541_v9, %v5629_v35 }
 0x6df   : > { %v1536_v13 = vpop.f32.mrb[18].mxu0 }
 0x6e0   : > { %v1542_v14 = vmul.f32 0.35355338, %v1536_v13  ;;  %v4537_v15 = vpop.f32.mrb[19].mxu0  ;;  %v1549_v16 = vsel %vm1044_vm7, %v1544_v12, -inf }
 0x6e1   : > { %1550 = vmax.xlane.f32.xlu1 %v1549_v16 }
 0x6e2   : > { %v1545_v17 = vadd.f32 %v1542_v14, %v5629_v35 }
 0x6e3   : > { %v1783_v18 = vpop.f32.mrb[20].mxu0 }
 0x6e4   : > { %v1797_v19 = vmul.f32 0.35355338, %v1783_v18  ;;  %v4561_v20 = vpop.f32.mrb[21].mxu0  ;;  %v1552_v22 = vsel %vm1044_vm7, %v1545_v17, -inf }
 0x6e5   : > { %1553 = vmax.xlane.f32.xlu0 %v1552_v22 }
 0x6e6   : > { %v1800_v24 = vadd.f32 %v1797_v19, %v5629_v35 }
 0x6e7   : > { %v1788_v25 = vpop.f32.mrb[22].mxu0 }
 0x6e8   : > { %v1798_v26 = vmul.f32 0.35355338, %v1788_v25  ;;  %v4564_v27 = vpop.f32.mrb[23].mxu0  ;;  %v1803_v29 = vsel %vm1044_vm7, %v1800_v24, -inf }
 0x6e9   : > { %1804 = vmax.xlane.f32.xlu1 %v1803_v29 }
 0x6ea   : > { %v1801_v30 = vadd.f32 %v1798_v26, %v5629_v35 }
 0x6eb   : > { %v1793_v31 = vpop.f32.mrb[24].mxu0 }
 0x6ec   : > { %v1799_v32 = vmul.f32 0.35355338, %v1793_v31  ;;  %v4567_v33 = vpop.f32.mrb[25].mxu0  ;;  %v1806_v34 = vsel %vm1044_vm7, %v1801_v30, -inf }
 0x6ed   : > { %1807 = vmax.xlane.f32.xlu0 %v1806_v34 }
 0x6ee   : > { %v5747_v36 = vadd.f32 %v1799_v32, %v5629_v35 }
 0x6f0   : > { %v1809_v37 = vsel %vm1044_vm7, %v5747_v36, -inf }
 0x6f1   : > { %1810 = vmax.xlane.f32.xlu1 %v1809_v37 }
 0x702   : > { %5070 = vrot.lane.b32.xlu1 %v5598_v21, %s6538_s26 }
 0x703   : > { %1326 = vrot.lane.b32.xlu0 %v5600_v23, %s6538_s26  ;;  %s6540_s26 = smov 40  }
 0x707   : > { %5075 = vrot.lane.b32.xlu0 %v5598_v21, %s6542_s29 }
 0x75e   : > { %v1291_v38 = vpop.xlane.xlu1 %1290 }
 0x75f   : > { %v1298_v39 = vsub.f32 %v1286_v56, %v1291_v38 }
 0x761   : > { %v1301_v40 = vmul.f32 1.442695, %v1298_v39 }
 0x762   : > { %v1294_v41 = vpop.xlane.xlu0 %1293 }
 0x763   : > { %5142 = vpow2.f32 %v1301_v40  ;;  %v1299_v42 = vsub.f32 %v1287_v61, %v1294_v41 }
 0x765   : > { %v1303_v43 = vmul.f32 1.442695, %v1299_v42 }
 0x766   : > { %v1297_v44 = vpop.xlane.xlu0 %1296 }
 0x767   : > { %5144 = vpow2.f32 %v1303_v43  ;;  %v1300_v45 = vsub.f32 %v1288_v2, %v1297_v44 }
 0x769   : > { %v1305_v46 = vmul.f32 1.442695, %v1300_v45 }
 0x76a   : > { %v1548_v47 = vpop.xlane.xlu0 %1547 }
 0x76b   : > { %5146 = vpow2.f32 %v1305_v46  ;;  %v1555_v48 = vsub.f32 %v1543_v7, %v1548_v47 }
 0x76d   : > { %v5757_v49 = vpop.eup %5142  ;;  %v1558_v51 = vmul.f32 1.442695, %v1555_v48 }
 0x76e   : > { %v1551_v52 = vpop.xlane.xlu1 %1550  ;;  %v1307_v54 = vsel %vm1044_vm7, %v5757_v49, 0.0 }
 0x76f   : > { %5148 = vpow2.f32 %v1558_v51  ;;  %v1556_v55 = vsub.f32 %v1544_v12, %v1551_v52  ;;  %1308 = vadd.xlane.f32.xlu0 %v1307_v54 }
 0x771   : > { %v5761_v56 = vpop.eup %5144  ;;  %v1560_v57 = vmul.f32 1.442695, %v1556_v55 }
 0x772   : > { %v1554_v58 = vpop.xlane.xlu0 %1553  ;;  %v1310_v59 = vsel %vm1044_vm7, %v5761_v56, 0.0 }
 0x773   : > { %5150 = vpow2.f32 %v1560_v57  ;;  %v1557_v60 = vsub.f32 %v1545_v17, %v1554_v58  ;;  %1311 = vadd.xlane.f32.xlu1 %v1310_v59 }
 0x775   : > { %v5765_v61 = vpop.eup %5146  ;;  %v1562_v62 = vmul.f32 1.442695, %v1557_v60 }
 0x776   : > { %v1805_v63 = vpop.xlane.xlu1 %1804  ;;  %v1313_v0 = vsel %vm1044_vm7, %v5765_v61, 0.0 }
 0x777   : > { %5152 = vpow2.f32 %v1562_v62  ;;  %v1812_v1 = vsub.f32 %v1800_v24, %v1805_v63  ;;  %1314 = vadd.xlane.f32.xlu0 %v1313_v0 }
 0x779   : > { %v5769_v2 = vpop.eup %5148  ;;  %v1815_v3 = vmul.f32 1.442695, %v1812_v1 }
 0x77a   : > { %v1808_v4 = vpop.xlane.xlu0 %1807  ;;  %v1564_v5 = vsel %vm1044_vm7, %v5769_v2, 0.0 }
 0x77b   : > { %5154 = vpow2.f32 %v1815_v3  ;;  %v1813_v6 = vsub.f32 %v1801_v30, %v1808_v4  ;;  %1565 = vadd.xlane.f32.xlu1 %v1564_v5 }
 0x77d   : > { %v5773_v7 = vpop.eup %5150  ;;  %v1817_v8 = vmul.f32 1.442695, %v1813_v6 }
 0x77e   : > { %v1811_v9 = vpop.xlane.xlu1 %1810  ;;  %v1567_v10 = vsel %vm1044_vm7, %v5773_v7, 0.0  ;;  %v1327_v22 = vpop.permute.xlu0 %1326 }
 0x77f   : > { %5156 = vpow2.f32 %v1817_v8  ;;  %1568 = vadd.xlane.f32.xlu0 %v1567_v10  ;;  %v1814_v24 = vsub.f32 %v5747_v36, %v1811_v9  ;;  %v1953_v9 = vld [vmem:[%s6513_s9] sm:$0xff]  ;;  %v1954_v10 = vld [vmem:[%s6513_s9 + $0x8] sm:$0xff] }
 0x781   : > { %v5777_v11 = vpop.eup %5152  ;;  %v1819_v25 = vmul.f32 1.442695, %v1814_v24 }
 0x782   : > { %v5071_v12 = vpop.permute.xlu1 %5070  ;;  %v1570_v13 = vsel %vm1044_vm7, %v5777_v11, 0.0  ;;  %v5076_v29 = vpop.permute.xlu0 %5075 }
 0x783   : > { %v5073_v14 = vunpack.i.h.bf16 %v5071_v12  ;;  %1571 = vadd.xlane.f32.xlu0 %v1570_v13  ;;  %v5072_v15 = vunpack.i.l.bf16 %v5071_v12  ;;  %5158 = vpow2.f32 %v1819_v25  ;;  %v5078_v32 = vunpack.i.h.bf16 %v5076_v29 }
 0x784   : > { %v5077_v33 = vunpack.i.l.bf16 %v5076_v29  ;;  %v4896_v12 = vpack.c.bf16 %v1954_v10, %v1953_v9  ;;  %v2116_v9 = vld [vmem:[%s6517_s13 + $0x8] sm:$0xff] }
 0x785   : > { %v5781_v16 = vpop.eup %5154  ;;  %v4879_v17 = vpack.c.bf16 %v5073_v14, %v5072_v15  ;;  %v1955_v14 = vld [vmem:[%s6513_s9 + $0x10] sm:$0xff]  ;;  %v1956_v15 = vld [vmem:[%s6513_s9 + $0x18] sm:$0xff] }
 0x786   : > { %v1821_v18 = vsel %vm1044_vm7, %v5781_v16, 0.0  ;;  %v4886_v37 = vpack.c.bf16 %v5078_v32, %v5077_v33  ;;  %4897 = vmatpush3.bf16.msra.mxu0 %v4896_v12  ;;  %v2118_v12 = vld [vmem:[%s6517_s13 + $0x18] sm:$0xff] }
 0x787   : > { %1822 = vadd.xlane.f32.xlu0 %v1821_v18  ;;  %4880 = vmatpush3.bf16.msra.mxu1 %v4879_v17  ;;  %v4899_v17 = vpack.c.bf16 %v1956_v15, %v1955_v14 }
 0x788   : > { %4512 = vmatprep.subr.mxu1 %v5329_v53  ;;  %4898 = vmatprep.subr.bf16.mxu0 %v5327_v50 }
 0x789   : > { %v5785_v19 = vpop.eup %5156 }
 0x78a   : > { %v1824_v20 = vsel %vm1044_vm7, %v5785_v19, 0.0  ;;  %4900 = vmatpush3.bf16.msra.mxu0 %v4899_v17 }
 0x78b   : > { %1825 = vadd.xlane.f32.xlu1 %v1824_v20  ;;  %4513 = vmatpush3.msra.mxu1 %v1327_v22 }
 0x78c   : > { %4885 = vmatprep.subr.bf16.mxu1 %v5327_v50  ;;  %4907 = vmatprep.subr.bf16.mxu0 %v5327_v50 }
 0x78d   : > { %v5798_v26 = vpop.eup %5158 }
 0x78e   : > { %v1827_v27 = vsel %vm1044_vm7, %v5798_v26, 0.0 }
 0x79c   : > { %5080 = vrot.lane.b32.xlu1 %v5598_v21, %s6540_s26 }
 0x79d   : > { %1583 = vrot.lane.b32.xlu0 %v5600_v23, %s6542_s29  ;;  %s6593_s29 = smov 56  }
 0x7a0   : > { %1840 = vrot.lane.b32.xlu1 %v5600_v23, %s6540_s26  ;;  %s6556_s26 = smov 8  }
 0x7bc   : > { %1828 = vadd.xlane.f32.xlu0 %v1827_v27 }
 0x7fc   : > { %v1309_v30 = vpop.xlane.xlu0 %1308 }
 0x7fd   : > { %5160 = vrcp.f32 %v1309_v30 }
 0x800   : > { %v1312_v21 = vpop.xlane.xlu1 %1311 }
 0x801   : > { %5162 = vrcp.f32 %v1312_v21 }
 0x804   : > { %v1315_v31 = vpop.xlane.xlu0 %1314 }
 0x805   : > { %5164 = vrcp.f32 %v1315_v31 }
 0x807   : > { %v5161_v23 = vpop.eup %5160 }
 0x808   : > { %v1319_v34 = vmul.f32 %v5161_v23, %v5757_v49  ;;  %v1566_v36 = vpop.xlane.xlu1 %1565 }
 0x809   : > { %5166 = vrcp.f32 %v1566_v36 }
 0x80a   : > { %4515 = vmatmul.mubr.msk.f32.vlgmr.msra.gmra.mrb[12].mxu1 %vm1044_vm7, %v1319_v34 }
 0x80b   : > { %v5163_v38 = vpop.eup %5162  ;;  %4887 = vmatpush3.bf16.msra.mxu1 %v4886_v37  ;;  %4517 = vmatprep.mubr.msk.f32.mxu1 %vm5328_vm3, %v5329_v53 }
 0x80c   : > { %v1569_v39 = vpop.xlane.xlu0 %1568  ;;  %v1320_v40 = vmul.f32 %v5163_v38, %v5761_v56  ;;  %4542 = vmatprep.subr.mxu1 %v5329_v53 }
 0x80d   : > { %5168 = vrcp.f32 %v1569_v39 }
 0x80e   : > { %4518 = vmatmul.mubr.msk.f32.gmra.mrb[14].mxu1 %vm1044_vm7, %v1320_v40 }
 0x80f   : > { %v5165_v41 = vpop.eup %5164  ;;  %4520 = vmatprep.mubr.msk.f32.mxu1 %vm5328_vm3, %v5329_v53 }
 0x810   : > { %v1572_v42 = vpop.xlane.xlu0 %1571  ;;  %v1321_v43 = vmul.f32 %v5165_v41, %v5765_v61  ;;  %v4153_v41 = vld [vmem:[%s6514_s10] ss:$0 sm:$0xff] }
 0x811   : > { %5170 = vrcp.f32 %v1572_v42 }
 0x812   : > { %4521 = vmatmul.mubr.msk.f32.gmra.mrb[16].mxu1 %vm1044_vm7, %v1321_v43 }
 0x813   : > { %4544 = vmatprep.mubr.msk.f32.mxu1 %vm5328_vm3, %v5329_v53  ;;  %v5167_v45 = vpop.eup %5166 }
 0x814   : > { %v1823_v44 = vpop.xlane.xlu0 %1822  ;;  %v1576_v46 = vmul.f32 %v5167_v45, %v5769_v2  ;;  %v5260_v45 = vld [vmem:[#allocation2] sm:$0xff] }
 0x815   : > { %5172 = vrcp.f32 %v1823_v44 }
 0x817   : > { %v5169_v49 = vpop.eup %5168 }
 0x818   : > { %v1584_v47 = vpop.permute.xlu0 %1583  ;;  %v1826_v48 = vpop.xlane.xlu1 %1825  ;;  %v1577_v52 = vmul.f32 %v5169_v49, %v5773_v7 }
 0x819   : > { %4543 = vmatpush3.msra.mxu1 %v1584_v47  ;;  %5174 = vrcp.f32 %v1826_v48 }
 0x81a   : > { %4545 = vmatmul.mubr.msk.f32.vlgmr.msra.gmra.mrb[18].mxu1 %vm1044_vm7, %v1576_v46  ;;  %4892 = vmatprep.subr.bf16.mxu1 %v5327_v50 }
 0x81b   : > { %4547 = vmatprep.mubr.msk.f32.mxu1 %vm5328_vm3, %v5329_v53  ;;  %v5171_v54 = vpop.eup %5170 }
 0x81c   : > { %v5081_v51 = vpop.permute.xlu1 %5080  ;;  %v1578_v58 = vmul.f32 %v5171_v54, %v5777_v11 }
 0x81d   : > { %v5083_v55 = vunpack.i.h.bf16 %v5081_v51  ;;  %v5082_v56 = vunpack.i.l.bf16 %v5081_v51 }
 0x81e   : > { %4548 = vmatmul.mubr.msk.f32.gmra.mrb[20].mxu1 %vm1044_vm7, %v1577_v52  ;;  %v5261_v52 = vld [vmem:[#allocation2 + $0x8] sm:$0xff] }
 0x81f   : > { %v4893_v57 = vpack.c.bf16 %v5083_v55, %v5082_v56  ;;  %4550 = vmatprep.mubr.msk.f32.mxu1 %vm5328_vm3, %v5329_v53  ;;  %v5173_v59 = vpop.eup %5172 }
 0x820   : > { %v1833_v60 = vmul.f32 %v5173_v59, %v5781_v16  ;;  %v1841_v61 = vpop.permute.xlu1 %1840  ;;  %v5262_v59 = vld [vmem:[#allocation2 + $0x10] sm:$0xff] }
 0x821   : > { %4894 = vmatpush3.bf16.msra.mxu1 %v4893_v57 }
 0x822   : > { %4551 = vmatmul.mubr.msk.f32.gmra.mrb[22].mxu1 %vm1044_vm7, %v1578_v58  ;;  %4572 = vmatprep.subr.mxu1 %v5329_v53 }
 0x823   : > { %4574 = vmatprep.mubr.msk.f32.mxu1 %vm5328_vm3, %v5329_v53  ;;  %v5175_v62 = vpop.eup %5174 }
 0x824   : > { %v1834_v63 = vmul.f32 %v5175_v62, %v5785_v19 }
 0x825   : > { %4573 = vmatpush3.msra.mxu1 %v1841_v61 }
 0x826   : > { %4575 = vmatmul.mubr.msk.f32.vlgmr.msra.gmra.mrb[24].mxu1 %vm1044_vm7, %v1833_v60  ;;  %4901 = vmatprep.subr.bf16.mxu1 %v5327_v50 }
 0x827   : > { %4577 = vmatprep.mubr.msk.f32.mxu1 %vm5328_vm3, %v5329_v53 }
 0x82a   : > { %4578 = vmatmul.mubr.msk.f32.gmra.mrb[26].mxu1 %vm1044_vm7, %v1834_v63 }
 0x82b   : > { %4580 = vmatprep.mubr.msk.f32.mxu1 %vm5328_vm3, %v5329_v53 }
 0x849   : > { %v1829_v0 = vpop.xlane.xlu0 %1828 }
 0x84a   : > { %5176 = vrcp.f32 %v1829_v0 }
 0x854   : > { %v5177_v1 = vpop.eup %5176 }
 0x855   : > { %v1835_v2 = vmul.f32 %v5177_v1, %v5798_v26 }
 0x857   : > { %4581 = vmatmul.mubr.msk.f32.gmra.mrb[28].mxu1 %vm1044_vm7, %v1835_v2 }
 0x858   : > { %4608 = vmatprep.mubr.msk.f32.mxu1 %vm5328_vm3, %v5329_v53 }
 0x8dd   : > { %v1406_v3 = vpop.f32.mrb[12].mxu1 }
 0x8de   : > { %1423 = vrot.lane.b32.xlu0 %v1406_v3, %s6556_s26  ;;  %v4516_v4 = vpop.f32.mrb[13].mxu1 }
 0x8e1   : > { %v1411_v5 = vpop.f32.mrb[14].mxu1 }
 0x8e2   : > { %1425 = vrot.lane.b32.xlu1 %v1411_v5, %s6556_s26  ;;  %v4519_v6 = vpop.f32.mrb[15].mxu1  ;;  %s6592_s26 = smov 64  }
 0x8e5   : > { %v1416_v7 = vpop.f32.mrb[16].mxu1 }
 0x8e6   : > { %v4522_v8 = vpop.f32.mrb[17].mxu1 }
 0x8e7   : > { %v2115_v8 = vld [vmem:[%s6517_s13] sm:$0xff] }
 0x8e8   : > { %v4902_v10 = vpack.c.bf16 %v2116_v9, %v2115_v8 }
 0x8ea   : > { %4903 = vmatpush3.bf16.msra.mxu1 %v4902_v10 }
 0x8eb   : > { %4904 = vmatprep.subr.bf16.mxu1 %v5327_v50 }
 0x8ed   : > { %v1663_v11 = vpop.f32.mrb[18].mxu1 }
 0x8ee   : > { %1680 = vrot.lane.b32.xlu1 %v1663_v11, %s6560_s0  ;;  %v4546_v13 = vpop.f32.mrb[19].mxu1  ;;  %v2117_v11 = vld [vmem:[%s6517_s13 + $0x10] sm:$0xff] }
 0x8ef   : > { %v4905_v13 = vpack.c.bf16 %v2118_v12, %v2117_v11 }
 0x8f1   : > { %v1668_v16 = vpop.f32.mrb[20].mxu1  ;;  %4906 = vmatpush3.bf16.msra.mxu1 %v4905_v13 }
 0x8f2   : > { %1682 = vrot.lane.b32.xlu1 %v1668_v16, %s6560_s0  ;;  %v4549_v18 = vpop.f32.mrb[21].mxu1  ;;  %4919 = vmatprep.subr.bf16.mxu1 %v5327_v50 }
 0x8f5   : > { %v1673_v19 = vpop.f32.mrb[22].mxu1 }
 0x8f6   : > { %1684 = vrot.lane.b32.xlu0 %v1673_v19, %s6560_s0  ;;  %v4552_v20 = vpop.f32.mrb[23].mxu1  ;;  %s6590_s0 = smov 112  }
 0x8f9   : > { %v1920_v22 = vpop.f32.mrb[24].mxu1 }
 0x8fa   : > { %1937 = vrot.lane.b32.xlu1 %v1920_v22, %s6558_s1  ;;  %v4576_v24 = vpop.f32.mrb[25].mxu1 }
 0x8fd   : > { %v1925_v25 = vpop.f32.mrb[26].mxu1 }
 0x8fe   : > { %1939 = vrot.lane.b32.xlu1 %v1925_v25, %s6558_s1  ;;  %v4579_v26 = vpop.f32.mrb[27].mxu1 }
 0x902   : > { %1427 = vrot.lane.b32.xlu1 %v1416_v7, %s6586_s2 }
 0x92a   : > { %v1930_v27 = vpop.f32.mrb[28].mxu1 }
 0x92b   : > { %1941 = vrot.lane.b32.xlu1 %v1930_v27, %s6558_s1  ;;  %v4582_v29 = vpop.f32.mrb[29].mxu1  ;;  %s6591_s1 = smov 88  }
 0x92c   : > { %v4157_v29 = vld [vmem:[%s6515_s11] ss:$0 sm:$0xff] }
 0x950   : > { %v1424_v30 = vpop.permute.xlu0 %1423 }
 0x951   : > { %1433 = vst.msk [vmem:[#allocation3] sm:$0xff] %vm1432_vm8, %v1424_v30 }
 0x954   : > { %v1426_v21 = vpop.permute.xlu1 %1425 }
 0x955   : > { %1434 = vst.msk [vmem:[#allocation3 + $0x8] sm:$0xff] %vm1432_vm8, %v1426_v21  ;;  %v4158_v21 = vld [vmem:[%s6516_s12] ss:$0 sm:$0xff] }
 0x960   : > { %v1681_v31 = vpop.permute.xlu1 %1680 }
 0x961   : > { %1690 = vst.msk [vmem:[#allocation3] sm:$0xff] %vm1689_vm9, %v1681_v31 }
 0x964   : > { %v1683_v32 = vpop.permute.xlu1 %1682 }
 0x965   : > { %1691 = vst.msk [vmem:[#allocation3 + $0x8] sm:$0xff] %vm1689_vm9, %v1683_v32 }
 0x968   : > { %v1685_v37 = vpop.permute.xlu0 %1684 }
 0x96c   : > { %v1938_v33 = vpop.permute.xlu1 %1937 }
 0x96d   : > { %1947 = vst.msk [vmem:[#allocation3] sm:$0xff] %vm1946_vm10, %v1938_v33 }
 0x970   : > { %v1940_v23 = vpop.permute.xlu1 %1939 }
 0x971   : > { %1948 = vst.msk [vmem:[#allocation3 + $0x8] sm:$0xff] %vm1946_vm10, %v1940_v23 }
 0x974   : > { %v1428_v34 = vpop.permute.xlu1 %1427  ;;  %v1950_v36 = vld [vmem:[#allocation3] sm:$0xff] }
 0x975   : > { %1435 = vst.msk [vmem:[#allocation3 + $0x10] sm:$0xff] %vm1432_vm8, %v1428_v34  ;;  %4592 = vmatmul.mubr.msk.f32.vlgmr.msra.gmra.mrb[26].mxu0 %vm754_vm1, %v1950_v36 }
 0x976   : > { %1692 = vst.msk [vmem:[#allocation3 + $0x10] sm:$0xff] %vm1689_vm9, %v1685_v37  ;;  %4594 = vmatprep.mubr.msk.f32.mxu0 %vm5328_vm3, %v5329_v53 }
 0x978   : > { %v1951_v38 = vld [vmem:[#allocation3 + $0x8] sm:$0xff] }
 0x979   : > { %4595 = vmatmul.mubr.msk.f32.gmra.mrb[28].mxu0 %vm754_vm1, %v1951_v38 }
 0x97a   : > { %4597 = vmatprep.mubr.msk.f32.mxu0 %vm5328_vm3, %v5329_v53 }
 0x99d   : > { %v1942_v39 = vpop.permute.xlu1 %1941 }
 0x99e   : > { %1949 = vst.msk [vmem:[#allocation3 + $0x10] sm:$0xff] %vm1946_vm10, %v1942_v39 }
 0x9a5   : > { %v1952_v40 = vld [vmem:[#allocation3 + $0x10] sm:$0xff] }
 0x9a6   : > { %4598 = vmatmul.mubr.msk.f32.gmra.mrb[30].mxu0 %vm754_vm1, %v1952_v40 }
 0x9a7   : > { %4633 = vmatprep.mubr.msk.f32.mxu0 %vm5328_vm3, %v5329_v53 }
 0xa48   : > { %v2039_v42 = vpop.f32.mrb[26].mxu0 }
 0xa49   : > { %v2040_v43 = vadd.f32 %v4153_v41, %v2039_v42  ;;  %v4593_v44 = vpop.f32.mrb[27].mxu0 }
 0xa4a   : > { %v2242_v44 = vld [vmem:[%s6519_s15] sm:$0xff] }
 0xa4b   : > { %v5886_v46 = vadd.f32 %v5260_v45, %v2040_v43  ;;  %v2243_v45 = vld [vmem:[%s6519_s15 + $0x8] sm:$0xff] }
 0xa4c   : > { %v2044_v47 = vpop.f32.mrb[28].mxu0 }
 0xa4d   : > { %v2045_v48 = vadd.f32 %v4153_v41, %v2044_v47  ;;  %v4596_v49 = vpop.f32.mrb[29].mxu0  ;;  %v2058_v51 = vsel %vm754_vm1, %v5886_v46, 0.0  ;;  %v4908_v47 = vpack.c.bf16 %v2243_v45, %v2242_v44 }
 0xa4e   : > { %2059 = vadd.xlane.f32.xlu0 %v2058_v51  ;;  %v2245_v49 = vld [vmem:[%s6519_s15 + $0x18] sm:$0xff] }
 0xa4f   : > { %v5890_v54 = vadd.f32 %v5261_v52, %v2045_v48  ;;  %4909 = vmatpush3.bf16.msra.mxu0 %v4908_v47  ;;  %v2244_v48 = vld [vmem:[%s6519_s15 + $0x10] sm:$0xff]  ;;  %v2246_v52 = vld [vmem:[%s6519_s15 + $0x20] sm:$0xff] }
 0xa50   : > { %4910 = vmatprep.subr.bf16.mxu0 %v5327_v50  ;;  %v4911_v51 = vpack.c.bf16 %v2245_v49, %v2244_v48 }
 0xa51   : > { %v2061_v55 = vsel %vm754_vm1, %v5890_v54, 0.0 }
 0xa52   : > { %2062 = vadd.xlane.f32.xlu1 %v2061_v55  ;;  %v2247_v55 = vld [vmem:[%s6519_s15 + $0x28] sm:$0xff] }
 0xa53   : > { %4912 = vmatpush3.bf16.msra.mxu0 %v4911_v51 }
 0xa54   : > { %4913 = vmatprep.subr.bf16.mxu0 %v5327_v50 }
 0xa79   : > { %v2049_v56 = vpop.f32.mrb[30].mxu0 }
 0xa7a   : > { %v2050_v57 = vadd.f32 %v4153_v41, %v2049_v56  ;;  %v4599_v58 = vpop.f32.mrb[31].mxu0  ;;  %v4914_v56 = vpack.c.bf16 %v2247_v55, %v2246_v52 }
 0xa7b   : > { %v2249_v58 = vld [vmem:[%s6519_s15 + $0x38] sm:$0xff] }
 0xa7c   : > { %v5894_v60 = vadd.f32 %v5262_v59, %v2050_v57  ;;  %4915 = vmatpush3.bf16.msra.mxu0 %v4914_v56  ;;  %v2248_v57 = vld [vmem:[%s6519_s15 + $0x30] sm:$0xff] }
 0xa7d   : > { %4916 = vmatprep.subr.bf16.mxu0 %v5327_v50  ;;  %v4917_v59 = vpack.c.bf16 %v2249_v58, %v2248_v57 }
 0xa7e   : > { %v2064_v61 = vsel %vm754_vm1, %v5894_v60, 0.0 }
 0xa7f   : > { %2065 = vadd.xlane.f32.xlu0 %v2064_v61  ;;  %v4159_v61 = vld [vmem:[%s6518_s14] ss:$0 sm:$0xff] }
 0xa80   : > { %4918 = vmatpush3.bf16.msra.mxu0 %v4917_v59 }
 0xa81   : > { %4929 = vmatprep.subr.bf16.mxu0 %v5327_v50 }
 0xadb   : > { %v2060_v62 = vpop.xlane.xlu0 %2059 }
 0xadc   : > { %v2067_v63 = vmul.f32 0.03125, %v2060_v62 }
 0xade   : > { %v2070_v0 = vsub.f32 %v5886_v46, %v2067_v63 }
 0xadf   : > { %v2063_v1 = vpop.xlane.xlu1 %2062 }
 0xae0   : > { %v2068_v2 = vmul.f32 0.03125, %v2063_v1  ;;  %v2073_v3 = vmul.f32 %v2070_v0, %v2070_v0 }
 0xae2   : > { %v2071_v4 = vsub.f32 %v5890_v54, %v2068_v2  ;;  %v2076_v5 = vsel %vm754_vm1, %v2073_v3, 0.0 }
 0xae3   : > { %2077 = vadd.xlane.f32.xlu0 %v2076_v5 }
 0xae4   : > { %v2074_v6 = vmul.f32 %v2071_v4, %v2071_v4 }
 0xae6   : > { %v2079_v7 = vsel %vm754_vm1, %v2074_v6, 0.0 }
 0xae7   : > { %2080 = vadd.xlane.f32.xlu0 %v2079_v7 }
 0xb0c   : > { %v2066_v14 = vpop.xlane.xlu0 %2065 }
 0xb0d   : > { %v2069_v15 = vmul.f32 0.03125, %v2066_v14 }
 0xb0f   : > { %v2072_v16 = vsub.f32 %v5894_v60, %v2069_v15 }
 0xb11   : > { %v2075_v17 = vmul.f32 %v2072_v16, %v2072_v16 }
 0xb13   : > { %v2082_v18 = vsel %vm754_vm1, %v2075_v17, 0.0 }
 0xb14   : > { %2083 = vadd.xlane.f32.xlu1 %v2082_v18 }
 0xb70   : > { %v2078_v19 = vpop.xlane.xlu0 %2077 }
 0xb71   : > { %v2085_v20 = vmul.f32 0.03125, %v2078_v19 }
 0xb73   : > { %v2088_v22 = vadd.f32 1e-12, %v2085_v20 }
 0xb74   : > { %v2081_v24 = vpop.xlane.xlu0 %2080 }
 0xb75   : > { %5178 = vrsqrt.f32 %v2088_v22  ;;  %v2086_v25 = vmul.f32 0.03125, %v2081_v24 }
 0xb77   : > { %v2089_v26 = vadd.f32 1e-12, %v2086_v25 }
 0xb79   : > { %5180 = vrsqrt.f32 %v2089_v26 }
 0xb7f   : > { %v5179_v27 = vpop.eup %5178 }
 0xb80   : > { %v2094_v30 = vmul.f32 %v5179_v27, %v2070_v0 }
 0xb82   : > { %v2103_v31 = vmul.f32 %v4157_v29, %v2094_v30 }
 0xb83   : > { %v5181_v32 = vpop.eup %5180 }
 0xb84   : > { %v2112_v33 = vadd.f32 %v4158_v21, %v2103_v31  ;;  %v2095_v23 = vmul.f32 %v5181_v32, %v2071_v4 }
 0xb86   : > { %4609 = vmatmul.mubr.msk.f32.vlgmr.msra.gmra.mrb[30].mxu1 %vm754_vm1, %v2112_v33  ;;  %v2104_v34 = vmul.f32 %v4157_v29, %v2095_v23 }
 0xb87   : > { %4611 = vmatprep.mubr.msk.f32.mxu1 %vm5328_vm3, %v5329_v53 }
 0xb88   : > { %v2113_v36 = vadd.f32 %v4158_v21, %v2104_v34 }
 0xb8a   : > { %4612 = vmatmul.mubr.msk.f32.gmra.mrb[32].mxu1 %vm754_vm1, %v2113_v36  ;;  %v4163_v36 = vld [vmem:[%s6520_s16] ss:$0 sm:$0xff] }
 0xb8b   : > { %4614 = vmatprep.mubr.msk.f32.mxu1 %vm5328_vm3, %v5329_v53 }
 0xba1   : > { %v2084_v37 = vpop.xlane.xlu1 %2083 }
 0xba2   : > { %v2087_v38 = vmul.f32 0.03125, %v2084_v37 }
 0xba4   : > { %v2090_v39 = vadd.f32 1e-12, %v2087_v38 }
 0xba6   : > { %5182 = vrsqrt.f32 %v2090_v39 }
 0xbb0   : > { %v5183_v40 = vpop.eup %5182 }
 0xbb1   : > { %v2096_v41 = vmul.f32 %v5183_v40, %v2072_v16 }
 0xbb3   : > { %v2105_v42 = vmul.f32 %v4157_v29, %v2096_v41 }
 0xbb5   : > { %v2114_v43 = vadd.f32 %v4158_v21, %v2105_v42 }
 0xbb7   : > { %4615 = vmatmul.mubr.msk.f32.gmra.mrb[34].mxu1 %vm754_vm1, %v2114_v43 }
 0xbb8   : > { %4650 = vmatprep.mubr.msk.f32.mxu1 %vm5328_vm3, %v5329_v53 }
 0xc59   : > { %v2201_v62 = vpop.f32.mrb[30].mxu1 }
 0xc5a   : > { %v2202_v63 = vadd.f32 %v4159_v61, %v2201_v62  ;;  %v4610_v0 = vpop.f32.mrb[31].mxu1 }
 0xc5b   : > { %v4171_v0 = vld [vmem:[%s6511_s7 + $0x20] sm:$0xff] }
 0xc5c   : > { %v2215_v1 = vmul.f32 %v2202_v63, %v2202_v63 }
 0xc5d   : > { %v2206_v2 = vpop.f32.mrb[32].mxu1 }
 0xc5e   : > { %v2218_v3 = vmul.f32 %v2215_v1, %v2202_v63  ;;  %v2207_v4 = vadd.f32 %v4159_v61, %v2206_v2  ;;  %v4613_v5 = vpop.f32.mrb[33].mxu1  ;;  %v4172_v1 = vld [vmem:[%s6511_s7 + $0x28] sm:$0xff] }
 0xc5f   : > { %v4920_v2 = vpack.c.bf16 %v4172_v1, %v4171_v0 }
 0xc60   : > { %v2221_v6 = vmul.f32 0.044715, %v2218_v3  ;;  %v2216_v7 = vmul.f32 %v2207_v4, %v2207_v4  ;;  %v4173_v3 = vld [vmem:[%s6511_s7 + $0x30] sm:$0xff] }
 0xc61   : > { %4921 = vmatpush3.bf16.msra.mxu1 %v4920_v2 }
 0xc62   : > { %v2224_v8 = vadd.f32 %v2221_v6, %v2202_v63  ;;  %v2219_v9 = vmul.f32 %v2216_v7, %v2207_v4  ;;  %4922 = vmatprep.subr.bf16.mxu1 %v5327_v50 }
 0xc64   : > { %v2227_v10 = vmul.f32 0.7978846, %v2224_v8  ;;  %v2222_v11 = vmul.f32 0.044715, %v2219_v9 }
 0xc66   : > { %5184 = vtanh.f32 %v2227_v10  ;;  %v2225_v12 = vadd.f32 %v2222_v11, %v2207_v4 }
 0xc68   : > { %v2228_v13 = vmul.f32 0.7978846, %v2225_v12 }
 0xc6a   : > { %5186 = vtanh.f32 %v2228_v13 }
 0xc70   : > { %v5185_v14 = vpop.eup %5184 }
 0xc71   : > { %v2233_v15 = vadd.f32 1.0, %v5185_v14 }
 0xc73   : > { %v2236_v16 = vmul.f32 0.5, %v2233_v15 }
 0xc74   : > { %v5187_v17 = vpop.eup %5186 }
 0xc75   : > { %v2239_v18 = vmul.f32 %v2236_v16, %v2202_v63  ;;  %v2234_v19 = vadd.f32 1.0, %v5187_v17 }
 0xc77   : > { %4634 = vmatmul.mubr.msk.f32.vlgmr.msra.gmra.mrb[32].mxu0 %vm2257_vm11, %v2239_v18  ;;  %v2237_v20 = vmul.f32 0.5, %v2234_v19  ;;  %v4169_v18 = vld [vmem:[%s6582_s30 + $0x1] ss:$0 sm:$0xff] }
 0xc78   : > { %4636 = vmatprep.mubr.msk.f32.mxu0 %vm5328_vm3, %v5329_v53 }
 0xc79   : > { %v2240_v22 = vmul.f32 %v2237_v20, %v2207_v4  ;;  %v4174_v4 = vld [vmem:[%s6511_s7 + $0x38] sm:$0xff]  ;;  %v4170_v20 = vld [vmem:[%s6583_s6 + $0x1] ss:$0 sm:$0xff]  ;;  %s647_s6 = sand.u32 1, %s5317_s25  }
 0xc7a   : > { %v4923_v5 = vpack.c.bf16 %v4174_v4, %v4173_v3 }
 0xc7b   : > { %4637 = vmatmul.mubr.msk.f32.gmra.mrb[34].mxu0 %vm2257_vm11, %v2240_v22 }
 0xc7c   : > { %4639 = vmatprep.mubr.msk.f32.mxu0 %vm5328_vm3, %v5329_v53  ;;  %4924 = vmatpush3.bf16.msra.mxu1 %v4923_v5 }
 0xc7d   : > { %4925 = vmatprep.subr.bf16.mxu1 %v5327_v50 }
 0xc8a   : > { %v2211_v24 = vpop.f32.mrb[34].mxu1 }
 0xc8b   : > { %v2212_v25 = vadd.f32 %v4159_v61, %v2211_v24  ;;  %v4616_v26 = vpop.f32.mrb[35].mxu1 }
 0xc8d   : > { %v2217_v27 = vmul.f32 %v2212_v25, %v2212_v25 }
 0xc8f   : > { %v2220_v29 = vmul.f32 %v2217_v27, %v2212_v25 }
 0xc91   : > { %v2223_v30 = vmul.f32 0.044715, %v2220_v29 }
 0xc93   : > { %v2226_v21 = vadd.f32 %v2223_v30, %v2212_v25 }
 0xc95   : > { %v2229_v31 = vmul.f32 0.7978846, %v2226_v21 }
 0xc97   : > { %5188 = vtanh.f32 %v2229_v31 }
 0xca1   : > { %v5189_v32 = vpop.eup %5188 }
 0xca2   : > { %v2235_v33 = vadd.f32 1.0, %v5189_v32 }
 0xca4   : > { %v2238_v23 = vmul.f32 0.5, %v2235_v33 }
 0xca6   : > { %v2241_v34 = vmul.f32 %v2238_v23, %v2212_v25 }
 0xca8   : > { %4640 = vmatmul.mubr.msk.f32.gmra.mrb[36].mxu0 %vm2257_vm11, %v2241_v34 }
 0xca9   : > { %4680 = vmatprep.mubr.msk.f32.mxu0 %vm5328_vm3, %v5329_v53 }
 0xd4a   : > { %v2333_v37 = vpop.f32.mrb[32].mxu0 }
 0xd4b   : > { %v2334_v38 = vadd.f32 %v4163_v36, %v2333_v37  ;;  %v4635_v39 = vpop.f32.mrb[33].mxu0 }
 0xd4d   : > { %v5977_v40 = vadd.f32 %v2334_v38, %v5886_v46  ;;  %v4176_v38 = vld [vmem:[%s6512_s8 + $0x1] ss:$0 sm:$0xff] }
 0xd4e   : > { %v2338_v41 = vpop.f32.mrb[34].mxu0 }
 0xd4f   : > { %v2339_v42 = vadd.f32 %v4163_v36, %v2338_v41  ;;  %v4638_v43 = vpop.f32.mrb[35].mxu0  ;;  %v2354_v44 = vsel %vm754_vm1, %v5977_v40, 0.0 }
 0xd50   : > { %2355 = vadd.xlane.f32.xlu0 %v2354_v44 }
 0xd51   : > { %v5982_v45 = vadd.f32 %v2339_v42, %v5890_v54 }
 0xd53   : > { %v2357_v47 = vsel %vm754_vm1, %v5982_v45, 0.0 }
 0xd54   : > { %2358 = vadd.xlane.f32.xlu1 %v2357_v47 }
 0xd7b   : > { %v2343_v48 = vpop.f32.mrb[36].mxu0 }
 0xd7c   : > { %v2344_v49 = vadd.f32 %v4163_v36, %v2343_v48  ;;  %v4641_v51 = vpop.f32.mrb[37].mxu0 }
 0xd7e   : > { %v5987_v46 = vadd.f32 %v2344_v49, %v5894_v60 }
 0xd80   : > { %v2360_v52 = vsel %vm754_vm1, %v5987_v46, 0.0 }
 0xd81   : > { %2361 = vadd.xlane.f32.xlu0 %v2360_v52 }
 0xddd   : > { %v2356_v55 = vpop.xlane.xlu0 %2355 }
 0xdde   : > { %v2363_v56 = vmul.f32 0.03125, %v2356_v55 }
 0xde0   : > { %v2366_v57 = vsub.f32 %v5977_v40, %v2363_v56 }
 0xde1   : > { %v2359_v54 = vpop.xlane.xlu1 %2358 }
 0xde2   : > { %v2364_v58 = vmul.f32 0.03125, %v2359_v54  ;;  %v2369_v59 = vmul.f32 %v2366_v57, %v2366_v57 }
 0xde4   : > { %v2367_v61 = vsub.f32 %v5982_v45, %v2364_v58  ;;  %v2372_v62 = vsel %vm754_vm1, %v2369_v59, 0.0 }
 0xde5   : > { %2373 = vadd.xlane.f32.xlu1 %v2372_v62 }
 0xde6   : > { %v2370_v63 = vmul.f32 %v2367_v61, %v2367_v61 }
 0xde8   : > { %v2375_v60 = vsel %vm754_vm1, %v2370_v63, 0.0 }
 0xde9   : > { %2376 = vadd.xlane.f32.xlu0 %v2375_v60 }
 0xe0e   : > { %v2362_v6 = vpop.xlane.xlu0 %2361 }
 0xe0f   : > { %v2365_v7 = vmul.f32 0.03125, %v2362_v6 }
 0xe11   : > { %v2368_v8 = vsub.f32 %v5987_v46, %v2365_v7 }
 0xe13   : > { %v2371_v9 = vmul.f32 %v2368_v8, %v2368_v8 }
 0xe15   : > { %v2378_v10 = vsel %vm754_vm1, %v2371_v9, 0.0 }
 0xe16   : > { %2379 = vadd.xlane.f32.xlu1 %v2378_v10 }
 0xe72   : > { %v2374_v11 = vpop.xlane.xlu1 %2373 }
 0xe73   : > { %v2381_v12 = vmul.f32 0.03125, %v2374_v11 }
 0xe75   : > { %v2384_v13 = vadd.f32 1e-12, %v2381_v12 }
 0xe76   : > { %v2377_v14 = vpop.xlane.xlu0 %2376 }
 0xe77   : > { %5190 = vrsqrt.f32 %v2384_v13  ;;  %v2382_v15 = vmul.f32 0.03125, %v2377_v14 }
 0xe79   : > { %v2385_v16 = vadd.f32 1e-12, %v2382_v15 }
 0xe7b   : > { %5192 = vrsqrt.f32 %v2385_v16 }
 0xe81   : > { %v5191_v17 = vpop.eup %5190 }
 0xe82   : > { %v2390_v19 = vmul.f32 %v5191_v17, %v2366_v57 }
 0xe84   : > { %v2399_v22 = vmul.f32 %v4169_v18, %v2390_v19 }
 0xe85   : > { %v5193_v24 = vpop.eup %5192 }
 0xe86   : > { %v2408_v25 = vadd.f32 %v4170_v20, %v2399_v22  ;;  %v2391_v26 = vmul.f32 %v5193_v24, %v2367_v61 }
 0xe88   : > { %4651 = vmatmul.mubr.msk.f32.vlgmr.msra.gmra.mrb[36].mxu1 %vm754_vm1, %v2408_v25  ;;  %v2400_v27 = vmul.f32 %v4169_v18, %v2391_v26 }
 0xe89   : > { %4653 = vmatprep.mubr.msk.f32.mxu1 %vm5328_vm3, %v5329_v53 }
 0xe8a   : > { %v2409_v29 = vadd.f32 %v4170_v20, %v2400_v27 }
 0xe8c   : > { %4654 = vmatmul.mubr.msk.f32.gmra.mrb[38].mxu1 %vm754_vm1, %v2409_v29 }
 0xe8d   : > { %4656 = vmatprep.mubr.msk.f32.mxu1 %vm5328_vm3, %v5329_v53 }
 0xea3   : > { %v2380_v30 = vpop.xlane.xlu1 %2379 }
 0xea4   : > { %v2383_v21 = vmul.f32 0.03125, %v2380_v30 }
 0xea6   : > { %v2386_v31 = vadd.f32 1e-12, %v2383_v21 }
 0xea8   : > { %5194 = vrsqrt.f32 %v2386_v31 }
 0xeb2   : > { %v5195_v32 = vpop.eup %5194 }
 0xeb3   : > { %v2392_v33 = vmul.f32 %v5195_v32, %v2368_v8 }
 0xeb5   : > { %v2401_v23 = vmul.f32 %v4169_v18, %v2392_v33 }
 0xeb7   : > { %v2410_v34 = vadd.f32 %v4170_v20, %v2401_v23 }
 0xeb9   : > { %4657 = vmatmul.mubr.msk.f32.gmra.mrb[40].mxu1 %vm754_vm1, %v2410_v34 }
 0xeba   : > { %4665 = vmatprep.mubr.msk.f32.mxu1 %vm5328_vm3, %v5329_v53 }
 0xf5b   : > { %v2499_v36 = vpop.f32.mrb[36].mxu1 }
 0xf5c   : > { %v4652_v37 = vpop.f32.mrb[37].mxu1  ;;  %v6029_v41 = vadd.f32 %v4176_v38, %v2499_v36 }
 0xf5f   : > { %v2504_v39 = vpop.f32.mrb[38].mxu1 }
 0xf60   : > { %v6031_v42 = vadd.f32 %v4176_v38, %v2504_v39  ;;  %v4655_v43 = vpop.f32.mrb[39].mxu1 }
 0xf62   : > { %v6035_v44 = vpack.i.bf16 %v6031_v42, %v6029_v41 }
 0xf64   : > { %5085 = vrot.lane.b32.xlu0 %v6035_v44, %s6587_s28 }
 0xf68   : > { %5095 = vrot.lane.b32.xlu0 %v6035_v44, %s6588_s4 }
 0xf6c   : > { %2756 = vrot.lane.b32.xlu0 %v6031_v42, %s6589_s23 }
 0xf8c   : > { %v2509_v47 = vpop.f32.mrb[40].mxu1 }
 0xf8d   : > { %v6043_v48 = vadd.f32 %v4176_v38, %v2509_v47  ;;  %v4658_v49 = vpop.f32.mrb[41].mxu1 }
 0xf8f   : > { %3020 = vrot.lane.b32.xlu0 %v6043_v48, %s6588_s4  ;;  %2520 = vrot.lane.b32.xlu1 %v6043_v48, %s6587_s28  ;;  %s6595_s28 = smov 72   ;;  %s6596_s4 = smov 104  }
 0xf93   : > { %3012 = vrot.lane.b32.xlu0 %v6031_v42, %s6590_s0  ;;  %5090 = vrot.lane.b32.xlu1 %v6035_v44, %s6591_s1 }
 0xf97   : > { %5100 = vrot.lane.b32.xlu0 %v6035_v44, %s6592_s26  ;;  %2764 = vrot.lane.b32.xlu1 %v6043_v48, %s6591_s1  ;;  %s6599_s1 = smov 24  }
 0xf9b   : > { %2754 = vrot.lane.b32.xlu1 %v6029_v41, %s6589_s23 }
 0xf9f   : > { %2758 = vrot.lane.b32.xlu1 %v6043_v48, %s6589_s23  ;;  %s6597_s23 = smov 40  }
 0xfa3   : > { %3010 = vrot.lane.b32.xlu1 %v6029_v41, %s6590_s0 }
 0xfa7   : > { %3014 = vrot.lane.b32.xlu1 %v6043_v48, %s6590_s0  ;;  %s6598_s0 = smov 16  }
 0xfab   : > { %2657 = vrot.lane.b32.xlu1 %v6043_v48, %s6592_s26  ;;  %s4254_s26 = sshll.u32 %s5477_s3, 4  ;;  %s5345_s3 = smov [#allocation4]  }
 0xfd6   : > { %v5086_v51 = vpop.permute.xlu0 %5085 }
 0xfd7   : > { %v5088_v52 = vunpack.i.h.bf16 %v5086_v51  ;;  %v5087_v55 = vunpack.i.l.bf16 %v5086_v51 }
 0xfd9   : > { %v4926_v56 = vpack.c.bf16 %v5088_v52, %v5087_v55 }
 0xfda   : > { %v5096_v57 = vpop.permute.xlu0 %5095 }
 0xfdb   : > { %4928 = vmatpush3.bf16.xpose.msk.msra.mxu1 %vm5608_vm5, %v4926_v56  ;;  %v5098_v7 = vunpack.i.h.bf16 %v5096_v57  ;;  %v5097_v8 = vunpack.i.l.bf16 %v5096_v57 }
 0xfdc   : > { %4663 = vmatprep.subr.mxu1 %v5329_v53 }
 0xfdd   : > { %v4940_v10 = vpack.c.bf16 %v5098_v7, %v5097_v8 }
 0xfde   : > { %v2757_v54 = vpop.permute.xlu0 %2756 }
0x1001   : > { %v3021_v58 = vpop.permute.xlu0 %3020  ;;  %v2521_v59 = vpop.permute.xlu1 %2520 }
0x1002   : > { %4664 = vmatpush3.xpose.msk.msra.mxu1 %vm945_vm4, %v2521_v59 }
0x1003   : > { %4932 = vmatprep.subr.bf16.mxu1 %v5327_v50 }
0x1005   : > { %v3013_v61 = vpop.permute.xlu0 %3012  ;;  %4666 = vmatmul.mubr.msk.f32.vlgmr.msra.gmra.mrb[42].mxu1 %vm945_vm4, %v6029_v41  ;;  %v5091_v62 = vpop.permute.xlu1 %5090 }
0x1006   : > { %v5093_v63 = vunpack.i.h.bf16 %v5091_v62  ;;  %v5092_v60 = vunpack.i.l.bf16 %v5091_v62  ;;  %4668 = vmatprep.mubr.msk.f32.mxu1 %vm5328_vm3, %v5329_v53 }
0x1008   : > { %v4933_v0 = vpack.c.bf16 %v5093_v63, %v5092_v60 }
0x1009   : > { %v5101_v1 = vpop.permute.xlu0 %5100  ;;  %4669 = vmatmul.mubr.msk.f32.gmra.mrb[44].mxu1 %vm945_vm4, %v6031_v42  ;;  %v2765_v2 = vpop.permute.xlu1 %2764 }
0x100a   : > { %v5103_v3 = vunpack.i.h.bf16 %v5101_v1  ;;  %v5102_v4 = vunpack.i.l.bf16 %v5101_v1  ;;  %4935 = vmatpush3.bf16.xpose.msk.msra.mxu1 %vm5608_vm5, %v4933_v0  ;;  %4671 = vmatprep.mubr.msk.f32.mxu1 %vm5328_vm3, %v5329_v53 }
0x100b   : > { %4693 = vmatprep.subr.mxu1 %v5329_v53 }
0x100c   : > { %v4930_v5 = vpack.c.bf16 %v5103_v3, %v5102_v4 }
0x100d   : > { %4672 = vmatmul.mubr.msk.f32.gmra.mrb[46].mxu1 %vm945_vm4, %v6043_v48  ;;  %v2755_v6 = vpop.permute.xlu1 %2754 }
0x100e   : > { %4931 = vmatpush3.bf16.msra.mxu0 %v4930_v5  ;;  %4695 = vmatprep.mubr.msk.f32.mxu1 %vm5328_vm3, %v5329_v53 }
0x100f   : > { %4678 = vmatprep.subr.mxu0 %v5329_v53 }
0x1011   : > { %v2759_v9 = vpop.permute.xlu1 %2758 }
0x1012   : > { %4694 = vmatpush3.xpose.msk.msra.mxu1 %vm945_vm4, %v2765_v2 }
0x1013   : > { %4939 = vmatprep.subr.bf16.mxu1 %v5327_v50 }
0x1015   : > { %v3011_v11 = vpop.permute.xlu1 %3010  ;;  %4696 = vmatmul.mubr.msk.f32.vlgmr.msra.gmra.mrb[48].mxu1 %vm945_vm4, %v2755_v6 }
0x1016   : > { %4942 = vmatpush3.bf16.xpose.msk.msra.mxu1 %vm5608_vm5, %v4940_v10  ;;  %4698 = vmatprep.mubr.msk.f32.mxu1 %vm5328_vm3, %v5329_v53 }
0x1017   : > { %4723 = vmatprep.subr.mxu1 %v5329_v53 }
0x1019   : > { %v3015_v12 = vpop.permute.xlu1 %3014  ;;  %4699 = vmatmul.mubr.msk.f32.gmra.mrb[50].mxu1 %vm945_vm4, %v2757_v54 }
0x101a   : > { %4701 = vmatprep.mubr.msk.f32.mxu1 %vm5328_vm3, %v5329_v53 }
0x101d   : > { %v2658_v13 = vpop.permute.xlu1 %2657  ;;  %4702 = vmatmul.mubr.msk.f32.gmra.mrb[52].mxu1 %vm945_vm4, %v2759_v9 }
0x101e   : > { %4679 = vmatpush3.msra.mxu0 %v2658_v13  ;;  %4724 = vmatpush3.xpose.msk.msra.mxu1 %vm945_vm4, %v3021_v58 }
0x101f   : > { %4725 = vmatprep.mubr.msk.f32.mxu1 %vm5328_vm3, %v5329_v53  ;;  %4936 = vmatprep.subr.bf16.mxu0 %v5327_v50 }
0x1020   : > { %4983 = vmatprep.subr.bf16.mxu1 %v5327_v50 }
0x1021   : > { %4726 = vmatmul.mubr.msk.f32.vlgmr.msra.gmra.mrb[54].mxu1 %vm945_vm4, %v3011_v11 }
0x1022   : > { %4728 = vmatprep.mubr.msk.f32.mxu1 %vm5328_vm3, %v5329_v53 }
0x1025   : > { %4729 = vmatmul.mubr.msk.f32.gmra.mrb[56].mxu1 %vm945_vm4, %v3013_v61 }
0x1026   : > { %4731 = vmatprep.mubr.msk.f32.mxu1 %vm5328_vm3, %v5329_v53 }
0x1029   : > { %4732 = vmatmul.mubr.msk.f32.gmra.mrb[58].mxu1 %vm945_vm4, %v3015_v12 }
0x102a   : > { %4758 = vmatprep.mubr.msk.f32.mxu1 %vm5328_vm3, %v5329_v53 }
0x10d8   : > { %v2600_v14 = vpop.f32.mrb[42].mxu1 }
0x10d9   : > { %v2614_v15 = vmul.f32 0.35355338, %v2600_v14  ;;  %v4667_v16 = vpop.f32.mrb[43].mxu1 }
0x10db   : > { %v2617_v17 = vadd.f32 %v2614_v15, %v5629_v35 }
0x10dc   : > { %v2605_v18 = vpop.f32.mrb[44].mxu1 }
0x10dd   : > { %v2615_v19 = vmul.f32 0.35355338, %v2605_v18  ;;  %v4670_v20 = vpop.f32.mrb[45].mxu1  ;;  %v2620_v22 = vsel %vm1044_vm7, %v2617_v17, -inf }
0x10de   : > { %2621 = vmax.xlane.f32.xlu0 %v2620_v22 }
0x10df   : > { %v2618_v24 = vadd.f32 %v2615_v19, %v5629_v35 }
0x10e0   : > { %v2610_v25 = vpop.f32.mrb[46].mxu1 }
0x10e1   : > { %v2616_v26 = vmul.f32 0.35355338, %v2610_v25  ;;  %v4673_v27 = vpop.f32.mrb[47].mxu1  ;;  %v2623_v29 = vsel %vm1044_vm7, %v2618_v24, -inf }
0x10e2   : > { %2624 = vmax.xlane.f32.xlu1 %v2623_v29 }
0x10e3   : > { %v6119_v30 = vadd.f32 %v2616_v26, %v5629_v35 }
0x10e5   : > { %v2626_v21 = vsel %vm1044_vm7, %v6119_v30, -inf }
0x10e6   : > { %2627 = vmax.xlane.f32.xlu0 %v2626_v21 }
0x10e8   : > { %v2844_v31 = vpop.f32.mrb[48].mxu1 }
0x10e9   : > { %v2858_v32 = vmul.f32 0.35355338, %v2844_v31  ;;  %v4697_v33 = vpop.f32.mrb[49].mxu1 }
0x10eb   : > { %v2861_v23 = vadd.f32 %v2858_v32, %v5629_v35 }
0x10ec   : > { %v2849_v34 = vpop.f32.mrb[50].mxu1 }
0x10ed   : > { %v2859_v36 = vmul.f32 0.35355338, %v2849_v34  ;;  %v4700_v37 = vpop.f32.mrb[51].mxu1  ;;  %v2864_v38 = vsel %vm1044_vm7, %v2861_v23, -inf }
0x10ee   : > { %2865 = vmax.xlane.f32.xlu0 %v2864_v38 }
0x10ef   : > { %v2862_v39 = vadd.f32 %v2859_v36, %v5629_v35 }
0x10f0   : > { %v2854_v43 = vpop.f32.mrb[52].mxu1 }
0x10f1   : > { %v2860_v47 = vmul.f32 0.35355338, %v2854_v43  ;;  %v4703_v49 = vpop.f32.mrb[53].mxu1  ;;  %v2867_v51 = vsel %vm1044_vm7, %v2862_v39, -inf }
0x10f2   : > { %2868 = vmax.xlane.f32.xlu0 %v2867_v51 }
0x10f3   : > { %v2863_v52 = vadd.f32 %v2860_v47, %v5629_v35 }
0x10f4   : > { %v3100_v55 = vpop.f32.mrb[54].mxu1 }
0x10f5   : > { %v3114_v56 = vmul.f32 0.35355338, %v3100_v55  ;;  %v4727_v57 = vpop.f32.mrb[55].mxu1  ;;  %v2870_v54 = vsel %vm1044_vm7, %v2863_v52, -inf }
0x10f6   : > { %2871 = vmax.xlane.f32.xlu1 %v2870_v54 }
0x10f7   : > { %v3117_v58 = vadd.f32 %v3114_v56, %v5629_v35 }
0x10f8   : > { %v3105_v59 = vpop.f32.mrb[56].mxu1 }
0x10f9   : > { %v3115_v61 = vmul.f32 0.35355338, %v3105_v59  ;;  %v4730_v62 = vpop.f32.mrb[57].mxu1  ;;  %v3120_v63 = vsel %vm1044_vm7, %v3117_v58, -inf }
0x10fa   : > { %3121 = vmax.xlane.f32.xlu0 %v3120_v63 }
0x10fb   : > { %v3118_v60 = vadd.f32 %v3115_v61, %v5629_v35 }
0x10fc   : > { %v3110_v0 = vpop.f32.mrb[58].mxu1 }
0x10fd   : > { %v3116_v1 = vmul.f32 0.35355338, %v3110_v0  ;;  %v4733_v2 = vpop.f32.mrb[59].mxu1  ;;  %v3123_v3 = vsel %vm1044_vm7, %v3118_v60, -inf }
0x10fe   : > { %3124 = vmax.xlane.f32.xlu1 %v3123_v3 }
0x10ff   : > { %v3119_v4 = vadd.f32 %v3116_v1, %v5629_v35 }
0x1101   : > { %v3126_v5 = vsel %vm1044_vm7, %v3119_v4, -inf }
0x1102   : > { %3127 = vmax.xlane.f32.xlu0 %v3126_v5 }
0x110f   : > { %5105 = vrot.lane.b32.xlu1 %v6035_v44, %s6593_s29 }
0x1118   : > { %2901 = vrot.lane.b32.xlu0 %v6043_v48, %s6593_s29 }
0x116b   : > { %v2622_v6 = vpop.xlane.xlu0 %2621 }
0x116c   : > { %v2629_v7 = vsub.f32 %v2617_v17, %v2622_v6 }
0x116e   : > { %v2632_v8 = vmul.f32 1.442695, %v2629_v7 }
0x116f   : > { %v2625_v9 = vpop.xlane.xlu1 %2624 }
0x1170   : > { %5196 = vpow2.f32 %v2632_v8  ;;  %v2630_v10 = vsub.f32 %v2618_v24, %v2625_v9 }
0x1172   : > { %v2634_v11 = vmul.f32 1.442695, %v2630_v10 }
0x1173   : > { %v2628_v12 = vpop.xlane.xlu0 %2627 }
0x1174   : > { %5198 = vpow2.f32 %v2634_v11  ;;  %v2631_v24 = vsub.f32 %v6119_v30, %v2628_v12 }
0x1176   : > { %v2636_v26 = vmul.f32 1.442695, %v2631_v24 }
0x117a   : > { %v6139_v13 = vpop.eup %5196 }
0x117b   : > { %v2866_v14 = vpop.xlane.xlu0 %2865  ;;  %v2638_v15 = vsel %vm1044_vm7, %v6139_v13, 0.0 }
0x117c   : > { %v2873_v16 = vsub.f32 %v2861_v23, %v2866_v14  ;;  %2639 = vadd.xlane.f32.xlu1 %v2638_v15 }
0x117e   : > { %v6143_v18 = vpop.eup %5198  ;;  %v2876_v19 = vmul.f32 1.442695, %v2873_v16 }
0x117f   : > { %v2641_v17 = vsel %vm1044_vm7, %v6143_v18, 0.0  ;;  %v2869_v25 = vpop.xlane.xlu0 %2868 }
0x1180   : > { %5200 = vpow2.f32 %v2876_v19  ;;  %2642 = vadd.xlane.f32.xlu0 %v2641_v17  ;;  %v2874_v27 = vsub.f32 %v2862_v39, %v2869_v25 }
0x1181   : > { %5202 = vpow2.f32 %v2636_v26 }
0x1182   : > { %v2878_v21 = vmul.f32 1.442695, %v2874_v27 }
0x1183   : > { %v2872_v29 = vpop.xlane.xlu1 %2871 }
0x1184   : > { %v2875_v31 = vsub.f32 %v2863_v52, %v2872_v29  ;;  %5204 = vpow2.f32 %v2878_v21 }
0x1186   : > { %v2880_v33 = vmul.f32 1.442695, %v2875_v31 }
0x1187   : > { %v3122_v32 = vpop.xlane.xlu0 %3121 }
0x1188   : > { %v3129_v23 = vsub.f32 %v3117_v58, %v3122_v32  ;;  %5206 = vpow2.f32 %v2880_v33 }
0x118a   : > { %v6147_v20 = vpop.eup %5200  ;;  %v3132_v38 = vmul.f32 1.442695, %v3129_v23 }
0x118b   : > { %v2882_v22 = vsel %vm1044_vm7, %v6147_v20, 0.0  ;;  %v3125_v34 = vpop.xlane.xlu1 %3124  ;;  %v5203_v43 = vpop.eup %5202 }
0x118c   : > { %2883 = vadd.xlane.f32.xlu0 %v2882_v22  ;;  %v3130_v37 = vsub.f32 %v3118_v60, %v3125_v34  ;;  %5208 = vpow2.f32 %v3132_v38  ;;  %v2644_v49 = vsel %vm1044_vm7, %v5203_v43, 0.0 }
0x118d   : > { %5110 = vrot.lane.b32.xlu1 %v6035_v44, %s6594_s22 }
0x118e   : > { %v3134_v47 = vmul.f32 1.442695, %v3130_v37  ;;  %v6157_v51 = vpop.eup %5204 }
0x118f   : > { %v3128_v36 = vpop.xlane.xlu0 %3127  ;;  %v2885_v52 = vsel %vm1044_vm7, %v6157_v51, 0.0  ;;  %v5106_v63 = vpop.permute.xlu1 %5105 }
0x1190   : > { %v3131_v30 = vsub.f32 %v3119_v4, %v3128_v36  ;;  %5210 = vpow2.f32 %v3134_v47  ;;  %v5108_v2 = vunpack.i.h.bf16 %v5106_v63  ;;  %v5107_v3 = vunpack.i.l.bf16 %v5106_v63 }
0x1192   : > { %v3136_v39 = vmul.f32 1.442695, %v3131_v30  ;;  %v6161_v55 = vpop.eup %5206  ;;  %v4937_v6 = vpack.c.bf16 %v5108_v2, %v5107_v3 }
0x1193   : > { %v2888_v56 = vsel %vm1044_vm7, %v6161_v55, 0.0  ;;  %v2902_v60 = vpop.permute.xlu0 %2901 }
0x1194   : > { %5212 = vpow2.f32 %v3136_v39 }
0x1196   : > { %v6165_v57 = vpop.eup %5208 }
0x1197   : > { %v3138_v58 = vsel %vm1044_vm7, %v6165_v57, 0.0 }
0x119a   : > { %v6167_v54 = vpop.eup %5210 }
0x119b   : > { %v3141_v61 = vsel %vm1044_vm7, %v6167_v54, 0.0 }
0x119e   : > { %v6171_v59 = vpop.eup %5212 }
0x119f   : > { %v3144_v62 = vsel %vm1044_vm7, %v6171_v59, 0.0 }
0x11a2   : > { %3157 = vrot.lane.b32.xlu0 %v6043_v48, %s6594_s22  ;;  %s6461_s22 = scalar_lea.hbm %s6525_s21, %s4254_s26 }
0x11b1   : > { %2645 = vadd.xlane.f32.xlu1 %v2644_v49 }
0x11b5   : > { %2886 = vadd.xlane.f32.xlu1 %v2885_v52 }
0x11b9   : > { %2889 = vadd.xlane.f32.xlu1 %v2888_v56 }
0x11bd   : > { %3139 = vadd.xlane.f32.xlu1 %v3138_v58 }
0x11c1   : > { %3142 = vadd.xlane.f32.xlu0 %v3141_v61  ;;  %3145 = vadd.xlane.f32.xlu1 %v3144_v62 }
0x11d2   : > { %3276 = vrot.lane.b32.xlu1 %v6043_v48, %s6595_s28 }
0x11d7   : > { %5115 = vrot.lane.b32.xlu0 %v6035_v44, %s6595_s28  ;;  %s4035_s28 = scalar_lea.sflag [#allocation5], %s647_s6 }
0x11db   : > { %3266 = vrot.lane.b32.xlu0 %v6029_v41, %s6596_s4 }
0x1209   : > { %v2640_v0 = vpop.xlane.xlu1 %2639 }
0x120a   : > { %5214 = vrcp.f32 %v2640_v0 }
0x120d   : > { %v2643_v1 = vpop.xlane.xlu0 %2642  ;;  %v5111_v8 = vpop.permute.xlu1 %5110 }
0x120e   : > { %5216 = vrcp.f32 %v2643_v1  ;;  %v5113_v19 = vunpack.i.h.bf16 %v5111_v8  ;;  %v5112_v17 = vunpack.i.l.bf16 %v5111_v8 }
0x1210   : > { %v4944_v26 = vpack.c.bf16 %v5113_v19, %v5112_v17 }
0x1214   : > { %v5215_v4 = vpop.eup %5214 }
0x1215   : > { %v2650_v5 = vmul.f32 %v5215_v4, %v6139_v13 }
0x1217   : > { %4681 = vmatmul.mubr.msk.f32.vlgmr.msra.gmra.mrb[38].mxu0 %vm1044_vm7, %v2650_v5 }
0x1218   : > { %v5217_v7 = vpop.eup %5216  ;;  %4938 = vmatpush3.bf16.msra.mxu0 %v4937_v6  ;;  %4683 = vmatprep.mubr.msk.f32.mxu0 %vm5328_vm3, %v5329_v53 }
0x1219   : > { %4708 = vmatprep.subr.mxu0 %v5329_v53  ;;  %v2651_v41 = vmul.f32 %v5217_v7, %v6143_v18  ;;  %v2884_v9 = vpop.xlane.xlu0 %2883 }
0x121b   : > { %4684 = vmatmul.mubr.msk.f32.gmra.mrb[40].mxu0 %vm1044_vm7, %v2651_v41 }
0x121c   : > { %4709 = vmatpush3.msra.mxu0 %v2902_v60  ;;  %4686 = vmatprep.mubr.msk.f32.mxu0 %vm5328_vm3, %v5329_v53 }
0x121d   : > { %4943 = vmatprep.subr.bf16.mxu0 %v5327_v50  ;;  %v3158_v14 = vpop.permute.xlu0 %3157 }
0x123e   : > { %v2646_v10 = vpop.xlane.xlu1 %2645 }
0x123f   : > { %5218 = vrcp.f32 %v2646_v10 }
0x1240   : > { %5220 = vrcp.f32 %v2884_v9 }
0x1242   : > { %v2887_v11 = vpop.xlane.xlu1 %2886 }
0x1243   : > { %5222 = vrcp.f32 %v2887_v11 }
0x1246   : > { %v2890_v12 = vpop.xlane.xlu1 %2889 }
0x1247   : > { %5224 = vrcp.f32 %v2890_v12 }
0x1249   : > { %v5219_v13 = vpop.eup %5218 }
0x124a   : > { %v3140_v15 = vpop.xlane.xlu1 %3139  ;;  %v2652_v16 = vmul.f32 %v5219_v13, %v5203_v43  ;;  %v5221_v18 = vpop.eup %5220 }
0x124b   : > { %5226 = vrcp.f32 %v3140_v15  ;;  %v2894_v22 = vmul.f32 %v5221_v18, %v6147_v20 }
0x124c   : > { %4687 = vmatmul.mubr.msk.f32.gmra.mrb[42].mxu0 %vm1044_vm7, %v2652_v16 }
0x124d   : > { %4710 = vmatprep.mubr.msk.f32.mxu0 %vm5328_vm3, %v5329_v53  ;;  %v5223_v25 = vpop.eup %5222 }
0x124e   : > { %v3143_v24 = vpop.xlane.xlu0 %3142  ;;  %v3146_v27 = vpop.xlane.xlu1 %3145  ;;  %v2895_v21 = vmul.f32 %v5223_v25, %v6157_v51 }
0x124f   : > { %5228 = vrcp.f32 %v3143_v24 }
0x1250   : > { %4711 = vmatmul.mubr.msk.f32.vlgmr.msra.gmra.mrb[44].mxu0 %vm1044_vm7, %v2894_v22  ;;  %5230 = vrcp.f32 %v3146_v27 }
0x1251   : > { %4945 = vmatpush3.bf16.msra.mxu0 %v4944_v26  ;;  %4713 = vmatprep.mubr.msk.f32.mxu0 %vm5328_vm3, %v5329_v53  ;;  %v5225_v31 = vpop.eup %5224 }
0x1252   : > { %v5116_v29 = vpop.permute.xlu0 %5115  ;;  %4738 = vmatprep.subr.mxu0 %v5329_v53  ;;  %v2896_v23 = vmul.f32 %v5225_v31, %v6161_v55  ;;  %v3277_v38 = vpop.permute.xlu1 %3276 }
0x1253   : > { %v5118_v32 = vunpack.i.h.bf16 %v5116_v29  ;;  %v5117_v33 = vunpack.i.l.bf16 %v5116_v29 }
0x1254   : > { %4714 = vmatmul.mubr.msk.f32.gmra.mrb[46].mxu0 %vm1044_vm7, %v2895_v21 }
0x1255   : > { %v4947_v20 = vpack.c.bf16 %v5118_v32, %v5117_v33  ;;  %4739 = vmatpush3.msra.mxu0 %v3158_v14  ;;  %4716 = vmatprep.mubr.msk.f32.mxu0 %vm5328_vm3, %v5329_v53  ;;  %v5227_v34 = vpop.eup %5226 }
0x1256   : > { %4946 = vmatprep.subr.bf16.mxu0 %v5327_v50  ;;  %v3150_v36 = vmul.f32 %v5227_v34, %v6165_v57  ;;  %v3267_v47 = vpop.permute.xlu0 %3266 }
0x1257   : > { %4985 = vmatpush3.bf16.xpose.msk.msra.mxu1 %vm5608_vm5, %v4947_v20 }
0x1258   : > { %4717 = vmatmul.mubr.msk.f32.gmra.mrb[48].mxu0 %vm1044_vm7, %v2896_v23  ;;  %4984 = vmatprep.subr.mxu1 %v5329_v53  ;;  %v4217_v23 = vld [vmem:[%s6513_s9 + $0x28] sm:$0xff] }
0x1259   : > { %4740 = vmatprep.mubr.msk.f32.mxu0 %vm5328_vm3, %v5329_v53  ;;  %v5229_v37 = vpop.eup %5228 }
0x125a   : > { %v3151_v30 = vmul.f32 %v5229_v37, %v6167_v54  ;;  %v5231_v43 = vpop.eup %5230  ;;  %v4219_v37 = vld [vmem:[%s6513_s9 + $0x38] sm:$0xff] }
0x125b   : > { %v3152_v28 = vmul.f32 %v5231_v43, %v6171_v59 }
0x125c   : > { %4741 = vmatmul.mubr.msk.f32.vlgmr.msra.gmra.mrb[50].mxu0 %vm1044_vm7, %v3150_v36  ;;  %v4218_v36 = vld [vmem:[%s6513_s9 + $0x30] sm:$0xff] }
0x125d   : > { %4949 = vmatpush3.bf16.xpose.msk.msra.mxu0 %vm5608_vm5, %v4947_v20  ;;  %4743 = vmatprep.mubr.msk.f32.mxu0 %vm5328_vm3, %v5329_v53  ;;  %v4216_v20 = vld [vmem:[%s6513_s9 + $0x20] sm:$0xff] }
0x125e   : > { %4753 = vmatprep.subr.mxu0 %v5329_v53  ;;  %v4954_v34 = vpack.c.bf16 %v4217_v23, %v4216_v20  ;;  %v6356_v23 = vld [vmem:[%s6516_s12 + $0x1] ss:$0 sm:$0xff] }
0x125f   : > { %4986 = vmatpush3.xpose.msk.msra.mxu1 %vm945_vm4, %v3277_v38 }
0x1260   : > { %4744 = vmatmul.mubr.msk.f32.gmra.mrb[52].mxu0 %vm1044_vm7, %v3151_v30  ;;  %4953 = vmatprep.subr.bf16.mxu1 %v5327_v50 }
0x1261   : > { %4746 = vmatprep.mubr.msk.f32.mxu0 %vm5328_vm3, %v5329_v53 }
0x1264   : > { %4747 = vmatmul.mubr.msk.f32.gmra.mrb[54].mxu0 %vm1044_vm7, %v3152_v28 }
0x1265   : > { %4754 = vmatpush3.xpose.msk.msra.mxu0 %vm945_vm4, %v3277_v38  ;;  %4755 = vmatprep.mubr.msk.f32.mxu0 %vm5328_vm3, %v5329_v53  ;;  %v4957_v38 = vpack.c.bf16 %v4219_v37, %v4218_v36 }
0x1266   : > { %4950 = vmatprep.subr.bf16.mxu0 %v5327_v50 }
0x1268   : > { %4756 = vmatmul.mubr.msk.f32.vlgmr.msra.gmra.mrb[56].mxu0 %vm945_vm4, %v3267_v47 }
0x1269   : > { %4770 = vmatprep.mubr.msk.f32.mxu0 %vm5328_vm3, %v5329_v53 }
0x12ea   : > { %v2737_v39 = vpop.f32.mrb[38].mxu0 }
0x12eb   : > { %2751 = vst.msk [vmem:[#allocation3] sm:$0xff] %vm945_vm4, %v2737_v39  ;;  %v4682_v49 = vpop.f32.mrb[39].mxu0 }
0x12ee   : > { %v2742_v51 = vpop.f32.mrb[40].mxu0 }
0x12ef   : > { %2752 = vst.msk [vmem:[#allocation3 + $0x8] sm:$0xff] %vm945_vm4, %v2742_v51  ;;  %v4685_v52 = vpop.f32.mrb[41].mxu0 }
0x131f   : > { %v2747_v55 = vpop.f32.mrb[42].mxu0 }
0x1320   : > { %2753 = vst.msk [vmem:[#allocation3 + $0x10] sm:$0xff] %vm945_vm4, %v2747_v55  ;;  %v4688_v56 = vpop.f32.mrb[43].mxu0 }
0x1323   : > { %v2981_v57 = vpop.f32.mrb[44].mxu0 }
0x1324   : > { %v4712_v54 = vpop.f32.mrb[45].mxu0 }
0x1327   : > { %v6238_v58 = vpop.f32.mrb[46].mxu0 }
0x1328   : > { %v4715_v59 = vpop.f32.mrb[47].mxu0 }
0x132b   : > { %v6240_v61 = vpop.f32.mrb[48].mxu0 }
0x132c   : > { %v4718_v62 = vpop.f32.mrb[49].mxu0 }
0x132f   : > { %v3237_v63 = vpop.f32.mrb[50].mxu0 }
0x1330   : > { %v4742_v60 = vpop.f32.mrb[51].mxu0 }
0x1333   : > { %v6242_v0 = vpop.f32.mrb[52].mxu0 }
0x1334   : > { %v4745_v1 = vpop.f32.mrb[53].mxu0 }
0x1337   : > { %v6244_v2 = vpop.f32.mrb[54].mxu0 }
0x1338   : > { %v4748_v3 = vpop.f32.mrb[55].mxu0 }
0x1339   : > { %v6305_v3 = vld [vmem:[%s6514_s10 + $0x1] ss:$0 sm:$0xff] }
0x133b   : > { %v3356_v4 = vpop.f32.mrb[56].mxu0 }
0x133c   : > { %v3370_v5 = vmul.f32 0.35355338, %v3356_v4  ;;  %v4757_v6 = vpop.f32.mrb[57].mxu0 }
0x133e   : > { %v3373_v7 = vadd.f32 %v3370_v5, %v5629_v35 }
0x1340   : > { %v3376_v41 = vsel %vm1044_vm7, %v3373_v7, -inf }
0x1341   : > { %3377 = vmax.xlane.f32.xlu1 %v3376_v41 }
0x1352   : > { %3413 = vrot.lane.b32.xlu1 %v6043_v48, %s6597_s23 }
0x1356   : > { %3268 = vrot.lane.b32.xlu1 %v6031_v42, %s6596_s4 }
0x135a   : > { %2998 = vrot.lane.b32.xlu1 %v2981_v57, %s6586_s2 }
0x13ce   : > { %v3378_v8 = vpop.xlane.xlu1 %3377 }
0x13cf   : > { %v3385_v9 = vsub.f32 %v3373_v7, %v3378_v8 }
0x13d1   : > { %v3388_v10 = vmul.f32 1.442695, %v3385_v9 }
0x13d2   : > { %v3414_v11 = vpop.permute.xlu1 %3413 }
0x13d3   : > { %5232 = vpow2.f32 %v3388_v10 }
0x13d6   : > { %v3269_v12 = vpop.permute.xlu1 %3268 }
0x13d7   : > { %4759 = vmatmul.mubr.msk.f32.vlgmr.msra.gmra.mrb[60].mxu1 %vm945_vm4, %v3269_v12 }
0x13d8   : > { %4761 = vmatprep.mubr.msk.f32.mxu1 %vm5328_vm3, %v5329_v53  ;;  %4955 = vmatpush3.bf16.msra.mxu1 %v4954_v34 }
0x13d9   : > { %4956 = vmatprep.subr.bf16.mxu1 %v5327_v50 }
0x13da   : > { %v2999_v13 = vpop.permute.xlu1 %2998 }
0x13db   : > { %3007 = vst.msk [vmem:[#allocation3] sm:$0xff] %vm1432_vm8, %v2999_v13 }
0x13dc   : > { %4958 = vmatpush3.bf16.msra.mxu1 %v4957_v38 }
0x13dd   : > { %v5233_v14 = vpop.eup %5232  ;;  %4965 = vmatprep.subr.bf16.mxu1 %v5327_v50 }
0x13de   : > { %v3394_v15 = vsel %vm1044_vm7, %v5233_v14, 0.0 }
0x13df   : > { %3395 = vadd.xlane.f32.xlu0 %v3394_v15 }
0x13f5   : > { %5120 = vrot.lane.b32.xlu0 %v6035_v44, %s6597_s23  ;;  %s5267_s23 = sshll.u32 %s5345_s3, 4  ;;  %s5268_s23 = int_to_ptr.vmem [resolvable:$false] %s5267_s23 }
0x13f9   : > { %3270 = vrot.lane.b32.xlu0 %v6043_v48, %s6596_s4 }
0x13fd   : > { %3254 = vrot.lane.b32.xlu0 %v3237_v63, %s6598_s0 }
0x146c   : > { %v3396_v42 = vpop.xlane.xlu0 %3395 }
0x146d   : > { %5234 = vrcp.f32 %v3396_v42 }
0x1470   : > { %v5121_v16 = vpop.permute.xlu0 %5120 }
0x1471   : > { %v5123_v18 = vunpack.i.h.bf16 %v5121_v16  ;;  %v5122_v19 = vunpack.i.l.bf16 %v5121_v16 }
0x1473   : > { %v4951_v17 = vpack.c.bf16 %v5123_v18, %v5122_v19 }
0x1474   : > { %v3271_v22 = vpop.permute.xlu0 %3270 }
0x1475   : > { %4762 = vmatmul.mubr.msk.f32.gmra.mrb[62].mxu1 %vm945_vm4, %v3271_v22  ;;  %4952 = vmatpush3.bf16.msra.mxu0 %v4951_v17  ;;  %v4231_v17 = vld [vmem:[%s6517_s13 + $0x30] sm:$0xff] }
0x1476   : > { %4768 = vmatprep.subr.mxu0 %v5329_v53  ;;  %4787 = vmatprep.mubr.msk.f32.mxu1 %vm5328_vm3, %v5329_v53 }
0x1477   : > { %v5235_v44 = vpop.eup %5234 }
0x1478   : > { %v3406_v24 = vmul.f32 %v5235_v44, %v5233_v14  ;;  %v3255_v48 = vpop.permute.xlu0 %3254 }
0x1479   : > { %3263 = vst.msk [vmem:[#allocation3] sm:$0xff] %vm1689_vm9, %v3255_v48  ;;  %4769 = vmatpush3.msra.mxu0 %v3414_v11 }
0x147a   : > { %4771 = vmatmul.mubr.msk.f32.vlgmr.msra.gmra.mrb[58].mxu0 %vm1044_vm7, %v3406_v24  ;;  %4959 = vmatprep.subr.bf16.mxu0 %v5327_v50 }
0x147b   : > { %4773 = vmatprep.mubr.msk.f32.mxu0 %vm5328_vm3, %v5329_v53 }
0x14aa   : > { %v3361_v25 = vpop.f32.mrb[60].mxu1 }
0x14ab   : > { %v3371_v26 = vmul.f32 0.35355338, %v3361_v25  ;;  %v4760_v27 = vpop.f32.mrb[61].mxu1 }
0x14ad   : > { %v3374_v29 = vadd.f32 %v3371_v26, %v5629_v35 }
0x14af   : > { %v3379_v21 = vsel %vm1044_vm7, %v3374_v29, -inf }
0x14b0   : > { %3380 = vmax.xlane.f32.xlu0 %v3379_v21 }
0x153d   : > { %v3381_v31 = vpop.xlane.xlu0 %3380 }
0x153e   : > { %v3386_v32 = vsub.f32 %v3374_v29, %v3381_v31 }
0x1540   : > { %v3390_v33 = vmul.f32 1.442695, %v3386_v32 }
0x1542   : > { %5236 = vpow2.f32 %v3390_v33  ;;  %v6351_v33 = vld [vmem:[%s6515_s11 + $0x1] ss:$0 sm:$0xff] }
0x1548   : > { %v3366_v30 = vpop.f32.mrb[62].mxu1 }
0x1549   : > { %v4763_v43 = vpop.f32.mrb[63].mxu1  ;;  %v3372_v51 = vmul.f32 0.35355338, %v3366_v30  ;;  %v4238_v30 = vld [vmem:[%s6519_s15 + $0x40] sm:$0xff] }
0x154a   : > { %v4239_v43 = vld [vmem:[%s6519_s15 + $0x48] sm:$0xff] }
0x154b   : > { %v3375_v52 = vadd.f32 %v3372_v51, %v5629_v35  ;;  %v4242_v51 = vld [vmem:[%s6519_s15 + $0x60] sm:$0xff] }
0x154c   : > { %v5237_v28 = vpop.eup %5236 }
0x154d   : > { %v3493_v47 = vpop.f32.mrb[58].mxu0  ;;  %v3397_v39 = vsel %vm1044_vm7, %v5237_v28, 0.0  ;;  %v3382_v55 = vsel %vm1044_vm7, %v3375_v52, -inf }
0x154e   : > { %3510 = vrot.lane.b32.xlu1 %v3493_v47, %s6599_s1  ;;  %v4772_v49 = vpop.f32.mrb[59].mxu0  ;;  %3398 = vadd.xlane.f32.xlu0 %v3397_v39  ;;  %v4240_v47 = vld [vmem:[%s6519_s15 + $0x50] sm:$0xff]  ;;  %v4241_v39 = vld [vmem:[%s6519_s15 + $0x58] sm:$0xff] }
0x154f   : > { %v4969_v49 = vpack.c.bf16 %v4241_v39, %v4240_v47 }
0x1572   : > { %3383 = vmax.xlane.f32.xlu1 %v3382_v55 }
0x1583   : > { %3256 = vrot.lane.b32.xlu1 %v6242_v0, %s6598_s0 }
0x15c0   : > { %v3511_v56 = vpop.permute.xlu1 %3510 }
0x15c1   : > { %3519 = vst.msk [vmem:[#allocation3] sm:$0xff] %vm1946_vm10, %v3511_v56  ;;  %v4244_v56 = vld [vmem:[%s6519_s15 + $0x70] sm:$0xff] }
0x15c8   : > { %v3522_v57 = vld [vmem:[#allocation3] sm:$0xff] }
0x15c9   : > { %4788 = vmatmul.mubr.msk.f32.vlgmr.msra.gmra.mrb[64].mxu1 %vm754_vm1, %v3522_v57  ;;  %v4245_v57 = vld [vmem:[%s6519_s15 + $0x78] sm:$0xff] }
0x15ca   : > { %4790 = vmatprep.mubr.msk.f32.mxu1 %vm5328_vm3, %v5329_v53 }
0x15db   : > { %v3399_v54 = vpop.xlane.xlu0 %3398 }
0x15dc   : > { %5238 = vrcp.f32 %v3399_v54  ;;  %v4975_v54 = vpack.c.bf16 %v4245_v57, %v4244_v56  ;;  %v3954_v57 = vld [vmem:[%s6523_s19] sm:$0xff] }
0x15e6   : > { %v5239_v59 = vpop.eup %5238 }
0x15e7   : > { %v3407_v62 = vmul.f32 %v5239_v59, %v5237_v28  ;;  %v4966_v28 = vpack.c.bf16 %v4239_v43, %v4238_v30 }
0x15e9   : > { %4774 = vmatmul.mubr.msk.f32.gmra.mrb[60].mxu0 %vm1044_vm7, %v3407_v62  ;;  %4967 = vmatpush3.bf16.msra.mxu1 %v4966_v28 }
0x15ea   : > { %4776 = vmatprep.mubr.msk.f32.mxu0 %vm5328_vm3, %v5329_v53  ;;  %4968 = vmatprep.subr.bf16.mxu1 %v5327_v50 }
0x15ed   : > { %4970 = vmatpush3.bf16.msra.mxu1 %v4969_v49 }
0x15ee   : > { %4971 = vmatprep.subr.bf16.mxu1 %v5327_v50 }
0x15ff   : > { %v3384_v35 = vpop.xlane.xlu1 %3383 }
0x1600   : > { %v3387_v63 = vsub.f32 %v3375_v52, %v3384_v35  ;;  %v4243_v52 = vld [vmem:[%s6519_s15 + $0x68] sm:$0xff] }
0x1601   : > { %v4972_v55 = vpack.c.bf16 %v4243_v52, %v4242_v51 }
0x1602   : > { %v3392_v60 = vmul.f32 1.442695, %v3387_v63 }
0x1603   : > { %v3257_v42 = vpop.permute.xlu1 %3256  ;;  %4973 = vmatpush3.bf16.msra.mxu1 %v4972_v55 }
0x1604   : > { %5240 = vpow2.f32 %v3392_v60  ;;  %4974 = vmatprep.subr.bf16.mxu1 %v5327_v50 }
0x1607   : > { %4976 = vmatpush3.bf16.msra.mxu1 %v4975_v54  ;;  %v3956_v54 = vld [vmem:[%s6523_s19 + $0x10] sm:$0xff] }
0x160e   : > { %v5241_v0 = vpop.eup %5240 }
0x160f   : > { %v3400_v1 = vsel %vm1044_vm7, %v5241_v0, 0.0 }
0x1610   : > { %3401 = vadd.xlane.f32.xlu0 %v3400_v1 }
0x169c   : > { %v3613_v4 = vpop.f32.mrb[64].mxu1 }
0x169d   : > { %v3614_v5 = vadd.f32 %v6305_v3, %v3613_v4  ;;  %v3402_v6 = vpop.xlane.xlu0 %3401  ;;  %v4789_v7 = vpop.f32.mrb[65].mxu1 }
0x169e   : > { %5242 = vrcp.f32 %v3402_v6 }
0x169f   : > { %v6309_v41 = vadd.f32 %v3614_v5, %v5977_v40 }
0x16a1   : > { %v3634_v8 = vsel %vm754_vm1, %v6309_v41, 0.0 }
0x16a2   : > { %3635 = vadd.xlane.f32.xlu0 %v3634_v8 }
0x16a8   : > { %v5243_v9 = vpop.eup %5242 }
0x16a9   : > { %v3408_v10 = vmul.f32 %v5243_v9, %v5241_v0  ;;  %v6400_v0 = vld [vmem:[%s6518_s14 + $0x1] ss:$0 sm:$0xff] }
0x16ab   : > { %4777 = vmatmul.mubr.msk.f32.gmra.mrb[62].mxu0 %vm1044_vm7, %v3408_v10 }
0x16ac   : > { %4804 = vmatprep.mubr.msk.f32.mxu0 %vm5328_vm3, %v5329_v53 }
0x16b8   : > { %3000 = vrot.lane.b32.xlu0 %v6238_v58, %s6586_s2  ;;  %v4229_v58 = vld [vmem:[%s6517_s13 + $0x20] sm:$0xff] }
0x16bc   : > { %v3498_v11 = vpop.f32.mrb[60].mxu0  ;;  %3258 = vrot.lane.b32.xlu0 %v6244_v2, %s6598_s0  ;;  %v4230_v2 = vld [vmem:[%s6517_s13 + $0x28] sm:$0xff]  ;;  %s5269_s0 = scalar_lea.vmem %s5268_s23, 32 }
0x16bd   : > { %v4775_v40 = vpop.f32.mrb[61].mxu0  ;;  %v4960_v19 = vpack.c.bf16 %v4230_v2, %v4229_v58 }
0x16bf   : > { %4961 = vmatpush3.bf16.msra.mxu0 %v4960_v19 }
0x16c0   : > { %4962 = vmatprep.subr.bf16.mxu0 %v5327_v50 }
0x172f   : > { %v3636_v12 = vpop.xlane.xlu0 %3635 }
0x1730   : > { %v3643_v13 = vmul.f32 0.03125, %v3636_v12 }
0x1732   : > { %v3646_v14 = vsub.f32 %v6309_v41, %v3643_v13 }
0x1733   : > { %v3001_v15 = vpop.permute.xlu0 %3000 }
0x1734   : > { %3008 = vst.msk [vmem:[#allocation3 + $0x8] sm:$0xff] %vm1432_vm8, %v3001_v15  ;;  %v3649_v16 = vmul.f32 %v3646_v14, %v3646_v14 }
0x1735   : > { %3264 = vst.msk [vmem:[#allocation3 + $0x8] sm:$0xff] %vm1689_vm9, %v3257_v42 }
0x1736   : > { %v3652_v18 = vsel %vm754_vm1, %v3649_v16, 0.0 }
0x1737   : > { %3653 = vadd.xlane.f32.xlu1 %v3652_v18  ;;  %v3259_v21 = vpop.permute.xlu0 %3258 }
0x1748   : > { %3512 = vrot.lane.b32.xlu1 %v3498_v11, %s6599_s1 }
0x174c   : > { %3002 = vrot.lane.b32.xlu1 %v6240_v61, %s6586_s2  ;;  %v4232_v61 = vld [vmem:[%s6517_s13 + $0x38] sm:$0xff]  ;;  %s648_s2 = scalar_lea.vmem [#allocation4], %s647_s6 }
0x174d   : > { %v4963_v22 = vpack.c.bf16 %v4232_v61, %v4231_v17 }
0x174f   : > { %4964 = vmatpush3.bf16.msra.mxu0 %v4963_v22 }
0x1750   : > { %4977 = vmatprep.subr.bf16.mxu0 %v5327_v50 }
0x177e   : > { %v3503_v44 = vpop.f32.mrb[62].mxu0 }
0x177f   : > { %v4778_v24 = vpop.f32.mrb[63].mxu0  ;;  %3514 = vrot.lane.b32.xlu1 %v3503_v44, %s6599_s1  ;;  %s4047_s1 = sshll.u32 %s648_s2, 4  ;;  %s6463_s1 = int_to_ptr.vmem [resolvable:$true] %s4047_s1 }
0x1780   : > { %s5263_s4 = scalar_lea.vmem %s6463_s1, 16  ;;  %p5270_p0 = scmp.lt.s32.totalorder %s6463_s1, %s5268_s23 }
0x1781   : > { %p5264_p11 = scmp.ne.s32.totalorder %s6463_s1, %s5263_s4  ;;  %p5271_p1 = scmp.lt.s32.totalorder %s5269_s0, %s5263_s4 }
0x1783   : > { %p5265_p12 = pnand %p5264_p11, %p5494_p5  ;;  %p5272_p2 = por %p5271_p1, %p5270_p0 }
0x1785   : > { %p5266_p13 = pneg %p5265_p12 }
0x1787   : > { %p5273_p3 = pnand %p5272_p2, %p5266_p13 }
0x17c4   : > { %v3654_v48 = vpop.xlane.xlu1 %3653 }
0x17c5   : > { %v3661_v25 = vmul.f32 0.03125, %v3654_v48 }
0x17c7   : > { %v3664_v26 = vadd.f32 1e-12, %v3661_v25 }
0x17c8   : > { %v3513_v27 = vpop.permute.xlu1 %3512 }
0x17c9   : > { %5244 = vrsqrt.f32 %v3664_v26  ;;  %3520 = vst.msk [vmem:[#allocation3 + $0x8] sm:$0xff] %vm1946_vm10, %v3513_v27 }
0x17cc   : > { %v3003_v29 = vpop.permute.xlu1 %3002 }
0x17cd   : > { %3009 = vst.msk [vmem:[#allocation3 + $0x10] sm:$0xff] %vm1432_vm8, %v3003_v29 }
0x17ce   : > { %3265 = vst.msk [vmem:[#allocation3 + $0x10] sm:$0xff] %vm1689_vm9, %v3259_v21 }
0x17d0   : > { %v3523_v31 = vld [vmem:[#allocation3 + $0x8] sm:$0xff] }
0x17d1   : > { %4791 = vmatmul.mubr.msk.f32.gmra.mrb[66].mxu1 %vm754_vm1, %v3523_v31 }
0x17d2   : > { %4793 = vmatprep.mubr.msk.f32.mxu1 %vm5328_vm3, %v5329_v53 }
0x17d3   : > { %v5245_v32 = vpop.eup %5244 }
0x17d4   : > { %v3670_v20 = vmul.f32 %v5245_v32, %v3646_v14 }
0x17d6   : > { %v3679_v34 = vmul.f32 %v6351_v33, %v3670_v20 }
0x17d8   : > { %v3688_v36 = vadd.f32 %v6356_v23, %v3679_v34 }
0x17da   : > { %4805 = vmatmul.mubr.msk.f32.vlgmr.msra.gmra.mrb[64].mxu0 %vm754_vm1, %v3688_v36 }
0x17db   : > { %4807 = vmatprep.mubr.msk.f32.mxu0 %vm5328_vm3, %v5329_v53 }
0x17f1   : > { %v3515_v37 = vpop.permute.xlu1 %3514 }
0x17f2   : > { %3521 = vst.msk [vmem:[#allocation3 + $0x10] sm:$0xff] %vm1946_vm10, %v3515_v37 }
0x17f9   : > { %v3524_v38 = vld [vmem:[#allocation3 + $0x10] sm:$0xff] }
0x17fa   : > { %4794 = vmatmul.mubr.msk.f32.gmra.mrb[68].mxu1 %vm754_vm1, %v3524_v38 }
0x17fb   : > { %4829 = vmatprep.mubr.msk.f32.mxu1 %vm5328_vm3, %v5329_v53 }
0x18a4   : > { %v3618_v59 = vpop.f32.mrb[66].mxu1 }
0x18a5   : > { %v3619_v62 = vadd.f32 %v6305_v3, %v3618_v59  ;;  %v4792_v35 = vpop.f32.mrb[67].mxu1  ;;  %v3957_v59 = vld [vmem:[%s6523_s19 + $0x18] sm:$0xff] }
0x18a7   : > { %v3628_v63 = vadd.f32 %v3619_v62, %v5982_v45  ;;  %v4981_v62 = vpack.c.bf16 %v3957_v59, %v3956_v54 }
0x18a9   : > { %v3637_v60 = vsel %vm754_vm1, %v3628_v63, 0.0 }
0x18aa   : > { %3638 = vadd.xlane.f32.xlu0 %v3637_v60 }
0x18ad   : > { %v3779_v1 = vpop.f32.mrb[64].mxu0 }
0x18ae   : > { %v3780_v4 = vadd.f32 %v6400_v0, %v3779_v1  ;;  %v4806_v5 = vpop.f32.mrb[65].mxu0 }
0x18b0   : > { %v3793_v6 = vmul.f32 %v3780_v4, %v3780_v4 }
0x18b2   : > { %v3796_v7 = vmul.f32 %v3793_v6, %v3780_v4 }
0x18b4   : > { %v3799_v8 = vmul.f32 0.044715, %v3796_v7 }
0x18b6   : > { %v3802_v9 = vadd.f32 %v3799_v8, %v3780_v4 }
0x18b8   : > { %v3805_v10 = vmul.f32 0.7978846, %v3802_v9 }
0x18ba   : > { %5246 = vtanh.f32 %v3805_v10 }
0x18c4   : > { %v5247_v11 = vpop.eup %5246 }
0x18c5   : > { %v3811_v45 = vadd.f32 1.0, %v5247_v11 }
0x18c7   : > { %v3814_v40 = vmul.f32 0.5, %v3811_v45 }
0x18c9   : > { %v3817_v12 = vmul.f32 %v3814_v40, %v3780_v4 }
0x18cb   : > { %4830 = vmatmul.mubr.msk.f32.vlgmr.msra.gmra.mrb[70].mxu1 %vm2257_vm11, %v3817_v12 }
0x18cc   : > { %4832 = vmatprep.mubr.msk.f32.mxu1 %vm5328_vm3, %v5329_v53 }
0x18cd   : > { %v3623_v13 = vpop.f32.mrb[68].mxu1 }
0x18ce   : > { %v3624_v14 = vadd.f32 %v6305_v3, %v3623_v13  ;;  %v4795_v15 = vpop.f32.mrb[69].mxu1  ;;  %v4251_v13 = vld [vmem:[%s6521_s17] ss:$0 sm:$0xff] }
0x18cf   : > { %v4252_v15 = vld [vmem:[%s6522_s18] ss:$0 sm:$0xff] }
0x18d0   : > { %v3629_v42 = vadd.f32 %v3624_v14, %v5987_v46  ;;  %v4247_v46 = vld [vmem:[%s6520_s16 + $0x1] ss:$0 sm:$0xff] }
0x18d2   : > { %v3640_v16 = vsel %vm754_vm1, %v3629_v42, 0.0 }
0x18d3   : > { %3641 = vadd.xlane.f32.xlu1 %v3640_v16 }
0x1937   : > { %v3639_v18 = vpop.xlane.xlu0 %3638 }
0x1938   : > { %v3644_v58 = vmul.f32 0.03125, %v3639_v18 }
0x193a   : > { %v3647_v2 = vsub.f32 %v3628_v63, %v3644_v58 }
0x193c   : > { %v3650_v19 = vmul.f32 %v3647_v2, %v3647_v2 }
0x193e   : > { %v3655_v17 = vsel %vm754_vm1, %v3650_v19, 0.0 }
0x193f   : > { %3656 = vadd.xlane.f32.xlu0 %v3655_v17 }
0x1960   : > { %v3642_v61 = vpop.xlane.xlu1 %3641 }
0x1961   : > { %v3645_v22 = vmul.f32 0.03125, %v3642_v61 }
0x1963   : > { %v3648_v44 = vsub.f32 %v3629_v42, %v3645_v22 }
0x1965   : > { %v3651_v24 = vmul.f32 %v3648_v44, %v3648_v44 }
0x1967   : > { %v3658_v48 = vsel %vm754_vm1, %v3651_v24, 0.0 }
0x1968   : > { %3659 = vadd.xlane.f32.xlu0 %v3658_v48 }
0x199e   : > { %v3912_v3 = vpop.f32.mrb[70].mxu1 }
0x199f   : > { %v3913_v25 = vadd.f32 %v4247_v46, %v3912_v3  ;;  %v4831_v26 = vpop.f32.mrb[71].mxu1 }
0x19a1   : > { %v3924_v27 = vadd.f32 %v3913_v25, %v6309_v41 }
0x19a3   : > { %v3927_v29 = vsel %vm754_vm1, %v3924_v27, 0.0 }
0x19a4   : > { %3928 = vadd.xlane.f32.xlu0 %v3927_v29 }
0x19cc   : > { %v3657_v21 = vpop.xlane.xlu0 %3656 }
0x19cd   : > { %v3662_v31 = vmul.f32 0.03125, %v3657_v21 }
0x19cf   : > { %v3665_v32 = vadd.f32 1e-12, %v3662_v31 }
0x19d1   : > { %5248 = vrsqrt.f32 %v3665_v32 }
0x19db   : > { %v5249_v20 = vpop.eup %5248 }
0x19dc   : > { %v3671_v34 = vmul.f32 %v5249_v20, %v3647_v2 }
0x19de   : > { %v3680_v36 = vmul.f32 %v6351_v33, %v3671_v34 }
0x19e0   : > { %v3689_v37 = vadd.f32 %v6356_v23, %v3680_v36 }
0x19e2   : > { %4808 = vmatmul.mubr.msk.f32.gmra.mrb[66].mxu0 %vm754_vm1, %v3689_v37 }
0x19e3   : > { %4810 = vmatprep.mubr.msk.f32.mxu0 %vm5328_vm3, %v5329_v53 }
0x19f5   : > { %v3660_v38 = vpop.xlane.xlu0 %3659 }
0x19f6   : > { %v3663_v41 = vmul.f32 0.03125, %v3660_v38 }
0x19f8   : > { %v3666_v30 = vadd.f32 1e-12, %v3663_v41 }
0x19fa   : > { %5250 = vrsqrt.f32 %v3666_v30 }
0x1a04   : > { %v5251_v43 = vpop.eup %5250 }
0x1a05   : > { %v3672_v28 = vmul.f32 %v5251_v43, %v3648_v44 }
0x1a07   : > { %v3681_v47 = vmul.f32 %v6351_v33, %v3672_v28  ;;  %v3955_v33 = vld [vmem:[%s6523_s19 + $0x8] sm:$0xff] }
0x1a09   : > { %v3690_v39 = vadd.f32 %v6356_v23, %v3681_v47  ;;  %v4978_v23 = vpack.c.bf16 %v3955_v33, %v3954_v57 }
0x1a0b   : > { %4811 = vmatmul.mubr.msk.f32.gmra.mrb[68].mxu0 %vm754_vm1, %v3690_v39 }
0x1a0c   : > { %4846 = vmatprep.mubr.msk.f32.mxu0 %vm5328_vm3, %v5329_v53  ;;  %4979 = vmatpush3.bf16.msra.mxu0 %v4978_v23 }
0x1a0d   : > { %4980 = vmatprep.subr.bf16.mxu0 %v5327_v50 }
0x1a10   : > { %4982 = vmatpush3.bf16.msra.mxu0 %v4981_v62 }
0x1a31   : > { %v3929_v49 = vpop.xlane.xlu0 %3928 }
0x1a32   : > { %v3930_v51 = vmul.f32 0.03125, %v3929_v49 }
0x1a34   : > { %v3931_v52 = vsub.f32 %v3924_v27, %v3930_v51 }
0x1a36   : > { %v3932_v55 = vmul.f32 %v3931_v52, %v3931_v52 }
0x1a38   : > { %v3933_v56 = vsel %vm754_vm1, %v3932_v55, 0.0 }
0x1a39   : > { %3934 = vadd.xlane.f32.xlu1 %v3933_v56 }
0x1ab5   : > { %v3784_v35 = vpop.f32.mrb[66].mxu0 }
0x1ab6   : > { %v3785_v63 = vadd.f32 %v6400_v0, %v3784_v35  ;;  %v4809_v60 = vpop.f32.mrb[67].mxu0 }
0x1ab8   : > { %v3794_v1 = vmul.f32 %v3785_v63, %v3785_v63 }
0x1aba   : > { %v3797_v4 = vmul.f32 %v3794_v1, %v3785_v63 }
0x1abc   : > { %v3800_v5 = vmul.f32 0.044715, %v3797_v4 }
0x1abe   : > { %v3803_v6 = vadd.f32 %v3800_v5, %v3785_v63 }
0x1ac0   : > { %v3806_v7 = vmul.f32 0.7978846, %v3803_v6 }
0x1ac2   : > { %5252 = vtanh.f32 %v3806_v7 }
0x1ac6   : > { %v3935_v50 = vpop.xlane.xlu1 %3934 }
0x1ac7   : > { %v3936_v8 = vmul.f32 0.03125, %v3935_v50 }
0x1ac9   : > { %v3937_v9 = vadd.f32 1e-12, %v3936_v8 }
0x1acb   : > { %5254 = vrsqrt.f32 %v3937_v9 }
0x1acc   : > { %v5253_v10 = vpop.eup %5252 }
0x1acd   : > { %v3812_v11 = vadd.f32 1.0, %v5253_v10 }
0x1acf   : > { %v3815_v45 = vmul.f32 0.5, %v3812_v11 }
0x1ad1   : > { %v3818_v40 = vmul.f32 %v3815_v45, %v3785_v63 }
0x1ad3   : > { %4833 = vmatmul.mubr.msk.f32.gmra.mrb[72].mxu1 %vm2257_vm11, %v3818_v40 }
0x1ad4   : > { %4835 = vmatprep.mubr.msk.f32.mxu1 %vm5328_vm3, %v5329_v53 }
0x1ad5   : > { %v5255_v12 = vpop.eup %5254 }
0x1ad6   : > { %v3939_v14 = vmul.f32 %v5255_v12, %v3931_v52 }
0x1ad8   : > { %v3946_v42 = vmul.f32 %v4251_v13, %v3939_v14 }
0x1ada   : > { %v3953_v16 = vadd.f32 %v4252_v15, %v3946_v42 }
0x1adc   : > { %4847 = vmatmul.mubr.msk.f32.vlgmr.msra.gmra.mrb[70].mxu0 %vm754_vm1, %v3953_v16 }
0x1ade   : > { %v3789_v18 = vpop.f32.mrb[68].mxu0 }
0x1adf   : > { %v3790_v58 = vadd.f32 %v6400_v0, %v3789_v18  ;;  %v4812_v2 = vpop.f32.mrb[69].mxu0  ;;  %v3958_v0 = vld [vmem:[%s6524_s20] sm:$0x1] }
0x1ae1   : > { %v3795_v19 = vmul.f32 %v3790_v58, %v3790_v58 }
0x1ae3   : > { %v3798_v53 = vmul.f32 %v3795_v19, %v3790_v58 }
0x1ae5   : > { %v3801_v17 = vmul.f32 0.044715, %v3798_v53 }
0x1ae7   : > { %v3804_v61 = vadd.f32 %v3801_v17, %v3790_v58 }
0x1ae9   : > { %v3807_v22 = vmul.f32 0.7978846, %v3804_v61 }
0x1aeb   : > { %5256 = vtanh.f32 %v3807_v22 }
0x1af5   : > { %v5257_v44 = vpop.eup %5256 }
0x1af6   : > { %v3813_v24 = vadd.f32 1.0, %v5257_v44 }
0x1af8   : > { %v3816_v48 = vmul.f32 0.5, %v3813_v24 }
0x1afa   : > { %v3819_v46 = vmul.f32 %v3816_v48, %v3790_v58 }
0x1afc   : > { %4836 = vmatmul.mubr.msk.f32.gmra.mrb[74].mxu1 %vm2257_vm11, %v3819_v46 }
0x1ba6   : > { %v3917_v3 = vpop.f32.mrb[72].mxu1 }
0x1ba7   : > { %v4834_v25 = vpop.f32.mrb[73].mxu1 }
0x1baf   : > { %v4028_v26 = vpop.f32.mrb[70].mxu0 }
0x1bb0   : > { %v4029_v27 = vadd.f32 %v4028_v26, %v3958_v0  ;;  %v4848_v29 = vpop.f32.mrb[71].mxu0 }
0x1bb2   : > { %5258 = vtanh.f32 %v4029_v27 }
0x1bbc   : > { %v5259_v21 = vpop.eup %5258 }
0x1bbd   : > { %4033 = vst.msk [vmem:[%s648_s2] sm:$0x1] %vm761_vm2, %v5259_v21 }
0x1bbe   : > { %5276 = shalt.err (!%p5273_p3)
}
0x1bbf   : > { %s5277_s6 = scalar_lea.hbm %s6461_s22, 16  ;;  %s5281_s29 = scalar_lea.hbm %s6525_s21, 32 }
0x1bc0   : > { %p5278_p4 = scmp.ne.s32.totalorder %s6461_s22, %s5277_s6  ;;  %p5282_p9 = scmp.lt.u32.totalorder %s6461_s22, %s6525_s21 }
0x1bc1   : > { %p5283_p10 = scmp.lt.u32.totalorder %s5281_s29, %s5277_s6  ;;  %p5285_p12 = scmp.lt.u32.totalorder %s5277_s6, %s6461_s22 }
0x1bc2   : > { %p5279_p7 = pnand %p5278_p4, %p5494_p5 }
0x1bc3   : > { %p5284_p11 = por %p5283_p10, %p5282_p9 }
0x1bc4   : > { %p5280_p8 = pneg %p5279_p7 }
0x1bc5   : > { %p5286_p13 = por %p5285_p12, %p5284_p11 }
0x1bc7   : > { %p5287_p0 = pnand %p5286_p13, %p5280_p8 }
0x1bc9   : > { %5290 = shalt.err (!%p5287_p0)
}
0x1bca   : > { %4987 = dma.vmem_to_hbm [thread:$0]  (%p5494_p5), %s6463_s1, 16, %s6461_s22, %s4035_s28  }
0x1bcf   : > { %v3921_v31 = vpop.f32.mrb[74].mxu1 }
0x1bd0   : > { %v4837_v32 = vpop.f32.mrb[75].mxu1 }
0x1bd1 PF: > { %s6600_s4 = sld [smem:[#allocation7_spill]]  ;;  %p4993_p1 = scmp.ge.s32.totalorder %s5325_s27, 2 }
0x1bd3   : > { %p4990_p2 = pnand %p4993_p1, %p5498_p6 }
0x1bd7   : > { %s4059_s26 = sand.u32 1, %s6600_s4  }
0x1bd8   : > { %s4060_s2 = scalar_lea.sflag [#allocation5], %s4059_s26 }
0x1bd9   : > { %5308 = dma.done.wait (!%p4990_p2), %s4060_s2, 16  }
0x1bda   : > { %5310 = vsyncadd (!%p4990_p2), %s4060_s2, 4294967280  ;;  %s6602_s27 = sld [smem:[#allocation9_spill]]  ;;  %s6603_s6 = sld [smem:[#allocation8_spill]] }
0x1bdb   : > { %s6604_s26 = sld [smem:[#allocation10_spill]]  ;;  %s6605_s2 = smov %s5317_s25 }
0x1be0   : > { %p31_p3 = scmp.ge.s32.totalorder %s6602_s27, 4   ;;  %s6606_s25 = smov %s6603_s6 }
0x1be2   :  { %33 = sbr.rel (!%p31_p3) target bundleno = 11 (0xb), region = 151 }
0x1be9   :  { %4064 = vsyncpa [#allocation5], 1 }
0x1bea   :  { %4066 = vsyncpa [#allocation5 + $0x1], 1 }

</bundles_post_ra>
